<compile_context>
chip_gen: v7x
topology: tpu7x:2x2x1
jax: 0.10.0
libtpu: 0.0.40
codegen_flags: <defaults>
</compile_context>

<pallas_src>
import functools
import math

import jax
import jax.numpy as jnp
from jax.experimental import pallas as pl
from jax.experimental.pallas import tpu as pltpu

_BN_EPS = 1e-3   # nn.BatchNorm2d(c2, eps=0.001, momentum=0.03)


# ----------------------------------------------------------------------------
# Kernel 1: M-tiled matmul (bf16 in, f32 accum) + per-tile partial BN stats
# ----------------------------------------------------------------------------
def _matmul_stats_kernel(p_ref, w_ref, y_ref, stat_ref, *, k_steps):
    part = jnp.dot(p_ref[...], w_ref[...], preferred_element_type=jnp.float32)

    def write_stats(y):
        c = y.shape[-1]
        s = jnp.sum(y, axis=0, keepdims=True)          # (1, C) channel sum
        s2 = jnp.sum(y * y, axis=0, keepdims=True)     # (1, C) channel sum of squares
        row = jax.lax.broadcasted_iota(jnp.int32, (8, c), 0)
        stats = jnp.where(row == 0, s, jnp.where(row == 1, s2, 0.0))
        stat_ref[...] = stats[None]                    # (1, 8, C) sublane-padded tile

    if k_steps == 1:
        # Single K step: no accumulator read-modify-write, stats from the live value.
        y_ref[...] = part
        write_stats(part)
    else:
        k = pl.program_id(1)

        @pl.when(k == 0)
        def _():
            y_ref[...] = jnp.zeros_like(y_ref)

        # Accumulate straight into the resident f32 output tile (no extra scratch).
        y_ref[...] += part

        @pl.when(k == k_steps - 1)
        def _():
            write_stats(y_ref[...])


# ----------------------------------------------------------------------------
# Kernel 2: folded BatchNorm affine + SiLU, per M tile
# ----------------------------------------------------------------------------
def _bn_silu_kernel(y_ref, scale_ref, shift_ref, o_ref):
    z = y_ref[...] * scale_ref[...] + shift_ref[...]
    o_ref[...] = (z * jax.nn.sigmoid(z)).astype(o_ref.dtype)


# ----------------------------------------------------------------------------
# Tiling helpers
# ----------------------------------------------------------------------------
def _round_up(x, m):
    return ((x + m - 1) // m) * m


def _choose_tile_m(M):
    """Row tile: large enough to amortize per-step overhead, and >=2 tiles when
    possible so the 'parallel' M axis can split across TensorCores (v7x)."""
    for cand in (1024, 512, 256, 128, 64, 32, 16, 8):
        if M >= 2 * cand:
            return cand
    return _round_up(max(M, 1), 8)


def _choose_tk(K, C, tile_m, budget_bytes=24 * 1024 * 1024):
    """K tile sized against a VMEM budget counting double-buffered bf16
    patch/weight tiles plus the resident f32 output tile."""
    def footprint(tk):
        return (2 * tile_m * tk * 2      # patches tile (bf16, double-buffered)
                + 2 * tk * C * 2         # weight tile (bf16, double-buffered)
                + 2 * tile_m * C * 4     # f32 output tile (resident + next m)
                + 2 * 8 * C * 4)         # partial-stats tile

    if footprint(K) <= budget_bytes:
        return K, K                      # single K step, no padding
    fixed = 2 * tile_m * C * 4 + 2 * 8 * C * 4
    per_k = 2 * 2 * (tile_m + C)
    tk = max(128, ((budget_bytes - fixed) // per_k) // 128 * 128)
    tk = min(tk, _round_up(K, 128))
    return tk, _round_up(K, tk)          # zero-padded K is exact


# ----------------------------------------------------------------------------
# Fused matmul + BatchNorm (batch stats) + SiLU on flattened (M, C) matrices
# ----------------------------------------------------------------------------
def _matmul_bn_silu(patches, wmat, gamma, beta, *, out_dtype):
    """patches: (M, K), wmat: (K, C), gamma/beta: (C,) -> (M, C) out_dtype."""
    M, K = patches.shape
    K2, C = wmat.shape
    assert K == K2

    patches = patches.astype(jnp.bfloat16)   # feed the MXU bf16 (f32 accumulate)
    wmat = wmat.astype(jnp.bfloat16)

    tile_m = _choose_tile_m(M)
    Mp = _round_up(M, tile_m)
    tk, Kp = _choose_tk(K, C, tile_m)
    if Mp != M or Kp != K:
        # Zero padding is exact: padded rows/cols contribute 0 to the matmul
        # and to the channel sums (mean/var below divide by the true M).
        patches = jnp.pad(patches, ((0, Mp - M), (0, Kp - K)))
    if Kp != K:
        wmat = jnp.pad(wmat, ((0, Kp - K), (0, 0)))
    mt, kt = Mp // tile_m, Kp // tk

    y, partial = pl.pallas_call(
        functools.partial(_matmul_stats_kernel, k_steps=kt),
        out_shape=(
            jax.ShapeDtypeStruct((Mp, C), jnp.float32),
            jax.ShapeDtypeStruct((mt, 8, C), jnp.float32),
        ),
        grid_spec=pltpu.PrefetchScalarGridSpec(
            num_scalar_prefetch=0,
            grid=(mt, kt),
            in_specs=[
                pl.BlockSpec((tile_m, tk), lambda m, k: (m, k)),
                pl.BlockSpec((tk, C), lambda m, k: (k, 0)),
            ],
            out_specs=[
                pl.BlockSpec((tile_m, C), lambda m, k: (m, 0)),
                pl.BlockSpec((1, 8, C), lambda m, k: (m, 0, 0)),
            ],
        ),
        compiler_params=pltpu.CompilerParams(
            dimension_semantics=("parallel", "arbitrary"),
        ),
    )(patches, wmat)

    # Tiny (C,)-sized reduction + BN affine folding in plain JAX.
    s = jnp.sum(partial[:, 0, :], axis=0)
    s2 = jnp.sum(partial[:, 1, :], axis=0)
    mean = s / M
    var = s2 / M - mean * mean                      # biased (training-mode) variance
    rstd = jax.lax.rsqrt(var + _BN_EPS)
    scale = (gamma * rstd).reshape(1, C).astype(jnp.float32)
    shift = (beta - mean * gamma * rstd).reshape(1, C).astype(jnp.float32)

    out = pl.pallas_call(
        _bn_silu_kernel,
        out_shape=jax.ShapeDtypeStruct((Mp, C), out_dtype),
        grid_spec=pltpu.PrefetchScalarGridSpec(
            num_scalar_prefetch=0,
            grid=(mt,),
            in_specs=[
                pl.BlockSpec((tile_m, C), lambda m: (m, 0)),
                pl.BlockSpec((1, C), lambda m: (0, 0)),
                pl.BlockSpec((1, C), lambda m: (0, 0)),
            ],
            out_specs=pl.BlockSpec((tile_m, C), lambda m: (m, 0)),
        ),
        compiler_params=pltpu.CompilerParams(
            dimension_semantics=("parallel",),
        ),
    )(y, scale, shift)

    return out[:M]


# ----------------------------------------------------------------------------
# Channels-last conv wrappers (stride 1, autopad, bias=False)
# ----------------------------------------------------------------------------
def _im2col_nhwc(x, k, pad):
    """x: (N, H, W, C) -> (N*H*W, k*k*C) patches ((i,j) slow, C fast)."""
    N, H, W, C = x.shape
    xp = jnp.pad(x, ((0, 0), (pad, pad), (pad, pad), (0, 0)))
    cols = [xp[:, i:i + H, j:j + W, :] for i in range(k) for j in range(k)]
    patches = jnp.stack(cols, axis=3)                # (N, H, W, k*k, C)
    return patches.reshape(N * H * W, k * k * C)


def conv_bn_silu(x, w, gamma, beta, *, k, out_dtype=jnp.bfloat16):
    """Conv2d(k, s=1, p=k//2, bias=False) + BatchNorm2d(batch stats) + SiLU.
    x: (N, H, W, Cin) channels-last;  w: (Cout, Cin, k, k) PyTorch layout."""
    N, H, W, Cin = x.shape
    Cout = w.shape[0]
    if k == 1:
        patches = x.reshape(N * H * W, Cin)
        wmat = w.reshape(Cout, Cin).T
    else:
        patches = _im2col_nhwc(x, k, k // 2)
        wmat = jnp.transpose(w, (2, 3, 1, 0)).reshape(k * k * Cin, Cout)
    out = _matmul_bn_silu(patches, wmat, gamma, beta, out_dtype=out_dtype)
    return out.reshape(N, H, W, Cout)


# ----------------------------------------------------------------------------
# Block forward (matches the PyTorch module semantics)
# ----------------------------------------------------------------------------
def block_forward(x_nchw, params, ids):
    x = jnp.transpose(x_nchw, (0, 2, 3, 1))          # NCHW -> NHWC once
    c_ = params["cv1"]["w"].shape[0]

    # cv1 + cv2 fused: two 1x1 convs on the same input -> one lane-denser matmul.
    w12 = jnp.concatenate([params["cv1"]["w"], params["cv2"]["w"]], axis=0)
    g12 = jnp.concatenate([params["cv1"]["g"], params["cv2"]["g"]], axis=0)
    b12 = jnp.concatenate([params["cv1"]["b"], params["cv2"]["b"]], axis=0)
    y12 = conv_bn_silu(x, w12, g12, b12, k=1)
    x_1, x_2 = y12[..., :c_], y12[..., c_:]

    x_all = [x_1, x_2]
    for layer in params["cv3"]:
        x_2 = conv_bn_silu(x_2, layer["w"], layer["g"], layer["b"], k=3)
        x_all.append(x_2)

    cat = jnp.concatenate([x_all[i] for i in ids], axis=-1)
    out = conv_bn_silu(cat, params["cv4"]["w"], params["cv4"]["g"],
                       params["cv4"]["b"], k=1, out_dtype=jnp.float32)
    return jnp.transpose(out, (0, 3, 1, 2))          # NHWC -> NCHW


# ----------------------------------------------------------------------------
# Deterministic parameter construction (matches Block.__init__ shapes)
# ----------------------------------------------------------------------------
def init_block_params(key, c1, c2, c3, n=4, e=1, ids=(-1, -3, -5, -6)):
    c_ = int(c2 * e)
    keys = iter(jax.random.split(key, 4 * (n + 3)))

    def conv_w(cout, cin, k):
        fan_in = cin * k * k
        return (jax.random.normal(next(keys), (cout, cin, k, k), jnp.float32)
                * (1.0 / math.sqrt(fan_in)))

    def bn_params(c):
        g = 1.0 + 0.1 * jax.random.normal(next(keys), (c,), jnp.float32)
        b = 0.1 * jax.random.normal(next(keys), (c,), jnp.float32)
        return g, b

    p = {"cv1": {}, "cv2": {}, "cv3": [], "cv4": {}}
    p["cv1"]["w"] = conv_w(c_, c1, 1)
    p["cv1"]["g"], p["cv1"]["b"] = bn_params(c_)
    p["cv2"]["w"] = conv_w(c_, c1, 1)
    p["cv2"]["g"], p["cv2"]["b"] = bn_params(c_)
    for i in range(n):
        cin = c_ if i == 0 else c2
        g, b = bn_params(c2)
        p["cv3"].append({"w": conv_w(c2, cin, 3), "g": g, "b": b})
    cv4_in = c_ * 2 + c2 * (len(ids) - 2)
    p["cv4"]["w"] = conv_w(c3, cv4_in, 1)
    p["cv4"]["g"], p["cv4"]["b"] = bn_params(c3)
    return p


# ----------------------------------------------------------------------------
# Pure-JAX reference (same bf16 quantization points as the kernels)
# ----------------------------------------------------------------------------
def _q(a):
    return a.astype(jnp.bfloat16).astype(jnp.float32)


def _ref_conv_bn_silu(x, w, gamma, beta, k, out_bf16=True):
    pad = k // 2
    y = jax.lax.conv_general_dilated(
        _q(x), _q(jnp.transpose(w, (2, 3, 1, 0))),
        window_strides=(1, 1), padding=[(pad, pad), (pad, pad)],
        dimension_numbers=("NHWC", "HWIO", "NHWC"))
    mean = jnp.mean(y, axis=(0, 1, 2), keepdims=True)
    var = jnp.var(y, axis=(0, 1, 2), keepdims=True)
    z = (y - mean) * jax.lax.rsqrt(var + _BN_EPS) * gamma + beta
    out = z * jax.nn.sigmoid(z)
    return _q(out) if out_bf16 else out


def block_forward_ref(x_nchw, params, ids):
    x = jnp.transpose(x_nchw, (0, 2, 3, 1))
    x_1 = _ref_conv_bn_silu(x, params["cv1"]["w"], params["cv1"]["g"], params["cv1"]["b"], 1)
    x_2 = _ref_conv_bn_silu(x, params["cv2"]["w"], params["cv2"]["g"], params["cv2"]["b"], 1)
    x_all = [x_1, x_2]
    for layer in params["cv3"]:
        x_2 = _ref_conv_bn_silu(x_2, layer["w"], layer["g"], layer["b"], 3)
        x_all.append(x_2)
    cat = jnp.concatenate([x_all[i] for i in ids], axis=-1)
    out = _ref_conv_bn_silu(cat, params["cv4"]["w"], params["cv4"]["g"],
                            params["cv4"]["b"], 1, out_bf16=False)
    return jnp.transpose(out, (0, 3, 1, 2))


if __name__ == "__main__":
    key = jax.random.PRNGKey(0)
    kx, kp = jax.random.split(key)

    # Small Block config: Block(c1=16, c2=16, c3=64, n=4, e=1, ids=[-1,-3,-5,-6])
    N, c1, H, W = 2, 16, 16, 16
    c2, c3, n, e = 16, 64, 4, 1
    ids = (-1, -3, -5, -6)

    x = jax.random.normal(kx, (N, c1, H, W), jnp.float32)
    params = init_block_params(kp, c1, c2, c3, n=n, e=e, ids=ids)

    fwd = jax.jit(functools.partial(block_forward, ids=ids))
    out = jax.block_until_ready(fwd(x, params))

    assert out.shape == (N, c3, H, W), out.shape
    assert out.dtype == jnp.float32
    assert bool(jnp.all(jnp.isfinite(out)))

    ref = jax.jit(functools.partial(block_forward_ref, ids=ids))(x, params)
    max_err = float(jnp.max(jnp.abs(out - ref)))
    assert max_err < 5e-2, f"max abs err vs reference: {max_err}"

    print("KERNEL_OK")
</pallas_src>

<mosaic_0001>
module attributes {stable_mosaic.version = 11 : i64} {
  func.func @_matmul_stats_kernel(%arg0: i32, %arg1: i32, %arg2: memref<256x16xbf16, #tpu.memory_space<vmem>>, %arg3: memref<16x32xbf16, #tpu.memory_space<vmem>>, %arg4: memref<256x32xf32, #tpu.memory_space<vmem>>, %arg5: memref<1x8x32xf32, #tpu.memory_space<vmem>>) attributes {dimension_semantics = [#tpu.dimension_semantics<parallel>, #tpu.dimension_semantics<arbitrary>], iteration_bounds = array<i64: 2, 1>, scalar_prefetch = 0 : i64, scratch_operands = 0 : i64, tpu.core_type = #tpu.core_type<tc>, window_params = [{transform_indices = @transform_0, window_bounds = array<i64: 256, 16>}, {transform_indices = @transform_1, window_bounds = array<i64: 16, 32>}, {transform_indices = @transform_2, window_bounds = array<i64: 256, 32>}, {transform_indices = @transform_3, window_bounds = array<i64: 1, 8, 32>}]} {
    %c0 = arith.constant 0 : index
    %c0_0 = arith.constant 0 : index
    %0 = vector.load %arg2[%c0, %c0_0] : memref<256x16xbf16, #tpu.memory_space<vmem>>, vector<256x16xbf16>
    %c0_1 = arith.constant 0 : index
    %c0_2 = arith.constant 0 : index
    %1 = vector.load %arg3[%c0_1, %c0_2] : memref<16x32xbf16, #tpu.memory_space<vmem>>, vector<16x32xbf16>
    %cst = arith.constant dense<0.000000e+00> : vector<256x32xf32>
    %2 = tpu.matmul %0, %1, %cst {dimension_numbers = #tpu.dot_dimension_numbers<[1], [0], [0], [1], [0, 0, 1, 1], [], []>} : vector<256x16xbf16>, vector<16x32xbf16>, vector<256x32xf32> -> vector<256x32xf32>
    %c0_3 = arith.constant 0 : index
    %c0_4 = arith.constant 0 : index
    %3 = vector.load %arg4[%c0_3, %c0_4] : memref<256x32xf32, #tpu.memory_space<vmem>>, vector<256x32xf32>
    tpu.vector_store %arg4[%c0_3, %c0_4], %2 {strides = array<i32>} : memref<256x32xf32, #tpu.memory_space<vmem>>, vector<256x32xf32>,
    %cst_5 = arith.constant dense<0.000000e+00> : vector<32xf32>
    %4 = vector.multi_reduction <add>, %2, %cst_5 [0] : vector<256x32xf32> to vector<32xf32>
    %5 = vector.shape_cast %4 : vector<32xf32> to vector<1x32xf32>
    %6 = arith.mulf %2, %2 : vector<256x32xf32>
    %cst_6 = arith.constant dense<0.000000e+00> : vector<32xf32>
    %7 = vector.multi_reduction <add>, %6, %cst_6 [0] : vector<256x32xf32> to vector<32xf32>
    %8 = vector.shape_cast %7 : vector<32xf32> to vector<1x32xf32>
    %9 = tpu.iota {dimensions = array<i32: 0>} : vector<8x32xi32>
    %c0_i32 = arith.constant 0 : i32
    %10 = vector.broadcast %c0_i32 : i32 to vector<8x32xi32>
    %11 = arith.cmpi eq, %9, %10 : vector<8x32xi32>
    %c1_i32 = arith.constant 1 : i32
    %12 = vector.broadcast %c1_i32 : i32 to vector<8x32xi32>
    %13 = arith.cmpi eq, %9, %12 : vector<8x32xi32>
    %cst_7 = arith.constant 0.000000e+00 : f32
    %14 = vector.shape_cast %8 : vector<1x32xf32> to vector<1x32xf32>
    %15 = vector.broadcast %14 : vector<1x32xf32> to vector<8x32xf32>
    %16 = vector.broadcast %cst_7 : f32 to vector<8x32xf32>
    %17 = arith.select %13, %15, %16 : vector<8x32xi1>, vector<8x32xf32>
    %18 = vector.shape_cast %5 : vector<1x32xf32> to vector<1x32xf32>
    %19 = vector.broadcast %18 : vector<1x32xf32> to vector<8x32xf32>
    %20 = arith.select %11, %19, %17 : vector<8x32xi1>, vector<8x32xf32>
    %21 = vector.shape_cast %20 : vector<8x32xf32> to vector<1x8x32xf32>
    %c0_8 = arith.constant 0 : index
    %c0_9 = arith.constant 0 : index
    %c0_10 = arith.constant 0 : index
    %22 = vector.load %arg5[%c0_8, %c0_9, %c0_10] : memref<1x8x32xf32, #tpu.memory_space<vmem>>, vector<1x8x32xf32>
    tpu.vector_store %arg5[%c0_8, %c0_9, %c0_10], %21 {strides = array<i32>} : memref<1x8x32xf32, #tpu.memory_space<vmem>>, vector<1x8x32xf32>,
    return
  }
  func.func @transform_0(%arg0: i32, %arg1: i32) -> (i32, i32) {
    %c0_i32 = arith.constant 0 : i32
    return %arg0, %arg1 : i32, i32
  }
  func.func @transform_1(%arg0: i32, %arg1: i32) -> (i32, i32) {
    %c0_i32 = arith.constant 0 : i32
    %c0_i32_0 = arith.constant 0 : i32
    return %arg1, %c0_i32 : i32, i32
  }
  func.func @transform_2(%arg0: i32, %arg1: i32) -> (i32, i32) {
    %c0_i32 = arith.constant 0 : i32
    %c0_i32_0 = arith.constant 0 : i32
    return %arg0, %c0_i32 : i32, i32
  }
  func.func @transform_3(%arg0: i32, %arg1: i32) -> (i32, i32, i32) {
    %c0_i32 = arith.constant 0 : i32
    %c0_i32_0 = arith.constant 0 : i32
    %c0_i32_1 = arith.constant 0 : i32
    return %arg0, %c0_i32, %c0_i32_0 : i32, i32, i32
  }
}

module attributes {stable_mosaic.version = 11 : i64} {
  func.func @_bn_silu_kernel(%arg0: i32, %arg1: memref<256x32xf32, #tpu.memory_space<vmem>>, %arg2: memref<1x32xf32, #tpu.memory_space<vmem>>, %arg3: memref<1x32xf32, #tpu.memory_space<vmem>>, %arg4: memref<256x32xbf16, #tpu.memory_space<vmem>>) attributes {dimension_semantics = [#tpu.dimension_semantics<parallel>], iteration_bounds = array<i64: 2>, scalar_prefetch = 0 : i64, scratch_operands = 0 : i64, tpu.core_type = #tpu.core_type<tc>, window_params = [{transform_indices = @transform_0, window_bounds = array<i64: 256, 32>}, {pipeline_mode = #tpu.pipeline_mode<synchronous>, transform_indices = @transform_1, window_bounds = array<i64: 1, 32>}, {pipeline_mode = #tpu.pipeline_mode<synchronous>, transform_indices = @transform_2, window_bounds = array<i64: 1, 32>}, {transform_indices = @transform_3, window_bounds = array<i64: 256, 32>}]} {
    %c0 = arith.constant 0 : index
    %c0_0 = arith.constant 0 : index
    %0 = vector.load %arg1[%c0, %c0_0] : memref<256x32xf32, #tpu.memory_space<vmem>>, vector<256x32xf32>
    %c0_1 = arith.constant 0 : index
    %c0_2 = arith.constant 0 : index
    %1 = vector.load %arg2[%c0_1, %c0_2] : memref<1x32xf32, #tpu.memory_space<vmem>>, vector<1x32xf32>
    %2 = vector.broadcast %1 : vector<1x32xf32> to vector<256x32xf32>
    %3 = arith.mulf %0, %2 : vector<256x32xf32>
    %c0_3 = arith.constant 0 : index
    %c0_4 = arith.constant 0 : index
    %4 = vector.load %arg3[%c0_3, %c0_4] : memref<1x32xf32, #tpu.memory_space<vmem>>, vector<1x32xf32>
    %5 = vector.broadcast %4 : vector<1x32xf32> to vector<256x32xf32>
    %6 = arith.addf %3, %5 : vector<256x32xf32>
    %7 = arith.negf %6 : vector<256x32xf32>
    %8 = math.exp %7 : vector<256x32xf32>
    %cst = arith.constant 1.000000e+00 : f32
    %9 = vector.broadcast %cst : f32 to vector<256x32xf32>
    %10 = arith.addf %9, %8 : vector<256x32xf32>
    %11 = arith.divf %9, %10 : vector<256x32xf32>
    %12 = arith.mulf %6, %11 : vector<256x32xf32>
    %13 = arith.truncf %12 : vector<256x32xf32> to vector<256x32xbf16>
    %c0_5 = arith.constant 0 : index
    %c0_6 = arith.constant 0 : index
    %14 = vector.load %arg4[%c0_5, %c0_6] : memref<256x32xbf16, #tpu.memory_space<vmem>>, vector<256x32xbf16>
    tpu.vector_store %arg4[%c0_5, %c0_6], %13 {strides = array<i32>} : memref<256x32xbf16, #tpu.memory_space<vmem>>, vector<256x32xbf16>,
    return
  }
  func.func @transform_0(%arg0: i32) -> (i32, i32) {
    %c0_i32 = arith.constant 0 : i32
    %c0_i32_0 = arith.constant 0 : i32
    return %arg0, %c0_i32 : i32, i32
  }
  func.func @transform_1(%arg0: i32) -> (i32, i32) {
    %c0_i32 = arith.constant 0 : i32
    %c0_i32_0 = arith.constant 0 : i32
    %c0_i32_1 = arith.constant 0 : i32
    return %c0_i32, %c0_i32_0 : i32, i32
  }
  func.func @transform_2(%arg0: i32) -> (i32, i32) {
    %c0_i32 = arith.constant 0 : i32
    %c0_i32_0 = arith.constant 0 : i32
    %c0_i32_1 = arith.constant 0 : i32
    return %c0_i32, %c0_i32_0 : i32, i32
  }
  func.func @transform_3(%arg0: i32) -> (i32, i32) {
    %c0_i32 = arith.constant 0 : i32
    %c0_i32_0 = arith.constant 0 : i32
    return %arg0, %c0_i32 : i32, i32
  }
}

module attributes {stable_mosaic.version = 11 : i64} {
  func.func @_matmul_stats_kernel(%arg0: i32, %arg1: i32, %arg2: memref<256x144xbf16, #tpu.memory_space<vmem>>, %arg3: memref<144x16xbf16, #tpu.memory_space<vmem>>, %arg4: memref<256x16xf32, #tpu.memory_space<vmem>>, %arg5: memref<1x8x16xf32, #tpu.memory_space<vmem>>) attributes {dimension_semantics = [#tpu.dimension_semantics<parallel>, #tpu.dimension_semantics<arbitrary>], iteration_bounds = array<i64: 2, 1>, scalar_prefetch = 0 : i64, scratch_operands = 0 : i64, tpu.core_type = #tpu.core_type<tc>, window_params = [{transform_indices = @transform_0, window_bounds = array<i64: 256, 144>}, {transform_indices = @transform_1, window_bounds = array<i64: 144, 16>}, {transform_indices = @transform_2, window_bounds = array<i64: 256, 16>}, {transform_indices = @transform_3, window_bounds = array<i64: 1, 8, 16>}]} {
    %c0 = arith.constant 0 : index
    %c0_0 = arith.constant 0 : index
    %0 = vector.load %arg2[%c0, %c0_0] : memref<256x144xbf16, #tpu.memory_space<vmem>>, vector<256x144xbf16>
    %c0_1 = arith.constant 0 : index
    %c0_2 = arith.constant 0 : index
    %1 = vector.load %arg3[%c0_1, %c0_2] : memref<144x16xbf16, #tpu.memory_space<vmem>>, vector<144x16xbf16>
    %cst = arith.constant dense<0.000000e+00> : vector<256x16xf32>
    %2 = tpu.matmul %0, %1, %cst {dimension_numbers = #tpu.dot_dimension_numbers<[1], [0], [0], [1], [0, 0, 1, 1], [], []>} : vector<256x144xbf16>, vector<144x16xbf16>, vector<256x16xf32> -> vector<256x16xf32>
    %c0_3 = arith.constant 0 : index
    %c0_4 = arith.constant 0 : index
    %3 = vector.load %arg4[%c0_3, %c0_4] : memref<256x16xf32, #tpu.memory_space<vmem>>, vector<256x16xf32>
    tpu.vector_store %arg4[%c0_3, %c0_4], %2 {strides = array<i32>} : memref<256x16xf32, #tpu.memory_space<vmem>>, vector<256x16xf32>,
    %cst_5 = arith.constant dense<0.000000e+00> : vector<16xf32>
    %4 = vector.multi_reduction <add>, %2, %cst_5 [0] : vector<256x16xf32> to vector<16xf32>
    %5 = vector.shape_cast %4 : vector<16xf32> to vector<1x16xf32>
    %6 = arith.mulf %2, %2 : vector<256x16xf32>
    %cst_6 = arith.constant dense<0.000000e+00> : vector<16xf32>
    %7 = vector.multi_reduction <add>, %6, %cst_6 [0] : vector<256x16xf32> to vector<16xf32>
    %8 = vector.shape_cast %7 : vector<16xf32> to vector<1x16xf32>
    %9 = tpu.iota {dimensions = array<i32: 0>} : vector<8x16xi32>
    %c0_i32 = arith.constant 0 : i32
    %10 = vector.broadcast %c0_i32 : i32 to vector<8x16xi32>
    %11 = arith.cmpi eq, %9, %10 : vector<8x16xi32>
    %c1_i32 = arith.constant 1 : i32
    %12 = vector.broadcast %c1_i32 : i32 to vector<8x16xi32>
    %13 = arith.cmpi eq, %9, %12 : vector<8x16xi32>
    %cst_7 = arith.constant 0.000000e+00 : f32
    %14 = vector.shape_cast %8 : vector<1x16xf32> to vector<1x16xf32>
    %15 = vector.broadcast %14 : vector<1x16xf32> to vector<8x16xf32>
    %16 = vector.broadcast %cst_7 : f32 to vector<8x16xf32>
    %17 = arith.select %13, %15, %16 : vector<8x16xi1>, vector<8x16xf32>
    %18 = vector.shape_cast %5 : vector<1x16xf32> to vector<1x16xf32>
    %19 = vector.broadcast %18 : vector<1x16xf32> to vector<8x16xf32>
    %20 = arith.select %11, %19, %17 : vector<8x16xi1>, vector<8x16xf32>
    %21 = vector.shape_cast %20 : vector<8x16xf32> to vector<1x8x16xf32>
    %c0_8 = arith.constant 0 : index
    %c0_9 = arith.constant 0 : index
    %c0_10 = arith.constant 0 : index
    %22 = vector.load %arg5[%c0_8, %c0_9, %c0_10] : memref<1x8x16xf32, #tpu.memory_space<vmem>>, vector<1x8x16xf32>
    tpu.vector_store %arg5[%c0_8, %c0_9, %c0_10], %21 {strides = array<i32>} : memref<1x8x16xf32, #tpu.memory_space<vmem>>, vector<1x8x16xf32>,
    return
  }
  func.func @transform_0(%arg0: i32, %arg1: i32) -> (i32, i32) {
    %c0_i32 = arith.constant 0 : i32
    return %arg0, %arg1 : i32, i32
  }
  func.func @transform_1(%arg0: i32, %arg1: i32) -> (i32, i32) {
    %c0_i32 = arith.constant 0 : i32
    %c0_i32_0 = arith.constant 0 : i32
    return %arg1, %c0_i32 : i32, i32
  }
  func.func @transform_2(%arg0: i32, %arg1: i32) -> (i32, i32) {
    %c0_i32 = arith.constant 0 : i32
    %c0_i32_0 = arith.constant 0 : i32
    return %arg0, %c0_i32 : i32, i32
  }
  func.func @transform_3(%arg0: i32, %arg1: i32) -> (i32, i32, i32) {
    %c0_i32 = arith.constant 0 : i32
    %c0_i32_0 = arith.constant 0 : i32
    %c0_i32_1 = arith.constant 0 : i32
    return %arg0, %c0_i32, %c0_i32_0 : i32, i32, i32
  }
}

module attributes {stable_mosaic.version = 11 : i64} {
  func.func @_bn_silu_kernel(%arg0: i32, %arg1: memref<256x16xf32, #tpu.memory_space<vmem>>, %arg2: memref<1x16xf32, #tpu.memory_space<vmem>>, %arg3: memref<1x16xf32, #tpu.memory_space<vmem>>, %arg4: memref<256x16xbf16, #tpu.memory_space<vmem>>) attributes {dimension_semantics = [#tpu.dimension_semantics<parallel>], iteration_bounds = array<i64: 2>, scalar_prefetch = 0 : i64, scratch_operands = 0 : i64, tpu.core_type = #tpu.core_type<tc>, window_params = [{transform_indices = @transform_0, window_bounds = array<i64: 256, 16>}, {pipeline_mode = #tpu.pipeline_mode<synchronous>, transform_indices = @transform_1, window_bounds = array<i64: 1, 16>}, {pipeline_mode = #tpu.pipeline_mode<synchronous>, transform_indices = @transform_2, window_bounds = array<i64: 1, 16>}, {transform_indices = @transform_3, window_bounds = array<i64: 256, 16>}]} {
    %c0 = arith.constant 0 : index
    %c0_0 = arith.constant 0 : index
    %0 = vector.load %arg1[%c0, %c0_0] : memref<256x16xf32, #tpu.memory_space<vmem>>, vector<256x16xf32>
    %c0_1 = arith.constant 0 : index
    %c0_2 = arith.constant 0 : index
    %1 = vector.load %arg2[%c0_1, %c0_2] : memref<1x16xf32, #tpu.memory_space<vmem>>, vector<1x16xf32>
    %2 = vector.broadcast %1 : vector<1x16xf32> to vector<256x16xf32>
    %3 = arith.mulf %0, %2 : vector<256x16xf32>
    %c0_3 = arith.constant 0 : index
    %c0_4 = arith.constant 0 : index
    %4 = vector.load %arg3[%c0_3, %c0_4] : memref<1x16xf32, #tpu.memory_space<vmem>>, vector<1x16xf32>
    %5 = vector.broadcast %4 : vector<1x16xf32> to vector<256x16xf32>
    %6 = arith.addf %3, %5 : vector<256x16xf32>
    %7 = arith.negf %6 : vector<256x16xf32>
    %8 = math.exp %7 : vector<256x16xf32>
    %cst = arith.constant 1.000000e+00 : f32
    %9 = vector.broadcast %cst : f32 to vector<256x16xf32>
    %10 = arith.addf %9, %8 : vector<256x16xf32>
    %11 = arith.divf %9, %10 : vector<256x16xf32>
    %12 = arith.mulf %6, %11 : vector<256x16xf32>
    %13 = arith.truncf %12 : vector<256x16xf32> to vector<256x16xbf16>
    %c0_5 = arith.constant 0 : index
    %c0_6 = arith.constant 0 : index
    %14 = vector.load %arg4[%c0_5, %c0_6] : memref<256x16xbf16, #tpu.memory_space<vmem>>, vector<256x16xbf16>
    tpu.vector_store %arg4[%c0_5, %c0_6], %13 {strides = array<i32>} : memref<256x16xbf16, #tpu.memory_space<vmem>>, vector<256x16xbf16>,
    return
  }
  func.func @transform_0(%arg0: i32) -> (i32, i32) {
    %c0_i32 = arith.constant 0 : i32
    %c0_i32_0 = arith.constant 0 : i32
    return %arg0, %c0_i32 : i32, i32
  }
  func.func @transform_1(%arg0: i32) -> (i32, i32) {
    %c0_i32 = arith.constant 0 : i32
    %c0_i32_0 = arith.constant 0 : i32
    %c0_i32_1 = arith.constant 0 : i32
    return %c0_i32, %c0_i32_0 : i32, i32
  }
  func.func @transform_2(%arg0: i32) -> (i32, i32) {
    %c0_i32 = arith.constant 0 : i32
    %c0_i32_0 = arith.constant 0 : i32
    %c0_i32_1 = arith.constant 0 : i32
    return %c0_i32, %c0_i32_0 : i32, i32
  }
  func.func @transform_3(%arg0: i32) -> (i32, i32) {
    %c0_i32 = arith.constant 0 : i32
    %c0_i32_0 = arith.constant 0 : i32
    return %arg0, %c0_i32 : i32, i32
  }
}

module attributes {stable_mosaic.version = 11 : i64} {
  func.func @_matmul_stats_kernel(%arg0: i32, %arg1: i32, %arg2: memref<256x64xbf16, #tpu.memory_space<vmem>>, %arg3: memref<64x64xbf16, #tpu.memory_space<vmem>>, %arg4: memref<256x64xf32, #tpu.memory_space<vmem>>, %arg5: memref<1x8x64xf32, #tpu.memory_space<vmem>>) attributes {dimension_semantics = [#tpu.dimension_semantics<parallel>, #tpu.dimension_semantics<arbitrary>], iteration_bounds = array<i64: 2, 1>, scalar_prefetch = 0 : i64, scratch_operands = 0 : i64, tpu.core_type = #tpu.core_type<tc>, window_params = [{transform_indices = @transform_0, window_bounds = array<i64: 256, 64>}, {transform_indices = @transform_1, window_bounds = array<i64: 64, 64>}, {transform_indices = @transform_2, window_bounds = array<i64: 256, 64>}, {transform_indices = @transform_3, window_bounds = array<i64: 1, 8, 64>}]} {
    %c0 = arith.constant 0 : index
    %c0_0 = arith.constant 0 : index
    %0 = vector.load %arg2[%c0, %c0_0] : memref<256x64xbf16, #tpu.memory_space<vmem>>, vector<256x64xbf16>
    %c0_1 = arith.constant 0 : index
    %c0_2 = arith.constant 0 : index
    %1 = vector.load %arg3[%c0_1, %c0_2] : memref<64x64xbf16, #tpu.memory_space<vmem>>, vector<64x64xbf16>
    %cst = arith.constant dense<0.000000e+00> : vector<256x64xf32>
    %2 = tpu.matmul %0, %1, %cst {dimension_numbers = #tpu.dot_dimension_numbers<[1], [0], [0], [1], [0, 0, 1, 1], [], []>} : vector<256x64xbf16>, vector<64x64xbf16>, vector<256x64xf32> -> vector<256x64xf32>
    %c0_3 = arith.constant 0 : index
    %c0_4 = arith.constant 0 : index
    %3 = vector.load %arg4[%c0_3, %c0_4] : memref<256x64xf32, #tpu.memory_space<vmem>>, vector<256x64xf32>
    tpu.vector_store %arg4[%c0_3, %c0_4], %2 {strides = array<i32>} : memref<256x64xf32, #tpu.memory_space<vmem>>, vector<256x64xf32>,
    %cst_5 = arith.constant dense<0.000000e+00> : vector<64xf32>
    %4 = vector.multi_reduction <add>, %2, %cst_5 [0] : vector<256x64xf32> to vector<64xf32>
    %5 = vector.shape_cast %4 : vector<64xf32> to vector<1x64xf32>
    %6 = arith.mulf %2, %2 : vector<256x64xf32>
    %cst_6 = arith.constant dense<0.000000e+00> : vector<64xf32>
    %7 = vector.multi_reduction <add>, %6, %cst_6 [0] : vector<256x64xf32> to vector<64xf32>
    %8 = vector.shape_cast %7 : vector<64xf32> to vector<1x64xf32>
    %9 = tpu.iota {dimensions = array<i32: 0>} : vector<8x64xi32>
    %c0_i32 = arith.constant 0 : i32
    %10 = vector.broadcast %c0_i32 : i32 to vector<8x64xi32>
    %11 = arith.cmpi eq, %9, %10 : vector<8x64xi32>
    %c1_i32 = arith.constant 1 : i32
    %12 = vector.broadcast %c1_i32 : i32 to vector<8x64xi32>
    %13 = arith.cmpi eq, %9, %12 : vector<8x64xi32>
    %cst_7 = arith.constant 0.000000e+00 : f32
    %14 = vector.shape_cast %8 : vector<1x64xf32> to vector<1x64xf32>
    %15 = vector.broadcast %14 : vector<1x64xf32> to vector<8x64xf32>
    %16 = vector.broadcast %cst_7 : f32 to vector<8x64xf32>
    %17 = arith.select %13, %15, %16 : vector<8x64xi1>, vector<8x64xf32>
    %18 = vector.shape_cast %5 : vector<1x64xf32> to vector<1x64xf32>
    %19 = vector.broadcast %18 : vector<1x64xf32> to vector<8x64xf32>
    %20 = arith.select %11, %19, %17 : vector<8x64xi1>, vector<8x64xf32>
    %21 = vector.shape_cast %20 : vector<8x64xf32> to vector<1x8x64xf32>
    %c0_8 = arith.constant 0 : index
    %c0_9 = arith.constant 0 : index
    %c0_10 = arith.constant 0 : index
    %22 = vector.load %arg5[%c0_8, %c0_9, %c0_10] : memref<1x8x64xf32, #tpu.memory_space<vmem>>, vector<1x8x64xf32>
    tpu.vector_store %arg5[%c0_8, %c0_9, %c0_10], %21 {strides = array<i32>} : memref<1x8x64xf32, #tpu.memory_space<vmem>>, vector<1x8x64xf32>,
    return
  }
  func.func @transform_0(%arg0: i32, %arg1: i32) -> (i32, i32) {
    %c0_i32 = arith.constant 0 : i32
    return %arg0, %arg1 : i32, i32
  }
  func.func @transform_1(%arg0: i32, %arg1: i32) -> (i32, i32) {
    %c0_i32 = arith.constant 0 : i32
    %c0_i32_0 = arith.constant 0 : i32
    return %arg1, %c0_i32 : i32, i32
  }
  func.func @transform_2(%arg0: i32, %arg1: i32) -> (i32, i32) {
    %c0_i32 = arith.constant 0 : i32
    %c0_i32_0 = arith.constant 0 : i32
    return %arg0, %c0_i32 : i32, i32
  }
  func.func @transform_3(%arg0: i32, %arg1: i32) -> (i32, i32, i32) {
    %c0_i32 = arith.constant 0 : i32
    %c0_i32_0 = arith.constant 0 : i32
    %c0_i32_1 = arith.constant 0 : i32
    return %arg0, %c0_i32, %c0_i32_0 : i32, i32, i32
  }
}

module attributes {stable_mosaic.version = 11 : i64} {
  func.func @_bn_silu_kernel(%arg0: i32, %arg1: memref<256x64xf32, #tpu.memory_space<vmem>>, %arg2: memref<1x64xf32, #tpu.memory_space<vmem>>, %arg3: memref<1x64xf32, #tpu.memory_space<vmem>>, %arg4: memref<256x64xf32, #tpu.memory_space<vmem>>) attributes {dimension_semantics = [#tpu.dimension_semantics<parallel>], iteration_bounds = array<i64: 2>, scalar_prefetch = 0 : i64, scratch_operands = 0 : i64, tpu.core_type = #tpu.core_type<tc>, window_params = [{transform_indices = @transform_0, window_bounds = array<i64: 256, 64>}, {pipeline_mode = #tpu.pipeline_mode<synchronous>, transform_indices = @transform_1, window_bounds = array<i64: 1, 64>}, {pipeline_mode = #tpu.pipeline_mode<synchronous>, transform_indices = @transform_2, window_bounds = array<i64: 1, 64>}, {transform_indices = @transform_3, window_bounds = array<i64: 256, 64>}]} {
    %c0 = arith.constant 0 : index
    %c0_0 = arith.constant 0 : index
    %0 = vector.load %arg1[%c0, %c0_0] : memref<256x64xf32, #tpu.memory_space<vmem>>, vector<256x64xf32>
    %c0_1 = arith.constant 0 : index
    %c0_2 = arith.constant 0 : index
    %1 = vector.load %arg2[%c0_1, %c0_2] : memref<1x64xf32, #tpu.memory_space<vmem>>, vector<1x64xf32>
    %2 = vector.broadcast %1 : vector<1x64xf32> to vector<256x64xf32>
    %3 = arith.mulf %0, %2 : vector<256x64xf32>
    %c0_3 = arith.constant 0 : index
    %c0_4 = arith.constant 0 : index
    %4 = vector.load %arg3[%c0_3, %c0_4] : memref<1x64xf32, #tpu.memory_space<vmem>>, vector<1x64xf32>
    %5 = vector.broadcast %4 : vector<1x64xf32> to vector<256x64xf32>
    %6 = arith.addf %3, %5 : vector<256x64xf32>
    %7 = arith.negf %6 : vector<256x64xf32>
    %8 = math.exp %7 : vector<256x64xf32>
    %cst = arith.constant 1.000000e+00 : f32
    %9 = vector.broadcast %cst : f32 to vector<256x64xf32>
    %10 = arith.addf %9, %8 : vector<256x64xf32>
    %11 = arith.divf %9, %10 : vector<256x64xf32>
    %12 = arith.mulf %6, %11 : vector<256x64xf32>
    %c0_5 = arith.constant 0 : index
    %c0_6 = arith.constant 0 : index
    %13 = vector.load %arg4[%c0_5, %c0_6] : memref<256x64xf32, #tpu.memory_space<vmem>>, vector<256x64xf32>
    tpu.vector_store %arg4[%c0_5, %c0_6], %12 {strides = array<i32>} : memref<256x64xf32, #tpu.memory_space<vmem>>, vector<256x64xf32>,
    return
  }
  func.func @transform_0(%arg0: i32) -> (i32, i32) {
    %c0_i32 = arith.constant 0 : i32
    %c0_i32_0 = arith.constant 0 : i32
    return %arg0, %c0_i32 : i32, i32
  }
  func.func @transform_1(%arg0: i32) -> (i32, i32) {
    %c0_i32 = arith.constant 0 : i32
    %c0_i32_0 = arith.constant 0 : i32
    %c0_i32_1 = arith.constant 0 : i32
    return %c0_i32, %c0_i32_0 : i32, i32
  }
  func.func @transform_2(%arg0: i32) -> (i32, i32) {
    %c0_i32 = arith.constant 0 : i32
    %c0_i32_0 = arith.constant 0 : i32
    %c0_i32_1 = arith.constant 0 : i32
    return %c0_i32, %c0_i32_0 : i32, i32
  }
  func.func @transform_3(%arg0: i32) -> (i32, i32) {
    %c0_i32 = arith.constant 0 : i32
    %c0_i32_0 = arith.constant 0 : i32
    return %arg0, %c0_i32 : i32, i32
  }
}

</mosaic_0001>

<bundles_post_ra>
// kernel: block_forward.13
= control target key start
LH: loop header
LB: loop body
LE: loop exit
PB: predicated region body
PF: predicated region fallthrough
CT: control target
= control target key end

     0   :  { %s998_s12 = smov 0   ;;  %s1324_s0 = inlined_call_operand.vmem [shape: f32[512,32], index: 0, kind: input, shape index: {}]   ;;  %s1325_s1 = inlined_call_operand.vmem [shape: f32[1,32], index: 1, kind: input, shape index: {}]   ;;  %s1326_s2 = inlined_call_operand.vmem [shape: f32[1,32], index: 2, kind: input, shape index: {}]   ;;  %s1327_s3 = inlined_call_operand.vmem [shape: bf16[512,32], index: 3, kind: output, shape index: {}]  }
   0x1 LB: > { %s725_s13 = sadd.s32 4294967295, %s976_s12   ;;  %p729_p0 = scmp.ge.s32.totalorder %s976_s12, 1  ;;  %s976_s12 = sphi %s998_s12, %s13_s12  }
   0x2   : > { %p138_p1 = scmp.lt.s32.totalorder %s976_s12, 3 }
   0x4   : > { %p139_p2 = pnand %p729_p0, %p138_p1 }
   0x5   : > { %s730_s14 = sshll.u32 (!%p139_p2), %s725_s13, 5  ;;  %v1012_v0 = vld [vmem:[%s1325_s1] ss:$0 sm:$0xff] (!%p139_p2)  ;;  %vm636_vm0 = vcmask (!%p139_p2), 257024  }
   0x6   : > { %142 = sbr.rel (%p139_p2) target bundleno = 109 (0x6d), region = 32  ;;  %p163_p3 = scmp.lt.s32.totalorder (!%p139_p2), %s730_s14, 63  ;;  %v1022_v1 = vld [vmem:[%s1326_s2] ss:$0 sm:$0xff] (!%p139_p2) }
   0xd   : > { %s1329_s14 = smov (!%p163_p3, %s730_s14), 63 }
   0xe   : > { %s731_s15 = sshll.u32 %s1329_s14, 3  ;;  %s733_s23 = sshll.u32 %s1329_s14, 2 }
   0xf   : > { %s1017_s20 = scalar_lea.vmem %s1324_s0, %s731_s15  ;;  %s1170_s26 = scalar_lea.vmem %s1327_s3, %s733_s23 }
  0x10   : > { %v174_v2 = vld [vmem:[%s1017_s20] sm:$0xff]  ;;  %v175_v3 = vld [vmem:[%s1017_s20 + $0x8] sm:$0xff]  ;;  %v176_v4 = vld [vmem:[%s1017_s20 + $0x10] sm:$0xff] }
  0x11   : > { %v213_v5 = vmul.f32 %v1012_v0, %v174_v2  ;;  %v214_v6 = vmul.f32 %v1012_v0, %v175_v3  ;;  %v215_v7 = vmul.f32 %v1012_v0, %v176_v4  ;;  %v177_v8 = vld [vmem:[%s1017_s20 + $0x18] sm:$0xff]  ;;  %v178_v9 = vld [vmem:[%s1017_s20 + $0x20] sm:$0xff]  ;;  %v179_v10 = vld [vmem:[%s1017_s20 + $0x28] sm:$0xff] }
  0x12   : > { %v216_v11 = vmul.f32 %v1012_v0, %v177_v8  ;;  %v217_v12 = vmul.f32 %v1012_v0, %v178_v9  ;;  %v218_v13 = vmul.f32 %v1012_v0, %v179_v10  ;;  %v180_v14 = vld [vmem:[%s1017_s20 + $0x30] sm:$0xff]  ;;  %v181_v15 = vld [vmem:[%s1017_s20 + $0x38] sm:$0xff]  ;;  %v182_v20 = vld [vmem:[%s1017_s20 + $0x40] sm:$0xff] }
  0x13   : > { %v1039_v16 = vadd.f32 %v1022_v1, %v213_v5  ;;  %v1042_v17 = vadd.f32 %v1022_v1, %v214_v6  ;;  %v1045_v18 = vadd.f32 %v1022_v1, %v215_v7  ;;  %v219_v19 = vmul.f32 %v1012_v0, %v180_v14  ;;  %v183_v25 = vld [vmem:[%s1017_s20 + $0x48] sm:$0xff]  ;;  %v184_v26 = vld [vmem:[%s1017_s20 + $0x50] sm:$0xff]  ;;  %v185_v27 = vld [vmem:[%s1017_s20 + $0x58] sm:$0xff] }
  0x14   : > { %v1050_v21 = vadd.f32 %v1022_v1, %v216_v11  ;;  %v1053_v22 = vadd.f32 %v1022_v1, %v217_v12  ;;  %v1056_v23 = vadd.f32 %v1022_v1, %v218_v13  ;;  %v220_v24 = vmul.f32 %v1012_v0, %v181_v15  ;;  %v186_v35 = vld [vmem:[%s1017_s20 + $0x60] sm:$0xff]  ;;  %v187_v50 = vld [vmem:[%s1017_s20 + $0x68] sm:$0xff]  ;;  %v188_v55 = vld [vmem:[%s1017_s20 + $0x70] sm:$0xff] }
  0x15   : > { %v736_v28 = vmul.f32 -1.442695, %v1039_v16  ;;  %v737_v29 = vmul.f32 -1.442695, %v1042_v17  ;;  %v738_v30 = vmul.f32 -1.442695, %v1045_v18  ;;  %v1066_v31 = vadd.f32 %v1022_v1, %v219_v19 }
  0x16   : > { %v739_v32 = vmul.f32 -1.442695, %v1050_v21  ;;  %v740_v33 = vmul.f32 -1.442695, %v1053_v22  ;;  %v1071_v34 = vadd.f32 %v1022_v1, %v220_v24  ;;  %v741_v36 = vmul.f32 -1.442695, %v1056_v23 }
  0x17   : > { %842 = vpow2.f32 %v736_v28  ;;  %v221_v37 = vmul.f32 %v1012_v0, %v182_v20  ;;  %v222_v38 = vmul.f32 %v1012_v0, %v183_v25  ;;  %v742_v39 = vmul.f32 -1.442695, %v1066_v31  ;;  %v189_v57 = vld [vmem:[%s1017_s20 + $0x78] sm:$0xff]  ;;  %v190_v58 = vld [vmem:[%s1017_s20 + $0x80] sm:$0xff]  ;;  %v191_v61 = vld [vmem:[%s1017_s20 + $0x88] sm:$0xff] }
  0x18   : > { %844 = vpow2.f32 %v737_v29  ;;  %v223_v40 = vmul.f32 %v1012_v0, %v184_v26  ;;  %v224_v41 = vmul.f32 %v1012_v0, %v185_v27  ;;  %v225_v44 = vmul.f32 %v1012_v0, %v186_v35  ;;  %v192_v3 = vld [vmem:[%s1017_s20 + $0x90] sm:$0xff]  ;;  %v193_v8 = vld [vmem:[%s1017_s20 + $0x98] sm:$0xff]  ;;  %v194_v19 = vld [vmem:[%s1017_s20 + $0xa0] sm:$0xff] }
  0x19   : > { %846 = vpow2.f32 %v738_v30  ;;  %v1081_v42 = vadd.f32 %v1022_v1, %v221_v37  ;;  %v1084_v43 = vadd.f32 %v1022_v1, %v222_v38  ;;  %v743_v45 = vmul.f32 -1.442695, %v1071_v34  ;;  %v196_v38 = vld [vmem:[%s1017_s20 + $0xb0] sm:$0xff] }
  0x1a   : > { %848 = vpow2.f32 %v739_v32  ;;  %v1089_v46 = vadd.f32 %v1022_v1, %v223_v40  ;;  %v1092_v47 = vadd.f32 %v1022_v1, %v224_v41  ;;  %v1096_v49 = vadd.f32 %v1022_v1, %v225_v44  ;;  %v195_v32 = vld [vmem:[%s1017_s20 + $0xa8] sm:$0xff] }
  0x1b   : > { %850 = vpow2.f32 %v740_v33  ;;  %v744_v48 = vmul.f32 -1.442695, %v1081_v42  ;;  %v745_v51 = vmul.f32 -1.442695, %v1084_v43  ;;  %v226_v54 = vmul.f32 %v1012_v0, %v187_v50 }
  0x1c   : > { %852 = vpow2.f32 %v741_v36  ;;  %v746_v52 = vmul.f32 -1.442695, %v1089_v46  ;;  %v747_v53 = vmul.f32 -1.442695, %v1092_v47  ;;  %v748_v56 = vmul.f32 -1.442695, %v1096_v49 }
  0x1d   : > { %854 = vpow2.f32 %v742_v39  ;;  %v227_v60 = vmul.f32 %v1012_v0, %v188_v55  ;;  %v1110_v2 = vadd.f32 %v1022_v1, %v226_v54  ;;  %v228_v6 = vmul.f32 %v1012_v0, %v189_v57 }
  0x1e   : > { %856 = vpow2.f32 %v743_v45  ;;  %v229_v7 = vmul.f32 %v1012_v0, %v190_v58  ;;  %v230_v11 = vmul.f32 %v1012_v0, %v191_v61  ;;  %v231_v15 = vmul.f32 %v1012_v0, %v192_v3 }
  0x1f   : > { %858 = vpow2.f32 %v744_v48  ;;  %v1118_v14 = vadd.f32 %v1022_v1, %v227_v60  ;;  %v1123_v25 = vmul.f32 -1.442695, %v1110_v2  ;;  %v232_v26 = vmul.f32 %v1012_v0, %v193_v8  ;;  %v197_v60 = vld [vmem:[%s1017_s20 + $0xb8] sm:$0xff] }
  0x20   : > { %860 = vpow2.f32 %v745_v51  ;;  %v1127_v29 = vadd.f32 %v1022_v1, %v228_v6  ;;  %v1130_v30 = vadd.f32 %v1022_v1, %v229_v7  ;;  %v1134_v36 = vadd.f32 %v1022_v1, %v230_v11 }
  0x21   : > { %v843_v59 = vpop.eup %842  ;;  %862 = vpow2.f32 %v746_v52  ;;  %v233_v37 = vmul.f32 %v1012_v0, %v194_v19  ;;  %v750_v41 = vmul.f32 -1.442695, %v1118_v14  ;;  %v1140_v44 = vadd.f32 %v1022_v1, %v231_v15 }
  0x22   : > { %v845_v62 = vpop.eup %844  ;;  %v380_v63 = vadd.f32 1.0, %v843_v59  ;;  %864 = vpow2.f32 %v747_v53  ;;  %v1143_v50 = vadd.f32 %v1022_v1, %v232_v26  ;;  %v234_v51 = vmul.f32 %v1012_v0, %v195_v32 }
  0x23   : > { %v847_v4 = vpop.eup %846  ;;  %v381_v5 = vadd.f32 1.0, %v845_v62  ;;  %866 = vpow2.f32 %v748_v56  ;;  %v751_v54 = vmul.f32 -1.442695, %v1127_v29  ;;  %v235_v55 = vmul.f32 %v1012_v0, %v196_v38 }
  0x24   : > { %v849_v9 = vpop.eup %848  ;;  %868 = vrcp.f32 %v380_v63  ;;  %v382_v10 = vadd.f32 1.0, %v847_v4  ;;  %v752_v58 = vmul.f32 -1.442695, %v1130_v30  ;;  %v1151_v59 = vadd.f32 %v1022_v1, %v233_v37  ;;  %v198_v4 = vld [vmem:[%s1017_s20 + $0xc0] sm:$0xff] }
  0x25   : > { %v851_v12 = vpop.eup %850  ;;  %870 = vrcp.f32 %v381_v5  ;;  %v383_v13 = vadd.f32 1.0, %v849_v9  ;;  %v753_v63 = vmul.f32 -1.442695, %v1134_v36  ;;  %v754_v3 = vmul.f32 -1.442695, %v1140_v44  ;;  %v199_v9 = vld [vmem:[%s1017_s20 + $0xc8] sm:$0xff] }
  0x26   : > { %v853_v20 = vpop.eup %852  ;;  %872 = vrcp.f32 %v382_v10  ;;  %v384_v24 = vadd.f32 1.0, %v851_v12  ;;  %v755_v7 = vmul.f32 -1.442695, %v1143_v50  ;;  %v1159_v8 = vadd.f32 %v1022_v1, %v234_v51 }
  0x27   : > { %v855_v27 = vpop.eup %854  ;;  %874 = vrcp.f32 %v383_v13  ;;  %v385_v28 = vadd.f32 1.0, %v853_v20  ;;  %v1164_v12 = vadd.f32 %v1022_v1, %v235_v55  ;;  %v236_v13 = vmul.f32 %v1012_v0, %v197_v60 }
  0x28   : > { %v857_v33 = vpop.eup %856  ;;  %876 = vrcp.f32 %v384_v24  ;;  %v386_v35 = vadd.f32 1.0, %v855_v27  ;;  %v756_v20 = vmul.f32 -1.442695, %v1151_v59 }
  0x29   : > { %v859_v39 = vpop.eup %858  ;;  %878 = vrcp.f32 %v385_v28  ;;  %v387_v40 = vadd.f32 1.0, %v857_v33  ;;  %v238_v28 = vmul.f32 %v1012_v0, %v199_v9 }
  0x2a   : > { %v861_v45 = vpop.eup %860  ;;  %880 = vrcp.f32 %v386_v35  ;;  %v388_v48 = vadd.f32 1.0, %v859_v39 }
  0x2b   : > { %v863_v52 = vpop.eup %862  ;;  %882 = vrcp.f32 %v387_v40  ;;  %v389_v53 = vadd.f32 1.0, %v861_v45  ;;  %v1196_v51 = vadd.f32 %v1022_v1, %v238_v28 }
  0x2c   : > { %v865_v56 = vpop.eup %864  ;;  %884 = vrcp.f32 %v388_v48  ;;  %v390_v57 = vadd.f32 1.0, %v863_v52 }
  0x2d   : > { %v867_v61 = vpop.eup %866  ;;  %886 = vrcp.f32 %v389_v53  ;;  %v391_v62 = vadd.f32 1.0, %v865_v56 }
  0x2e   : > { %v869_v5 = vpop.eup %868  ;;  %888 = vrcp.f32 %v390_v57  ;;  %v392_v6 = vadd.f32 1.0, %v867_v61 }
  0x2f   : > { %v871_v10 = vpop.eup %870  ;;  %v476_v11 = vmul.f32 %v869_v5, %v1039_v16  ;;  %890 = vrcp.f32 %v391_v62  ;;  %v237_v16 = vmul.f32 %v1012_v0, %v198_v4 }
  0x30   : > { %v873_v15 = vpop.eup %872  ;;  %v477_v19 = vmul.f32 %v871_v10, %v1042_v17  ;;  %892 = vrcp.f32 %v392_v6  ;;  %v757_v17 = vmul.f32 -1.442695, %v1159_v8 }
  0x31   : > { %v875_v24 = vpop.eup %874  ;;  %v802_v26 = vpack.c.bf16 %v476_v11, %v476_v11  ;;  %v478_v27 = vmul.f32 %v873_v15, %v1045_v18  ;;  %894 = vpow2.f32 %v1123_v25  ;;  %v1184_v18 = vadd.f32 %v1022_v1, %v236_v13  ;;  %v200_v13 = vld [vmem:[%s1017_s20 + $0xd0] sm:$0xff] }
  0x32   : > { %v877_v32 = vpop.eup %876  ;;  %v803_v33 = vpack.c.bf16 %v477_v19, %v477_v19  ;;  %v479_v35 = vmul.f32 %v875_v24, %v1050_v21  ;;  %896 = vpow2.f32 %v750_v41  ;;  %v1190_v41 = vadd.f32 %v1022_v1, %v237_v16  ;;  %v202_v24 = vld [vmem:[%s1017_s20 + $0xe0] sm:$0xff] }
  0x33   : > { %v879_v37 = vpop.eup %878  ;;  %637 = vst.msk [vmem:[%s1170_s26] sm:$0xf] %vm636_vm0, %v802_v26  ;;  %v804_v38 = vpack.c.bf16 %v478_v27, %v478_v27  ;;  %v480_v39 = vmul.f32 %v877_v32, %v1053_v22  ;;  %898 = vpow2.f32 %v751_v54  ;;  %v758_v54 = vmul.f32 -1.442695, %v1164_v12  ;;  %v203_v32 = vld [vmem:[%s1017_s20 + $0xe8] sm:$0xff] }
  0x34   : > { %v881_v25 = vpop.eup %880  ;;  %638 = vst.msk [vmem:[%s1170_s26 + $0x4] sm:$0xf] %vm636_vm0, %v803_v33  ;;  %v805_v40 = vpack.c.bf16 %v479_v35, %v479_v35  ;;  %v481_v21 = vmul.f32 %v879_v37, %v1056_v23  ;;  %900 = vpow2.f32 %v752_v58  ;;  %v759_v57 = vmul.f32 -1.442695, %v1184_v18  ;;  %v204_v37 = vld [vmem:[%s1017_s20 + $0xf0] sm:$0xff] }
  0x35   : > { %v883_v45 = vpop.eup %882  ;;  %639 = vst.msk [vmem:[%s1170_s26 + $0x8] sm:$0xf] %vm636_vm0, %v804_v38  ;;  %v806_v22 = vpack.c.bf16 %v480_v39, %v480_v39  ;;  %v482_v48 = vmul.f32 %v881_v25, %v1066_v31  ;;  %902 = vpow2.f32 %v753_v63  ;;  %v760_v61 = vmul.f32 -1.442695, %v1190_v41 }
  0x36   : > { %v885_v52 = vpop.eup %884  ;;  %640 = vst.msk [vmem:[%s1170_s26 + $0xc] sm:$0xf] %vm636_vm0, %v805_v40  ;;  %v807_v23 = vpack.c.bf16 %v481_v21, %v481_v21  ;;  %v483_v53 = vmul.f32 %v883_v45, %v1071_v34  ;;  %904 = vpow2.f32 %v754_v3  ;;  %v761_v3 = vmul.f32 -1.442695, %v1196_v51  ;;  %v205_v40 = vld [vmem:[%s1017_s20 + $0xf8] sm:$0xff] }
  0x37   : > { %v887_v55 = vpop.eup %886  ;;  %641 = vst.msk [vmem:[%s1170_s26 + $0x10] sm:$0xf] %vm636_vm0, %v806_v22  ;;  %v808_v56 = vpack.c.bf16 %v482_v48, %v482_v48  ;;  %v484_v31 = vmul.f32 %v885_v52, %v1081_v42  ;;  %906 = vpow2.f32 %v755_v7  ;;  %v239_v28 = vmul.f32 %v1012_v0, %v200_v13 }
  0x38   : > { %v889_v58 = vpop.eup %888  ;;  %642 = vst.msk [vmem:[%s1170_s26 + $0x14] sm:$0xf] %vm636_vm0, %v807_v23  ;;  %v809_v60 = vpack.c.bf16 %v483_v53, %v483_v53  ;;  %v485_v34 = vmul.f32 %v887_v55, %v1084_v43  ;;  %908 = vpow2.f32 %v756_v20  ;;  %v201_v20 = vld [vmem:[%s1017_s20 + $0xd8] sm:$0xff]  ;;  %v241_v25 = vmul.f32 %v1012_v0, %v202_v24 }
  0x39   : > { %v891_v62 = vpop.eup %890  ;;  %643 = vst.msk [vmem:[%s1170_s26 + $0x18] sm:$0xf] %vm636_vm0, %v808_v56  ;;  %v810_v63 = vpack.c.bf16 %v484_v31, %v484_v31  ;;  %v486_v42 = vmul.f32 %v889_v58, %v1089_v46  ;;  %910 = vpow2.f32 %v757_v17  ;;  %v240_v17 = vmul.f32 %v1012_v0, %v201_v20 }
  0x3a   : > { %v893_v4 = vpop.eup %892  ;;  %644 = vst.msk [vmem:[%s1170_s26 + $0x1c] sm:$0xf] %vm636_vm0, %v809_v60  ;;  %v811_v5 = vpack.c.bf16 %v485_v34, %v485_v34  ;;  %v487_v43 = vmul.f32 %v891_v62, %v1092_v47  ;;  %912 = vpow2.f32 %v758_v54  ;;  %v242_v22 = vmul.f32 %v1012_v0, %v203_v32 }
  0x3b   : > { %v895_v6 = vpop.eup %894  ;;  %645 = vst.msk [vmem:[%s1170_s26 + $0x20] sm:$0xf] %vm636_vm0, %v810_v63  ;;  %v812_v7 = vpack.c.bf16 %v486_v42, %v486_v42  ;;  %v488_v46 = vmul.f32 %v893_v4, %v1096_v49  ;;  %914 = vpow2.f32 %v759_v57  ;;  %v1239_v23 = vadd.f32 %v1022_v1, %v239_v28 }
  0x3c   : > { %v897_v9 = vpop.eup %896  ;;  %646 = vst.msk [vmem:[%s1170_s26 + $0x24] sm:$0xf] %vm636_vm0, %v811_v5  ;;  %v813_v10 = vpack.c.bf16 %v487_v43, %v487_v43  ;;  %v393_v11 = vadd.f32 1.0, %v895_v6  ;;  %916 = vpow2.f32 %v760_v61  ;;  %v243_v53 = vmul.f32 %v1012_v0, %v204_v37 }
  0x3d   : > { %v899_v47 = vpop.eup %898  ;;  %647 = vst.msk [vmem:[%s1170_s26 + $0x28] sm:$0xf] %vm636_vm0, %v812_v7  ;;  %v814_v15 = vpack.c.bf16 %v488_v46, %v488_v46  ;;  %v394_v19 = vadd.f32 1.0, %v897_v9  ;;  %918 = vpow2.f32 %v761_v3  ;;  %v1243_v56 = vadd.f32 %v1022_v1, %v240_v17 }
  0x3e   : > { %v901_v49 = vpop.eup %900  ;;  %648 = vst.msk [vmem:[%s1170_s26 + $0x2c] sm:$0xf] %vm636_vm0, %v813_v10  ;;  %920 = vrcp.f32 %v393_v11  ;;  %v395_v16 = vadd.f32 1.0, %v899_v47  ;;  %v244_v31 = vmul.f32 %v1012_v0, %v205_v40  ;;  %v1247_v60 = vadd.f32 %v1022_v1, %v241_v25 }
  0x3f   : > { %v903_v26 = vpop.eup %902  ;;  %649 = vst.msk [vmem:[%s1170_s26 + $0x30] sm:$0xf] %vm636_vm0, %v814_v15  ;;  %922 = vrcp.f32 %v394_v19  ;;  %v396_v27 = vadd.f32 1.0, %v901_v49  ;;  %v1250_v62 = vadd.f32 %v1022_v1, %v242_v22  ;;  %v762_v3 = vmul.f32 -1.442695, %v1239_v23 }
  0x40   : > { %v905_v33 = vpop.eup %904  ;;  %924 = vrcp.f32 %v395_v16  ;;  %v397_v35 = vadd.f32 1.0, %v903_v26  ;;  %v1254_v4 = vadd.f32 %v1022_v1, %v243_v53  ;;  %v763_v43 = vmul.f32 -1.442695, %v1243_v56 }
  0x41   : > { %v907_v38 = vpop.eup %906  ;;  %926 = vrcp.f32 %v396_v27  ;;  %v398_v39 = vadd.f32 1.0, %v905_v33  ;;  %v1258_v6 = vadd.f32 %v1022_v1, %v244_v31  ;;  %v764_v9 = vmul.f32 -1.442695, %v1247_v60 }
  0x42   : > { %v909_v21 = vpop.eup %908  ;;  %928 = vrcp.f32 %v397_v35  ;;  %v399_v45 = vadd.f32 1.0, %v907_v38  ;;  %v765_v13 = vmul.f32 -1.442695, %v1250_v62  ;;  %v766_v1 = vmul.f32 -1.442695, %v1254_v4 }
  0x43   : > { %v911_v48 = vpop.eup %910  ;;  %930 = vrcp.f32 %v398_v39  ;;  %v400_v52 = vadd.f32 1.0, %v909_v21  ;;  %v767_v16 = vmul.f32 -1.442695, %v1258_v6 }
  0x44   : > { %v913_v54 = vpop.eup %912  ;;  %932 = vrcp.f32 %v399_v45  ;;  %v401_v55 = vadd.f32 1.0, %v911_v48 }
  0x45   : > { %v915_v57 = vpop.eup %914  ;;  %934 = vrcp.f32 %v400_v52  ;;  %v402_v58 = vadd.f32 1.0, %v913_v54 }
  0x46   : > { %v917_v34 = vpop.eup %916  ;;  %936 = vrcp.f32 %v401_v55  ;;  %v403_v61 = vadd.f32 1.0, %v915_v57 }
  0x47   : > { %v919_v63 = vpop.eup %918  ;;  %938 = vrcp.f32 %v402_v58  ;;  %v404_v42 = vadd.f32 1.0, %v917_v34 }
  0x48   : > { %v921_v0 = vpop.eup %920  ;;  %940 = vrcp.f32 %v403_v61  ;;  %v405_v5 = vadd.f32 1.0, %v919_v63 }
  0x49   : > { %v923_v7 = vpop.eup %922  ;;  %v489_v46 = vmul.f32 %v921_v0, %v1110_v2  ;;  %942 = vrcp.f32 %v404_v42 }
  0x4a   : > { %v925_v10 = vpop.eup %924  ;;  %v490_v11 = vmul.f32 %v923_v7, %v1118_v14  ;;  %944 = vrcp.f32 %v405_v5 }
  0x4b   : > { %v927_v47 = vpop.eup %926  ;;  %v815_v15 = vpack.c.bf16 %v489_v46, %v489_v46  ;;  %v491_v19 = vmul.f32 %v925_v10, %v1127_v29  ;;  %946 = vpow2.f32 %v762_v3 }
  0x4c   : > { %v929_v20 = vpop.eup %928  ;;  %v816_v2 = vpack.c.bf16 %v490_v11, %v490_v11  ;;  %v492_v49 = vmul.f32 %v927_v47, %v1130_v30  ;;  %948 = vpow2.f32 %v763_v43 }
  0x4d   : > { %v931_v14 = vpop.eup %930  ;;  %650 = vst.msk [vmem:[%s1170_s26 + $0x34] sm:$0xf] %vm636_vm0, %v815_v15  ;;  %v817_v24 = vpack.c.bf16 %v491_v19, %v491_v19  ;;  %v493_v26 = vmul.f32 %v929_v20, %v1134_v36  ;;  %950 = vpow2.f32 %v764_v9 }
  0x4e   : > { %v933_v29 = vpop.eup %932  ;;  %651 = vst.msk [vmem:[%s1170_s26 + $0x38] sm:$0xf] %vm636_vm0, %v816_v2  ;;  %v818_v27 = vpack.c.bf16 %v492_v49, %v492_v49  ;;  %v494_v28 = vmul.f32 %v931_v14, %v1140_v44  ;;  %952 = vpow2.f32 %v765_v13 }
  0x4f   : > { %v935_v30 = vpop.eup %934  ;;  %652 = vst.msk [vmem:[%s1170_s26 + $0x3c] sm:$0xf] %vm636_vm0, %v817_v24  ;;  %v819_v32 = vpack.c.bf16 %v493_v26, %v493_v26  ;;  %v495_v33 = vmul.f32 %v933_v29, %v1143_v50  ;;  %954 = vpow2.f32 %v766_v1 }
  0x50   : > { %v937_v35 = vpop.eup %936  ;;  %653 = vst.msk [vmem:[%s1170_s26 + $0x40] sm:$0xf] %vm636_vm0, %v818_v27  ;;  %v820_v36 = vpack.c.bf16 %v494_v28, %v494_v28  ;;  %v496_v17 = vmul.f32 %v935_v30, %v1151_v59  ;;  %956 = vpow2.f32 %v767_v16 }
  0x51   : > { %v939_v37 = vpop.eup %938  ;;  %654 = vst.msk [vmem:[%s1170_s26 + $0x44] sm:$0xf] %vm636_vm0, %v819_v32  ;;  %v821_v44 = vpack.c.bf16 %v495_v33, %v495_v33  ;;  %v497_v38 = vmul.f32 %v937_v35, %v1159_v8 }
  0x52   : > { %v941_v39 = vpop.eup %940  ;;  %655 = vst.msk [vmem:[%s1170_s26 + $0x48] sm:$0xf] %vm636_vm0, %v820_v36  ;;  %v822_v50 = vpack.c.bf16 %v496_v17, %v496_v17  ;;  %v498_v25 = vmul.f32 %v939_v37, %v1164_v12 }
  0x53   : > { %v943_v40 = vpop.eup %942  ;;  %656 = vst.msk [vmem:[%s1170_s26 + $0x4c] sm:$0xf] %vm636_vm0, %v821_v44  ;;  %v823_v59 = vpack.c.bf16 %v497_v38, %v497_v38  ;;  %v499_v21 = vmul.f32 %v941_v39, %v1184_v18 }
  0x54   : > { %v945_v45 = vpop.eup %944  ;;  %657 = vst.msk [vmem:[%s1170_s26 + $0x50] sm:$0xf] %vm636_vm0, %v822_v50  ;;  %v824_v22 = vpack.c.bf16 %v498_v25, %v498_v25  ;;  %v500_v8 = vmul.f32 %v943_v40, %v1190_v41 }
  0x55   : > { %v947_v48 = vpop.eup %946  ;;  %658 = vst.msk [vmem:[%s1170_s26 + $0x54] sm:$0xf] %vm636_vm0, %v823_v59  ;;  %v825_v52 = vpack.c.bf16 %v499_v21, %v499_v21  ;;  %v501_v12 = vmul.f32 %v945_v45, %v1196_v51 }
  0x56   : > { %v949_v53 = vpop.eup %948  ;;  %659 = vst.msk [vmem:[%s1170_s26 + $0x58] sm:$0xf] %vm636_vm0, %v824_v22  ;;  %v826_v54 = vpack.c.bf16 %v500_v8, %v500_v8  ;;  %v406_v55 = vadd.f32 1.0, %v947_v48 }
  0x57   : > { %v951_v18 = vpop.eup %950  ;;  %660 = vst.msk [vmem:[%s1170_s26 + $0x5c] sm:$0xf] %vm636_vm0, %v825_v52  ;;  %v827_v31 = vpack.c.bf16 %v501_v12, %v501_v12  ;;  %v407_v57 = vadd.f32 1.0, %v949_v53 }
  0x58   : > { %v953_v58 = vpop.eup %952  ;;  %661 = vst.msk [vmem:[%s1170_s26 + $0x60] sm:$0xf] %vm636_vm0, %v826_v54  ;;  %958 = vrcp.f32 %v406_v55  ;;  %v408_v41 = vadd.f32 1.0, %v951_v18 }
  0x59   : > { %v955_v34 = vpop.eup %954  ;;  %662 = vst.msk [vmem:[%s1170_s26 + $0x64] sm:$0xf] %vm636_vm0, %v827_v31  ;;  %960 = vrcp.f32 %v407_v57  ;;  %v409_v51 = vadd.f32 1.0, %v953_v58 }
  0x5a   : > { %v957_v61 = vpop.eup %956  ;;  %962 = vrcp.f32 %v408_v41  ;;  %v410_v63 = vadd.f32 1.0, %v955_v34 }
  0x5b   : > { %964 = vrcp.f32 %v409_v51  ;;  %v411_v42 = vadd.f32 1.0, %v957_v61 }
  0x5c   : > { %966 = vrcp.f32 %v410_v63 }
  0x5d   : > { %968 = vrcp.f32 %v411_v42 }
  0x62   : > { %v959_v3 = vpop.eup %958 }
  0x63   : > { %v961_v0 = vpop.eup %960  ;;  %v502_v5 = vmul.f32 %v959_v3, %v1239_v23 }
  0x64   : > { %v963_v43 = vpop.eup %962  ;;  %v503_v7 = vmul.f32 %v961_v0, %v1243_v56 }
  0x65   : > { %v965_v46 = vpop.eup %964  ;;  %v828_v9 = vpack.c.bf16 %v502_v5, %v502_v5  ;;  %v504_v10 = vmul.f32 %v963_v43, %v1247_v60 }
  0x66   : > { %v967_v11 = vpop.eup %966  ;;  %v829_v13 = vpack.c.bf16 %v503_v7, %v503_v7  ;;  %v505_v47 = vmul.f32 %v965_v46, %v1250_v62 }
  0x67   : > { %v969_v15 = vpop.eup %968  ;;  %663 = vst.msk [vmem:[%s1170_s26 + $0x68] sm:$0xf] %vm636_vm0, %v828_v9  ;;  %v830_v19 = vpack.c.bf16 %v504_v10, %v504_v10  ;;  %v506_v23 = vmul.f32 %v967_v11, %v1254_v4 }
  0x68   : > { %664 = vst.msk [vmem:[%s1170_s26 + $0x6c] sm:$0xf] %vm636_vm0, %v829_v13  ;;  %v831_v56 = vpack.c.bf16 %v505_v47, %v505_v47  ;;  %v507_v1 = vmul.f32 %v969_v15, %v1258_v6 }
  0x69   : > { %665 = vst.msk [vmem:[%s1170_s26 + $0x70] sm:$0xf] %vm636_vm0, %v830_v19  ;;  %v832_v20 = vpack.c.bf16 %v506_v23, %v506_v23 }
  0x6a   : > { %666 = vst.msk [vmem:[%s1170_s26 + $0x74] sm:$0xf] %vm636_vm0, %v831_v56  ;;  %v833_v60 = vpack.c.bf16 %v507_v1, %v507_v1 }
  0x6b   : > { %667 = vst.msk [vmem:[%s1170_s26 + $0x78] sm:$0xf] %vm636_vm0, %v832_v20 }
  0x6c   : > { %668 = vst.msk [vmem:[%s1170_s26 + $0x7c] sm:$0xf] %vm636_vm0, %v833_v60 }
  0x6d PF: > { %s13_s12 = sadd.s32 1, %s976_s12  }
  0x6e   : > { %p10_p4 = scmp.ge.s32.totalorder %s13_s12, 4  }
  0x70   :  { %12 = sbr.rel (!%p10_p4) target bundleno = 1 (0x1), region = 62 }

// kernel: block_forward.12
= control target key start
LH: loop header
LB: loop body
LE: loop exit
PB: predicated region body
PF: predicated region fallthrough
CT: control target
= control target key end

     0   :  { %s1069_s12 = smov 0   ;;  %s1071_s13 = smov 0   ;;  %s1378_s0 = inlined_call_operand.vmem [shape: bf16[512,16], index: 0, kind: input, shape index: {}]   ;;  %s1379_s1 = inlined_call_operand.vmem [shape: bf16[16,32], index: 1, kind: input, shape index: {}]   ;;  %s1380_s2 = inlined_call_operand.vmem [shape: f32[512,32], index: 2, kind: output, shape index: {0}]   ;;  %s1381_s3 = inlined_call_operand.vmem [shape: f32[2,8,32], index: 3, kind: output, shape index: {1}]  }
   0x1   :  { %s1073_s14 = smov 0  }
   0x2 LB: > { %s26_s15 = sadd.s32 1, %s1043_s13  ;;  %p890_p0 = scmp.ge.s32.totalorder %s1047_s14, 1  ;;  %s1047_s14 = sphi %s1073_s14, %s14_s14   ;;  %s1043_s13 = sphi %s1071_s13, %s1383_s13   ;;  %s1039_s12 = sphi %s1069_s12, %s1382_s12  }
   0x3   : > { %p28_p1 = scmp.ge.s32.totalorder %s26_s15, 2  ;;  %p169_p2 = scmp.lt.s32.totalorder %s1047_s14, 3 }
   0x5   : > { %s1385_s15 = smov (%p28_p1, %s26_s15), 0  ;;  %p170_p3 = pnand %p890_p0, %p169_p2 }
   0x6   : > { %v1008_v0 = vld [vmem:[%s1379_s1] sm:$0xff] (!%p170_p3)   ;;  %s891_s18 = sshll.u32 (!%p170_p3), %s1039_s12, 5  ;;  %vm351_vm0 = vcmask (!%p170_p3), 130048   ;;  %vm561_vm1 = vcmask (!%p170_p3), 261120   ;;  %p226_p5 = scmp.lt.s32.totalorder (!%p170_p3), %s1039_s12, 1 }
   0x7   : > { %173 = sbr.rel (%p170_p3) target bundleno = 314 (0x13a), region = 28  ;;  %p206_p4 = scmp.lt.s32.totalorder (!%p170_p3), %s891_s18, 63  ;;  %948 = vmatprep.subr.bf16.mxu0 (!%p170_p3), %v1008_v0  ;;  %982 = vmatprep.subr.bf16.mxu1 (!%p170_p3), %v1008_v0 }
   0x8   : > { %949 = vmatpush3.bf16.msra.mxu0 (!%p170_p3), %v1008_v0  ;;  %983 = vmatpush3.bf16.msra.mxu1 (!%p170_p3), %v1008_v0 }
   0xe   : > { %s1387_s18 = smov (!%p206_p4, %s891_s18), 63  ;;  %s1389_s12 = smov (!%p226_p5, %s1039_s12), 1 }
   0xf   : > { %s892_s19 = sshll.u32 %s1387_s18, 2  ;;  %s894_s23 = sshll.u32 %s1387_s18, 3 }
  0x10   : > { %s1099_s22 = scalar_lea.vmem %s1378_s0, %s892_s19  ;;  %s1137_s26 = scalar_lea.vmem %s1380_s2, %s894_s23 }
  0x11   : > { %v1009_v1 = vld [vmem:[%s1099_s22] sm:$0xff]   ;;  %v1010_v2 = vld [vmem:[%s1099_s22 + $0x8] sm:$0xff]   ;;  %v1011_v3 = vld [vmem:[%s1099_s22 + $0x10] sm:$0xff]   ;;  %s895_s27 = sshll.u32 %s1389_s12, 3 }
  0x12   : > { %950 = vmatprep.mubr.msk.bf16.mxu0 %vm351_vm0, %v1009_v1  ;;  %v1012_v4 = vld [vmem:[%s1099_s22 + $0x18] sm:$0xff]   ;;  %v1013_v5 = vld [vmem:[%s1099_s22 + $0x20] sm:$0xff]   ;;  %v1018_v7 = vld [vmem:[%s1099_s22 + $0x48] sm:$0xff]   ;;  %s229_s30 = scalar_lea.vmem %s1381_s3, %s895_s27 }
  0x13   : > { %951 = vmatmul.mubr.msk.bf16.vlgmr.msra.gmra.mrb[0].mxu0 %vm351_vm0, %v1010_v2  ;;  %v1017_v6 = vld [vmem:[%s1099_s22 + $0x40] sm:$0xff]   ;;  %v1019_v8 = vld [vmem:[%s1099_s22 + $0x50] sm:$0xff]   ;;  %v1014_v9 = vld [vmem:[%s1099_s22 + $0x28] sm:$0xff]  }
  0x14   : > { %954 = vmatprep.mubr.msk.bf16.mxu0 %vm351_vm0, %v1011_v3  ;;  %966 = vmatprep.mubr.msk.bf16.mxu1 %vm351_vm0, %v1017_v6  ;;  %v1020_v10 = vld [vmem:[%s1099_s22 + $0x58] sm:$0xff]   ;;  %v1015_v11 = vld [vmem:[%s1099_s22 + $0x30] sm:$0xff]   ;;  %v1021_v12 = vld [vmem:[%s1099_s22 + $0x60] sm:$0xff]  }
  0x15   : > { %967 = vmatmul.mubr.msk.bf16.vlgmr.msra.gmra.mrb[0].mxu1 %vm351_vm0, %v1018_v7  ;;  %v1016_v13 = vld [vmem:[%s1099_s22 + $0x38] sm:$0xff]   ;;  %v1022_v14 = vld [vmem:[%s1099_s22 + $0x68] sm:$0xff]   ;;  %v1023_v15 = vld [vmem:[%s1099_s22 + $0x70] sm:$0xff]  }
  0x16   : > { %970 = vmatprep.mubr.msk.bf16.mxu1 %vm351_vm0, %v1019_v8  ;;  %v1024_v16 = vld [vmem:[%s1099_s22 + $0x78] sm:$0xff]  }
  0x1b   : > { %955 = vmatmul.mubr.msk.bf16.gmra.mrb[4].mxu0 %vm351_vm0, %v1012_v4 }
  0x1c   : > { %958 = vmatprep.mubr.msk.bf16.mxu0 %vm351_vm0, %v1013_v5 }
  0x1d   : > { %971 = vmatmul.mubr.msk.bf16.gmra.mrb[4].mxu1 %vm351_vm0, %v1020_v10 }
  0x1e   : > { %974 = vmatprep.mubr.msk.bf16.mxu1 %vm351_vm0, %v1021_v12 }
  0x23   : > { %959 = vmatmul.mubr.msk.bf16.gmra.mrb[8].mxu0 %vm351_vm0, %v1014_v9 }
  0x24   : > { %962 = vmatprep.mubr.msk.bf16.mxu0 %vm351_vm0, %v1015_v11 }
  0x25   : > { %975 = vmatmul.mubr.msk.bf16.gmra.mrb[8].mxu1 %vm351_vm0, %v1022_v14 }
  0x26   : > { %978 = vmatprep.mubr.msk.bf16.mxu1 %vm351_vm0, %v1023_v15 }
  0x2b   : > { %963 = vmatmul.mubr.msk.bf16.gmra.mrb[12].mxu0 %vm351_vm0, %v1016_v13 }
  0x2d   : > { %979 = vmatmul.mubr.msk.bf16.gmra.mrb[12].mxu1 %vm351_vm0, %v1024_v16 }
  0xe6   : > { %v952_v17 = vpop.f32.mrb[0].mxu0 }
  0xe7   : > { %564 = vst.msk [vmem:[%s1137_s26 + $0x10] sm:$0xff] %vm561_vm1, %v952_v17  ;;  %v434_v18 = vpop.f32.mrb[1].mxu0  ;;  %v665_v22 = vmul.f32 %v952_v17, %v952_v17  ;;  %v597_v27 = vsel %vm561_vm1, %v952_v17, 0.0 }
  0xe8   : > { %562 = vst.msk [vmem:[%s1137_s26] sm:$0xff] %vm561_vm1, %v434_v18  ;;  %v663_v19 = vmul.f32 %v434_v18, %v434_v18  ;;  %v953_v20 = vpop.f32.mrb[2].mxu0  ;;  %v594_v23 = vsel %vm561_vm1, %v434_v18, 0.0  ;;  %v1154_v36 = vpop.f32.mrb[0].mxu1 }
  0xe9   : > { %565 = vst.msk [vmem:[%s1137_s26 + $0x18] sm:$0xff] %vm561_vm1, %v953_v20  ;;  %v437_v21 = vpop.f32.mrb[3].mxu0  ;;  %v666_v29 = vmul.f32 %v953_v20, %v953_v20  ;;  %v698_v33 = vsel %vm561_vm1, %v665_v22, 0.0  ;;  %v599_v34 = vsel %vm561_vm1, %v953_v20, 0.0  ;;  %580 = vst.msk [vmem:[%s1137_s26 + $0x90] sm:$0xff] %vm561_vm1, %v1154_v36  ;;  %v1161_v40 = vpop.f32.mrb[1].mxu1 }
  0xea   : > { %563 = vst.msk [vmem:[%s1137_s26 + $0x8] sm:$0xff] %vm561_vm1, %v437_v21  ;;  %v595_v24 = vsel %vm561_vm1, %v437_v21, 0.0  ;;  %v664_v25 = vmul.f32 %v437_v21, %v437_v21  ;;  %v695_v28 = vsel %vm561_vm1, %v663_v19, 0.0  ;;  %578 = vst.msk [vmem:[%s1137_s26 + $0x80] sm:$0xff] %vm561_vm1, %v1161_v40  ;;  %v1170_v45 = vpop.f32.mrb[2].mxu1 }
  0xeb   : > { %v596_v26 = vadd.f32 %v595_v24, %v594_v23  ;;  %v700_v41 = vsel %vm561_vm1, %v666_v29, 0.0  ;;  %581 = vst.msk [vmem:[%s1137_s26 + $0x98] sm:$0xff] %vm561_vm1, %v1170_v45  ;;  %v1177_v49 = vpop.f32.mrb[3].mxu1 }
  0xec   : > { %v696_v30 = vsel %vm561_vm1, %v664_v25, 0.0  ;;  %579 = vst.msk [vmem:[%s1137_s26 + $0x88] sm:$0xff] %vm561_vm1, %v1177_v49 }
  0xed   : > { %v598_v31 = vadd.f32 %v597_v27, %v596_v26  ;;  %v697_v32 = vadd.f32 %v696_v30, %v695_v28 }
  0xee   : > { %v956_v35 = vpop.f32.mrb[4].mxu0 }
  0xef   : > { %v699_v37 = vadd.f32 %v698_v33, %v697_v32  ;;  %568 = vst.msk [vmem:[%s1137_s26 + $0x30] sm:$0xff] %vm561_vm1, %v956_v35  ;;  %v450_v38 = vpop.f32.mrb[5].mxu0  ;;  %v600_v39 = vadd.f32 %v599_v34, %v598_v31  ;;  %v669_v50 = vmul.f32 %v956_v35, %v956_v35  ;;  %v605_v56 = vsel %vm561_vm1, %v956_v35, 0.0 }
  0xf0   : > { %566 = vst.msk [vmem:[%s1137_s26 + $0x20] sm:$0xff] %vm561_vm1, %v450_v38  ;;  %v601_v42 = vsel %vm561_vm1, %v450_v38, 0.0  ;;  %v667_v43 = vmul.f32 %v450_v38, %v450_v38  ;;  %v957_v44 = vpop.f32.mrb[6].mxu0  ;;  %v1190_v0 = vpop.f32.mrb[4].mxu1 }
  0xf1   : > { %v602_v46 = vadd.f32 %v601_v42, %v600_v39  ;;  %v701_v47 = vadd.f32 %v700_v41, %v699_v37  ;;  %569 = vst.msk [vmem:[%s1137_s26 + $0x38] sm:$0xff] %vm561_vm1, %v957_v44  ;;  %v453_v48 = vpop.f32.mrb[7].mxu0  ;;  %v670_v57 = vmul.f32 %v957_v44, %v957_v44  ;;  %v706_v61 = vsel %vm561_vm1, %v669_v50, 0.0  ;;  %584 = vst.msk [vmem:[%s1137_s26 + $0xb0] sm:$0xff] %vm561_vm1, %v1190_v0  ;;  %v1197_v4 = vpop.f32.mrb[5].mxu1 }
  0xf2   : > { %v702_v51 = vsel %vm561_vm1, %v667_v43, 0.0  ;;  %567 = vst.msk [vmem:[%s1137_s26 + $0x28] sm:$0xff] %vm561_vm1, %v453_v48  ;;  %v603_v52 = vsel %vm561_vm1, %v453_v48, 0.0  ;;  %v668_v53 = vmul.f32 %v453_v48, %v453_v48  ;;  %v607_v62 = vsel %vm561_vm1, %v957_v44, 0.0  ;;  %582 = vst.msk [vmem:[%s1137_s26 + $0xa0] sm:$0xff] %vm561_vm1, %v1197_v4  ;;  %v1206_v9 = vpop.f32.mrb[6].mxu1 }
  0xf3   : > { %v703_v54 = vadd.f32 %v702_v51, %v701_v47  ;;  %v604_v55 = vadd.f32 %v603_v52, %v602_v46  ;;  %v708_v5 = vsel %vm561_vm1, %v670_v57, 0.0  ;;  %585 = vst.msk [vmem:[%s1137_s26 + $0xb8] sm:$0xff] %vm561_vm1, %v1206_v9  ;;  %v1213_v13 = vpop.f32.mrb[7].mxu1 }
  0xf4   : > { %v704_v58 = vsel %vm561_vm1, %v668_v53, 0.0  ;;  %583 = vst.msk [vmem:[%s1137_s26 + $0xa8] sm:$0xff] %vm561_vm1, %v1213_v13 }
  0xf5   : > { %v606_v59 = vadd.f32 %v605_v56, %v604_v55  ;;  %v705_v60 = vadd.f32 %v704_v58, %v703_v54  ;;  %v679_v55 = vmul.f32 %v1161_v40, %v1161_v40 }
  0xf6   : > { %v960_v63 = vpop.f32.mrb[8].mxu0 }
  0xf7   : > { %v707_v1 = vadd.f32 %v706_v61, %v705_v60  ;;  %572 = vst.msk [vmem:[%s1137_s26 + $0x50] sm:$0xff] %vm561_vm1, %v960_v63  ;;  %v466_v2 = vpop.f32.mrb[9].mxu0  ;;  %v608_v3 = vadd.f32 %v607_v62, %v606_v59  ;;  %v673_v14 = vmul.f32 %v960_v63, %v960_v63  ;;  %v613_v20 = vsel %vm561_vm1, %v960_v63, 0.0 }
  0xf8   : > { %570 = vst.msk [vmem:[%s1137_s26 + $0x40] sm:$0xff] %vm561_vm1, %v466_v2  ;;  %v609_v6 = vsel %vm561_vm1, %v466_v2, 0.0  ;;  %v671_v7 = vmul.f32 %v466_v2, %v466_v2  ;;  %v961_v8 = vpop.f32.mrb[10].mxu0  ;;  %v1226_v28 = vpop.f32.mrb[8].mxu1  ;;  %v625_v60 = vsel %vm561_vm1, %v1161_v40, 0.0 }
  0xf9   : > { %v610_v10 = vadd.f32 %v609_v6, %v608_v3  ;;  %v709_v11 = vadd.f32 %v708_v5, %v707_v1  ;;  %573 = vst.msk [vmem:[%s1137_s26 + $0x58] sm:$0xff] %vm561_vm1, %v961_v8  ;;  %v469_v12 = vpop.f32.mrb[11].mxu0  ;;  %v674_v21 = vmul.f32 %v961_v8, %v961_v8  ;;  %v714_v25 = vsel %vm561_vm1, %v673_v14, 0.0  ;;  %588 = vst.msk [vmem:[%s1137_s26 + $0xd0] sm:$0xff] %vm561_vm1, %v1226_v28  ;;  %v1233_v32 = vpop.f32.mrb[9].mxu1 }
  0xfa   : > { %v710_v15 = vsel %vm561_vm1, %v671_v7, 0.0  ;;  %571 = vst.msk [vmem:[%s1137_s26 + $0x48] sm:$0xff] %vm561_vm1, %v469_v12  ;;  %v611_v16 = vsel %vm561_vm1, %v469_v12, 0.0  ;;  %v672_v17 = vmul.f32 %v469_v12, %v469_v12  ;;  %v615_v26 = vsel %vm561_vm1, %v961_v8, 0.0  ;;  %586 = vst.msk [vmem:[%s1137_s26 + $0xc0] sm:$0xff] %vm561_vm1, %v1233_v32  ;;  %v1242_v38 = vpop.f32.mrb[10].mxu1 }
  0xfb   : > { %v711_v18 = vadd.f32 %v710_v15, %v709_v11  ;;  %v612_v19 = vadd.f32 %v611_v16, %v610_v10  ;;  %v716_v33 = vsel %vm561_vm1, %v674_v21, 0.0  ;;  %589 = vst.msk [vmem:[%s1137_s26 + $0xd8] sm:$0xff] %vm561_vm1, %v1242_v38  ;;  %v1249_v43 = vpop.f32.mrb[11].mxu1  ;;  %v726_v3 = vsel %vm561_vm1, %v679_v55, 0.0 }
  0xfc   : > { %v712_v22 = vsel %vm561_vm1, %v672_v17, 0.0  ;;  %587 = vst.msk [vmem:[%s1137_s26 + $0xc8] sm:$0xff] %vm561_vm1, %v1249_v43  ;;  %v680_v5 = vmul.f32 %v1177_v49, %v1177_v49  ;;  %v681_v10 = vmul.f32 %v1154_v36, %v1154_v36  ;;  %v627_v11 = vsel %vm561_vm1, %v1177_v49, 0.0 }
  0xfd   : > { %v614_v23 = vadd.f32 %v613_v20, %v612_v19  ;;  %v713_v24 = vadd.f32 %v712_v22, %v711_v18  ;;  %v629_v15 = vsel %vm561_vm1, %v1154_v36, 0.0  ;;  %v682_v16 = vmul.f32 %v1170_v45, %v1170_v45 }
  0xfe   : > { %v964_v27 = vpop.f32.mrb[12].mxu0  ;;  %v728_v17 = vsel %vm561_vm1, %v680_v5, 0.0  ;;  %v683_v18 = vmul.f32 %v1197_v4, %v1197_v4  ;;  %v730_v49 = vsel %vm561_vm1, %v681_v10, 0.0  ;;  %v631_v21 = vsel %vm561_vm1, %v1170_v45, 0.0 }
  0xff   : > { %v715_v29 = vadd.f32 %v714_v25, %v713_v24  ;;  %576 = vst.msk [vmem:[%s1137_s26 + $0x70] sm:$0xff] %vm561_vm1, %v964_v27  ;;  %v482_v30 = vpop.f32.mrb[13].mxu0  ;;  %v616_v31 = vadd.f32 %v615_v26, %v614_v23  ;;  %v677_v44 = vmul.f32 %v964_v27, %v964_v27  ;;  %v621_v52 = vsel %vm561_vm1, %v964_v27, 0.0 }
 0x100   : > { %574 = vst.msk [vmem:[%s1137_s26 + $0x60] sm:$0xff] %vm561_vm1, %v482_v30  ;;  %v617_v34 = vsel %vm561_vm1, %v482_v30, 0.0  ;;  %v675_v35 = vmul.f32 %v482_v30, %v482_v30  ;;  %v965_v37 = vpop.f32.mrb[14].mxu0  ;;  %v1266_v61 = vpop.f32.mrb[12].mxu1  ;;  %v633_v22 = vsel %vm561_vm1, %v1197_v4, 0.0  ;;  %v732_v24 = vsel %vm561_vm1, %v682_v16, 0.0 }
 0x101   : > { %v618_v39 = vadd.f32 %v617_v34, %v616_v31  ;;  %v717_v41 = vadd.f32 %v716_v33, %v715_v29  ;;  %577 = vst.msk [vmem:[%s1137_s26 + $0x78] sm:$0xff] %vm561_vm1, %v965_v37  ;;  %v485_v42 = vpop.f32.mrb[15].mxu0  ;;  %v678_v53 = vmul.f32 %v965_v37, %v965_v37  ;;  %v722_v58 = vsel %vm561_vm1, %v677_v44, 0.0  ;;  %592 = vst.msk [vmem:[%s1137_s26 + $0xf0] sm:$0xff] %vm561_vm1, %v1266_v61  ;;  %v1271_v1 = vpop.f32.mrb[13].mxu1 }
 0x102   : > { %v718_v46 = vsel %vm561_vm1, %v675_v35, 0.0  ;;  %575 = vst.msk [vmem:[%s1137_s26 + $0x68] sm:$0xff] %vm561_vm1, %v485_v42  ;;  %v619_v47 = vsel %vm561_vm1, %v485_v42, 0.0  ;;  %v676_v48 = vmul.f32 %v485_v42, %v485_v42  ;;  %v623_v59 = vsel %vm561_vm1, %v965_v37, 0.0  ;;  %590 = vst.msk [vmem:[%s1137_s26 + $0xe0] sm:$0xff] %vm561_vm1, %v1271_v1  ;;  %v1280_v40 = vpop.f32.mrb[14].mxu1 }
 0x103   : > { %v719_v50 = vadd.f32 %v718_v46, %v717_v41  ;;  %v620_v51 = vadd.f32 %v619_v47, %v618_v39  ;;  %v724_v2 = vsel %vm561_vm1, %v678_v53, 0.0  ;;  %593 = vst.msk [vmem:[%s1137_s26 + $0xf8] sm:$0xff] %vm561_vm1, %v1280_v40  ;;  %v1285_v8 = vpop.f32.mrb[15].mxu1  ;;  %v734_v25 = vsel %vm561_vm1, %v683_v18, 0.0 }
 0x104   : > { %v720_v54 = vsel %vm561_vm1, %v676_v48, 0.0  ;;  %591 = vst.msk [vmem:[%s1137_s26 + $0xe8] sm:$0xff] %vm561_vm1, %v1285_v8  ;;  %v684_v26 = vmul.f32 %v1213_v13, %v1213_v13  ;;  %v685_v30 = vmul.f32 %v1190_v0, %v1190_v0  ;;  %v635_v45 = vsel %vm561_vm1, %v1213_v13, 0.0 }
 0x105   : > { %v622_v56 = vadd.f32 %v621_v52, %v620_v51  ;;  %v721_v57 = vadd.f32 %v720_v54, %v719_v50  ;;  %v637_v4 = vsel %vm561_vm1, %v1190_v0, 0.0  ;;  %v686_v34 = vmul.f32 %v1206_v9, %v1206_v9 }
 0x106   : > { %v736_v35 = vsel %vm561_vm1, %v684_v26, 0.0  ;;  %v687_v37 = vmul.f32 %v1233_v32, %v1233_v32  ;;  %v738_v42 = vsel %vm561_vm1, %v685_v30, 0.0  ;;  %v639_v13 = vsel %vm561_vm1, %v1206_v9, 0.0 }
 0x107   : > { %v723_v62 = vadd.f32 %v722_v58, %v721_v57  ;;  %v624_v63 = vadd.f32 %v623_v59, %v622_v56  ;;  %v641_v44 = vsel %vm561_vm1, %v1233_v32, 0.0  ;;  %v740_v47 = vsel %vm561_vm1, %v686_v34, 0.0 }
 0x108   : > { %v742_v48 = vsel %vm561_vm1, %v687_v37, 0.0  ;;  %v688_v50 = vmul.f32 %v1249_v43, %v1249_v43  ;;  %v689_v53 = vmul.f32 %v1226_v28, %v1226_v28  ;;  %v643_v9 = vsel %vm561_vm1, %v1249_v43, 0.0 }
 0x109   : > { %v626_v6 = vadd.f32 %v625_v60, %v624_v63  ;;  %v725_v7 = vadd.f32 %v724_v2, %v723_v62  ;;  %v645_v32 = vsel %vm561_vm1, %v1226_v28, 0.0  ;;  %v690_v56 = vmul.f32 %v1242_v38, %v1242_v38 }
 0x10a   : > { %v744_v57 = vsel %vm561_vm1, %v688_v50, 0.0  ;;  %v691_v58 = vmul.f32 %v1271_v1, %v1271_v1  ;;  %v746_v62 = vsel %vm561_vm1, %v689_v53, 0.0  ;;  %v647_v43 = vsel %vm561_vm1, %v1242_v38, 0.0 }
 0x10b   : > { %v727_v12 = vadd.f32 %v726_v3, %v725_v7  ;;  %v628_v14 = vadd.f32 %v627_v11, %v626_v6  ;;  %v649_v63 = vsel %vm561_vm1, %v1271_v1, 0.0  ;;  %v748_v3 = vsel %vm561_vm1, %v690_v56, 0.0 }
 0x10c   : > { %v750_v5 = vsel %vm561_vm1, %v691_v58, 0.0  ;;  %v692_v6 = vmul.f32 %v1285_v8, %v1285_v8  ;;  %v693_v11 = vmul.f32 %v1266_v61, %v1266_v61  ;;  %v651_v38 = vsel %vm561_vm1, %v1285_v8, 0.0 }
 0x10d   : > { %v630_v19 = vadd.f32 %v629_v15, %v628_v14  ;;  %v729_v20 = vadd.f32 %v728_v17, %v727_v12  ;;  %v653_v14 = vsel %vm561_vm1, %v1266_v61, 0.0  ;;  %v694_v15 = vmul.f32 %v1280_v40, %v1280_v40 }
 0x10e   : > { %v752_v16 = vsel %vm561_vm1, %v692_v6, 0.0 }
 0x10f   : > { %v731_v23 = vadd.f32 %v730_v49, %v729_v20  ;;  %v632_v36 = vadd.f32 %v631_v21, %v630_v19  ;;  %v754_v19 = vsel %vm561_vm1, %v693_v11, 0.0  ;;  %v655_v20 = vsel %vm561_vm1, %v1280_v40, 0.0 }
 0x110   : > { %v756_v21 = vsel %vm561_vm1, %v694_v15, 0.0 }
 0x111   : > { %v634_v27 = vadd.f32 %v633_v22, %v632_v36  ;;  %v733_v29 = vadd.f32 %v732_v24, %v731_v23  ;;  %v764_v24 = vlaneseq }
 0x113   : > { %v735_v31 = vadd.f32 %v734_v25, %v733_v29  ;;  %v636_v33 = vadd.f32 %v635_v45, %v634_v27  ;;  %v765_v30 = vshrl.u32 %v764_v24, 7 }
 0x115   : > { %v638_v39 = vadd.f32 %v637_v4, %v636_v33  ;;  %v737_v41 = vadd.f32 %v736_v35, %v735_v31  ;;  %vm767_vm2 = vcmp.eq.s32.totalorder %v765_v30, 1  ;;  %vm766_vm3 = vcmp.eq.s32.totalorder %v765_v30, 0 }
 0x117   : > { %v739_v46 = vadd.f32 %v738_v42, %v737_v41  ;;  %v640_v0 = vadd.f32 %v639_v13, %v638_v39 }
 0x119   : > { %v642_v51 = vadd.f32 %v641_v44, %v640_v0  ;;  %v741_v52 = vadd.f32 %v740_v47, %v739_v46 }
 0x11b   : > { %v743_v54 = vadd.f32 %v742_v48, %v741_v52  ;;  %v644_v55 = vadd.f32 %v643_v9, %v642_v51 }
 0x11d   : > { %v646_v59 = vadd.f32 %v645_v32, %v644_v55  ;;  %v745_v60 = vadd.f32 %v744_v57, %v743_v54 }
 0x11f   : > { %v747_v2 = vadd.f32 %v746_v62, %v745_v60  ;;  %v648_v28 = vadd.f32 %v647_v43, %v646_v59 }
 0x121   : > { %v650_v7 = vadd.f32 %v649_v63, %v648_v28  ;;  %v749_v10 = vadd.f32 %v748_v3, %v747_v2 }
 0x123   : > { %v751_v12 = vadd.f32 %v750_v5, %v749_v10  ;;  %v652_v1 = vadd.f32 %v651_v38, %v650_v7 }
 0x125   : > { %v654_v17 = vadd.f32 %v653_v14, %v652_v1  ;;  %v753_v18 = vadd.f32 %v752_v16, %v751_v12 }
 0x127   : > { %v656_v49 = vadd.f32 %v655_v20, %v654_v17  ;;  %v755_v8 = vadd.f32 %v754_v19, %v753_v18 }
 0x129   : > { %v657_v22 = vrot.slane %v656_v49, 4  ;;  %v757_v23 = vadd.f32 %v756_v21, %v755_v8 }
 0x12b   : > { %v658_v61 = vadd.f32 %v657_v22, %v656_v49  ;;  %v758_v36 = vrot.slane %v757_v23, 4 }
 0x12d   : > { %v659_v25 = vrot.slane %v658_v61, 2  ;;  %v759_v26 = vadd.f32 %v758_v36, %v757_v23 }
 0x12f   : > { %v660_v27 = vadd.f32 %v659_v25, %v658_v61  ;;  %v760_v29 = vrot.slane %v759_v26, 2 }
 0x131   : > { %v761_v45 = vadd.f32 %v760_v29, %v759_v26  ;;  %v661_v31 = vrot.slane %v660_v27, 1 }
 0x133   : > { %v762_v40 = vrot.slane %v761_v45, 1  ;;  %v662_v4 = vadd.f32 %v661_v31, %v660_v27 }
 0x135   : > { %v763_v33 = vadd.f32 %v762_v40, %v761_v45 }
 0x137   : > { %v768_v34 = vsel %vm767_vm2, %v763_v33, 0.0 }
 0x138   : > { %v769_v35 = vsel %vm766_vm3, %v662_v4, %v768_v34 }
 0x139   : > { %770 = vst.msk [vmem:[%s229_s30] sm:$0xff] %vm561_vm1, %v769_v35 }
 0x13a PF: > { %s14_s14 = sadd.s32 1, %s1047_s14   ;;  %s1382_s12 = smov %s1043_s13 }
 0x13b   : > { %p11_p6 = scmp.ge.s32.totalorder %s14_s14, 4   ;;  %s1383_s13 = smov %s1385_s15 }
 0x13d   :  { %13 = sbr.rel (!%p11_p6) target bundleno = 2 (0x2), region = 73 }

// kernel: block_forward.14
= control target key start
LH: loop header
LB: loop body
LE: loop exit
PB: predicated region body
PF: predicated region fallthrough
CT: control target
= control target key end

     0   :  { %s1240_s12 = smov 0   ;;  %s1242_s13 = smov 0   ;;  %s1592_s0 = inlined_call_operand.vmem [shape: bf16[512,144], index: 0, kind: input, shape index: {}]   ;;  %s1593_s1 = inlined_call_operand.vmem [shape: bf16[144,16], index: 1, kind: input, shape index: {}]   ;;  %s1594_s2 = inlined_call_operand.vmem [shape: f32[512,16], index: 2, kind: output, shape index: {0}]   ;;  %s1595_s3 = inlined_call_operand.vmem [shape: f32[2,8,16], index: 3, kind: output, shape index: {1}]  }
   0x1   :  { %s1244_s14 = smov 0  }
   0x2 LB: > { %s26_s15 = sadd.s32 1, %s1213_s13  ;;  %p1028_p0 = scmp.ge.s32.totalorder %s1217_s14, 1  ;;  %s1217_s14 = sphi %s1244_s14, %s14_s14   ;;  %s1213_s13 = sphi %s1242_s13, %s1597_s13   ;;  %s1209_s12 = sphi %s1240_s12, %s1596_s12  }
   0x3   : > { %p28_p1 = scmp.ge.s32.totalorder %s26_s15, 2  ;;  %p172_p2 = scmp.lt.s32.totalorder %s1217_s14, 3 }
   0x5   : > { %s1599_s15 = smov (%p28_p1, %s26_s15), 0  ;;  %p173_p3 = pnand %p1028_p0, %p172_p2 }
   0x6   : > { %v1138_v0 = vld [vmem:[%s1593_s1] sm:$0xff] (!%p173_p3)   ;;  %v1219_v1 = vmov (!%p173_p3), 0   ;;  %s1029_s18 = sshll.u32 (!%p173_p3), %s1209_s12, 5  ;;  %v1139_v2 = vld [vmem:[%s1593_s1 + $0x8] sm:$0xff] (!%p173_p3)   ;;  %v1140_v3 = vld [vmem:[%s1593_s1 + $0x10] sm:$0xff] (!%p173_p3)   ;;  %vm487_vm0 = vcmask (!%p173_p3), 130048  }
   0x7   : > { %176 = sbr.rel (%p173_p3) target bundleno = 365 (0x16d), region = 28  ;;  %536 = vmatprep.subr.bf16.mxu0 (!%p173_p3), %v1219_v1  ;;  %1095 = vmatprep.subr.bf16.mxu1 (!%p173_p3), %v1219_v1  ;;  %p212_p4 = scmp.lt.s32.totalorder (!%p173_p3), %s1029_s18, 63  ;;  %v1141_v4 = vld [vmem:[%s1593_s1 + $0x18] sm:$0xff] (!%p173_p3)   ;;  %v1142_v6 = vld [vmem:[%s1593_s1 + $0x20] sm:$0xff] (!%p173_p3)   ;;  %v1143_v8 = vld [vmem:[%s1593_s1 + $0x28] sm:$0xff] (!%p173_p3)  }
   0x8   : > { %537 = vmatpush1.bf16.msra.mxu0 (!%p173_p3), %v1138_v0  ;;  %1104 = vmatpush1.bf16.msra.mxu1 (!%p173_p3), %v1138_v0  ;;  %v1144_v9 = vld [vmem:[%s1593_s1 + $0x30] sm:$0xff] (!%p173_p3)   ;;  %v1145_v10 = vld [vmem:[%s1593_s1 + $0x38] sm:$0xff] (!%p173_p3)   ;;  %v1146_v11 = vld [vmem:[%s1593_s1 + $0x40] sm:$0xff] (!%p173_p3)   ;;  %p234_p5 = scmp.lt.s32.totalorder (!%p173_p3), %s1209_s12, 1 }
   0x9   : > { %538 = vmatprep.subr.bf16.mxu0 (!%p173_p3), %v1219_v1  ;;  %1096 = vmatprep.subr.bf16.mxu1 (!%p173_p3), %v1219_v1 }
   0xc   : > { %539 = vmatpush1.bf16.msra.mxu0 (!%p173_p3), %v1139_v2  ;;  %1105 = vmatpush1.bf16.msra.mxu1 (!%p173_p3), %v1139_v2 }
   0xd   : > { %540 = vmatprep.subr.bf16.mxu0 (!%p173_p3), %v1219_v1  ;;  %1097 = vmatprep.subr.bf16.mxu1 (!%p173_p3), %v1219_v1 }
   0xe   : > { %s1601_s18 = smov (!%p212_p4, %s1029_s18), 63  ;;  %s1603_s12 = smov (!%p234_p5, %s1209_s12), 1 }
   0xf   : > { %s1094_s23 = sshll.u32 %s1601_s18, 3  ;;  %s1034_s18 = sshll.u32 %s1603_s12, 3 }
  0x10   : > { %s1278_s26 = scalar_lea.vmem %s1592_s0, %s1094_s23  ;;  %541 = vmatpush1.bf16.msra.mxu0 %v1140_v3  ;;  %1106 = vmatpush1.bf16.msra.mxu1 %v1140_v3  ;;  %s1351_s19 = scalar_lea.vmem %s1594_s2, %s1094_s23 }
  0x11   : > { %v1149_v5 = vld [vmem:[%s1278_s26 + $0x4] ss:$8 sps:$4 sm:$0xff]   ;;  %542 = vmatprep.subr.bf16.mxu0 %v1219_v1  ;;  %1098 = vmatprep.subr.bf16.mxu1 %v1219_v1  ;;  %v1147_v12 = vld [vmem:[%s1278_s26] ss:$8 sps:$4 sm:$0xff]   ;;  %v1150_v14 = vld [vmem:[%s1278_s26 + $0x14] ss:$8 sps:$4 sm:$0xff]   ;;  %s237_s22 = scalar_lea.vmem %s1595_s3, %s1034_s18 }
  0x12   : > { %1076 = vmatprep.mubr.msk.bf16.mxu0 %vm487_vm0, %v1149_v5  ;;  %v1161_v7 = vld [vmem:[%s1278_s26 + $0x84] ss:$8 sps:$4 sm:$0xff]   ;;  %v1159_v13 = vld [vmem:[%s1278_s26 + $0x80] ss:$8 sps:$4 sm:$0xff]   ;;  %v1165_v15 = vld [vmem:[%s1278_s26 + $0x94] ss:$8 sps:$4 sm:$0xff]  }
  0x13   : > { %1084 = vmatprep.mubr.msk.bf16.mxu1 %vm487_vm0, %v1161_v7  ;;  %v1152_v16 = vld [vmem:[%s1278_s26 + $0x10] ss:$8 sps:$4 sm:$0xff]   ;;  %v1153_v18 = vld [vmem:[%s1278_s26 + $0x24] ss:$8 sps:$4 sm:$0xff]   ;;  %v1155_v20 = vld [vmem:[%s1278_s26 + $0x20] ss:$8 sps:$4 sm:$0xff]  }
  0x14   : > { %543 = vmatpush1.bf16.msra.mxu0 %v1141_v4  ;;  %1107 = vmatpush1.bf16.msra.mxu1 %v1141_v4  ;;  %v1167_v17 = vld [vmem:[%s1278_s26 + $0x90] ss:$8 sps:$4 sm:$0xff]   ;;  %v1171_v19 = vld [vmem:[%s1278_s26 + $0xa4] ss:$8 sps:$4 sm:$0xff]   ;;  %v1173_v21 = vld [vmem:[%s1278_s26 + $0xa0] ss:$8 sps:$4 sm:$0xff]  }
  0x15   : > { %544 = vmatprep.subr.bf16.mxu0 %v1219_v1  ;;  %1099 = vmatprep.subr.bf16.mxu1 %v1219_v1  ;;  %v1156_v22 = vld [vmem:[%s1278_s26 + $0x34] ss:$8 sps:$4 sm:$0xff]   ;;  %v1158_v24 = vld [vmem:[%s1278_s26 + $0x30] ss:$8 sps:$4 sm:$0xff]   ;;  %v1162_v26 = vld [vmem:[%s1278_s26 + $0x44] ss:$8 sps:$4 sm:$0xff]  }
  0x16   : > { %v1177_v23 = vld [vmem:[%s1278_s26 + $0xb4] ss:$8 sps:$4 sm:$0xff]   ;;  %v1179_v25 = vld [vmem:[%s1278_s26 + $0xb0] ss:$8 sps:$4 sm:$0xff]   ;;  %v1183_v27 = vld [vmem:[%s1278_s26 + $0xc4] ss:$8 sps:$4 sm:$0xff]  }
  0x17   : > { %v1164_v28 = vld [vmem:[%s1278_s26 + $0x40] ss:$8 sps:$4 sm:$0xff]   ;;  %v1168_v30 = vld [vmem:[%s1278_s26 + $0x54] ss:$8 sps:$4 sm:$0xff]   ;;  %v1170_v32 = vld [vmem:[%s1278_s26 + $0x50] ss:$8 sps:$4 sm:$0xff]  }
  0x18   : > { %545 = vmatpush1.bf16.msra.mxu0 %v1142_v6  ;;  %1108 = vmatpush1.bf16.msra.mxu1 %v1142_v6  ;;  %v1185_v29 = vld [vmem:[%s1278_s26 + $0xc0] ss:$8 sps:$4 sm:$0xff]   ;;  %v1186_v31 = vld [vmem:[%s1278_s26 + $0xd4] ss:$8 sps:$4 sm:$0xff]   ;;  %v1188_v33 = vld [vmem:[%s1278_s26 + $0xd0] ss:$8 sps:$4 sm:$0xff]  }
  0x19   : > { %546 = vmatprep.subr.bf16.mxu0 %v1219_v1  ;;  %1100 = vmatprep.subr.bf16.mxu1 %v1219_v1  ;;  %v1174_v34 = vld [vmem:[%s1278_s26 + $0x64] ss:$8 sps:$4 sm:$0xff]   ;;  %v1176_v36 = vld [vmem:[%s1278_s26 + $0x60] ss:$8 sps:$4 sm:$0xff]   ;;  %v1180_v38 = vld [vmem:[%s1278_s26 + $0x74] ss:$8 sps:$4 sm:$0xff]  }
  0x1a   : > { %v1189_v35 = vld [vmem:[%s1278_s26 + $0xe4] ss:$8 sps:$4 sm:$0xff]   ;;  %v1191_v37 = vld [vmem:[%s1278_s26 + $0xe0] ss:$8 sps:$4 sm:$0xff]   ;;  %v1192_v39 = vld [vmem:[%s1278_s26 + $0xf4] ss:$8 sps:$4 sm:$0xff]  }
  0x1b   : > { %v1182_v40 = vld [vmem:[%s1278_s26 + $0x70] ss:$8 sps:$4 sm:$0xff]  }
  0x1c   : > { %547 = vmatpush1.bf16.msra.mxu0 %v1143_v8  ;;  %1109 = vmatpush1.bf16.msra.mxu1 %v1143_v8  ;;  %v1194_v41 = vld [vmem:[%s1278_s26 + $0xf0] ss:$8 sps:$4 sm:$0xff]  }
  0x1d   : > { %548 = vmatprep.subr.bf16.mxu0 %v1219_v1  ;;  %1101 = vmatprep.subr.bf16.mxu1 %v1219_v1 }
  0x20   : > { %549 = vmatpush1.bf16.msra.mxu0 %v1144_v9  ;;  %1110 = vmatpush1.bf16.msra.mxu1 %v1144_v9 }
  0x21   : > { %550 = vmatprep.subr.bf16.mxu0 %v1219_v1  ;;  %1102 = vmatprep.subr.bf16.mxu1 %v1219_v1 }
  0x24   : > { %551 = vmatpush1.bf16.msra.mxu0 %v1145_v10  ;;  %1111 = vmatpush1.bf16.msra.mxu1 %v1145_v10 }
  0x25   : > { %552 = vmatprep.subr.bf16.mxu0 %v1219_v1  ;;  %1103 = vmatprep.subr.bf16.mxu1 %v1219_v1 }
  0x28   : > { %553 = vmatpush1.bf16.msra.mxu0 %v1146_v11  ;;  %1112 = vmatpush1.bf16.msra.mxu1 %v1146_v11 }
  0x2b   : > { %569 = vmatmul.mubr.bf16.vlgmr.msra.gmra.mrb[0].mxu0 %v1147_v12  ;;  %633 = vmatmul.mubr.bf16.vlgmr.msra.gmra.mrb[0].mxu1 %v1159_v13 }
  0x2c   : > { %1077 = vmatprep.mubr.msk.bf16.mxu0 %vm487_vm0, %v1150_v14  ;;  %1085 = vmatprep.mubr.msk.bf16.mxu1 %vm487_vm0, %v1165_v15 }
  0x33   : > { %577 = vmatmul.mubr.bf16.gmra.mrb[4].mxu0 %v1152_v16  ;;  %641 = vmatmul.mubr.bf16.gmra.mrb[4].mxu1 %v1167_v17 }
  0x34   : > { %1078 = vmatprep.mubr.msk.bf16.mxu0 %vm487_vm0, %v1153_v18  ;;  %1086 = vmatprep.mubr.msk.bf16.mxu1 %vm487_vm0, %v1171_v19 }
  0x3b   : > { %585 = vmatmul.mubr.bf16.gmra.mrb[8].mxu0 %v1155_v20  ;;  %649 = vmatmul.mubr.bf16.gmra.mrb[8].mxu1 %v1173_v21 }
  0x3c   : > { %1079 = vmatprep.mubr.msk.bf16.mxu0 %vm487_vm0, %v1156_v22  ;;  %1087 = vmatprep.mubr.msk.bf16.mxu1 %vm487_vm0, %v1177_v23 }
  0x43   : > { %593 = vmatmul.mubr.bf16.gmra.mrb[12].mxu0 %v1158_v24  ;;  %657 = vmatmul.mubr.bf16.gmra.mrb[12].mxu1 %v1179_v25 }
  0x44   : > { %1080 = vmatprep.mubr.msk.bf16.mxu0 %vm487_vm0, %v1162_v26  ;;  %1088 = vmatprep.mubr.msk.bf16.mxu1 %vm487_vm0, %v1183_v27 }
  0x4b   : > { %601 = vmatmul.mubr.bf16.gmra.mrb[16].mxu0 %v1164_v28  ;;  %665 = vmatmul.mubr.bf16.gmra.mrb[16].mxu1 %v1185_v29 }
  0x4c   : > { %1081 = vmatprep.mubr.msk.bf16.mxu0 %vm487_vm0, %v1168_v30  ;;  %1089 = vmatprep.mubr.msk.bf16.mxu1 %vm487_vm0, %v1186_v31 }
  0x53   : > { %609 = vmatmul.mubr.bf16.gmra.mrb[20].mxu0 %v1170_v32  ;;  %673 = vmatmul.mubr.bf16.gmra.mrb[20].mxu1 %v1188_v33 }
  0x54   : > { %1082 = vmatprep.mubr.msk.bf16.mxu0 %vm487_vm0, %v1174_v34  ;;  %1090 = vmatprep.mubr.msk.bf16.mxu1 %vm487_vm0, %v1189_v35 }
  0x5b   : > { %617 = vmatmul.mubr.bf16.gmra.mrb[24].mxu0 %v1176_v36  ;;  %681 = vmatmul.mubr.bf16.gmra.mrb[24].mxu1 %v1191_v37 }
  0x5c   : > { %1083 = vmatprep.mubr.msk.bf16.mxu0 %vm487_vm0, %v1180_v38  ;;  %1091 = vmatprep.mubr.msk.bf16.mxu1 %vm487_vm0, %v1192_v39 }
  0x63   : > { %625 = vmatmul.mubr.bf16.gmra.mrb[28].mxu0 %v1182_v40  ;;  %689 = vmatmul.mubr.bf16.gmra.mrb[28].mxu1 %v1194_v41 }
  0xfe   : > { %v570_v42 = vpop.f32.mrb[0].mxu0  ;;  %v1353_v43 = vpop.f32.mrb[0].mxu1 }
  0xff   : > { %697 = vst.msk [vmem:[%s1351_s19] sm:$0xff] %vm487_vm0, %v570_v42  ;;  %v798_v44 = vmul.f32 %v570_v42, %v570_v42  ;;  %v572_v45 = vpop.f32.mrb[1].mxu0  ;;  %713 = vst.msk [vmem:[%s1351_s19 + $0x80] sm:$0xff] %vm487_vm0, %v1353_v43  ;;  %v636_v46 = vpop.f32.mrb[1].mxu1  ;;  %v729_v49 = vsel %vm487_vm0, %v570_v42, 0.0 }
 0x100   : > { %v573_v47 = vpop.f32.mrb[2].mxu0  ;;  %v1360_v48 = vpop.f32.mrb[2].mxu1 }
 0x101   : > { %698 = vst.msk [vmem:[%s1351_s19 + $0x8] sm:$0xff] %vm487_vm0, %v573_v47  ;;  %v730_v50 = vsel %vm487_vm0, %v573_v47, 0.0  ;;  %v799_v51 = vmul.f32 %v573_v47, %v573_v47  ;;  %v575_v52 = vpop.f32.mrb[3].mxu0  ;;  %714 = vst.msk [vmem:[%s1351_s19 + $0x88] sm:$0xff] %vm487_vm0, %v1360_v48  ;;  %v639_v53 = vpop.f32.mrb[3].mxu1  ;;  %v830_v55 = vsel %vm487_vm0, %v798_v44, 0.0 }
 0x102   : > { %v731_v54 = vadd.f32 %v730_v50, %v729_v49 }
 0x103   : > { %v831_v56 = vsel %vm487_vm0, %v799_v51, 0.0 }
 0x104   : > { %v832_v57 = vadd.f32 %v831_v56, %v830_v55 }
 0x106   : > { %v578_v58 = vpop.f32.mrb[4].mxu0  ;;  %v1371_v59 = vpop.f32.mrb[4].mxu1 }
 0x107   : > { %699 = vst.msk [vmem:[%s1351_s19 + $0x10] sm:$0xff] %vm487_vm0, %v578_v58  ;;  %v732_v60 = vsel %vm487_vm0, %v578_v58, 0.0  ;;  %v800_v61 = vmul.f32 %v578_v58, %v578_v58  ;;  %v580_v62 = vpop.f32.mrb[5].mxu0  ;;  %715 = vst.msk [vmem:[%s1351_s19 + $0x90] sm:$0xff] %vm487_vm0, %v1371_v59  ;;  %v644_v63 = vpop.f32.mrb[5].mxu1 }
 0x108   : > { %v733_v0 = vadd.f32 %v732_v60, %v731_v54  ;;  %v581_v1 = vpop.f32.mrb[6].mxu0  ;;  %v1379_v2 = vpop.f32.mrb[6].mxu1 }
 0x109   : > { %v833_v3 = vsel %vm487_vm0, %v800_v61, 0.0  ;;  %700 = vst.msk [vmem:[%s1351_s19 + $0x18] sm:$0xff] %vm487_vm0, %v581_v1  ;;  %v734_v4 = vsel %vm487_vm0, %v581_v1, 0.0  ;;  %v801_v5 = vmul.f32 %v581_v1, %v581_v1  ;;  %v583_v6 = vpop.f32.mrb[7].mxu0  ;;  %716 = vst.msk [vmem:[%s1351_s19 + $0x98] sm:$0xff] %vm487_vm0, %v1379_v2  ;;  %v647_v7 = vpop.f32.mrb[7].mxu1 }
 0x10a   : > { %v834_v8 = vadd.f32 %v833_v3, %v832_v57  ;;  %v735_v9 = vadd.f32 %v734_v4, %v733_v0 }
 0x10b   : > { %v835_v10 = vsel %vm487_vm0, %v801_v5, 0.0 }
 0x10c   : > { %v836_v11 = vadd.f32 %v835_v10, %v834_v8 }
 0x10e   : > { %v586_v12 = vpop.f32.mrb[8].mxu0  ;;  %v1389_v13 = vpop.f32.mrb[8].mxu1 }
 0x10f   : > { %701 = vst.msk [vmem:[%s1351_s19 + $0x20] sm:$0xff] %vm487_vm0, %v586_v12  ;;  %v736_v14 = vsel %vm487_vm0, %v586_v12, 0.0  ;;  %v802_v15 = vmul.f32 %v586_v12, %v586_v12  ;;  %v588_v16 = vpop.f32.mrb[9].mxu0  ;;  %717 = vst.msk [vmem:[%s1351_s19 + $0xa0] sm:$0xff] %vm487_vm0, %v1389_v13  ;;  %v652_v17 = vpop.f32.mrb[9].mxu1 }
 0x110   : > { %v737_v18 = vadd.f32 %v736_v14, %v735_v9  ;;  %v589_v19 = vpop.f32.mrb[10].mxu0  ;;  %v1397_v20 = vpop.f32.mrb[10].mxu1 }
 0x111   : > { %v837_v21 = vsel %vm487_vm0, %v802_v15, 0.0  ;;  %702 = vst.msk [vmem:[%s1351_s19 + $0x28] sm:$0xff] %vm487_vm0, %v589_v19  ;;  %v738_v22 = vsel %vm487_vm0, %v589_v19, 0.0  ;;  %v803_v23 = vmul.f32 %v589_v19, %v589_v19  ;;  %v591_v24 = vpop.f32.mrb[11].mxu0  ;;  %718 = vst.msk [vmem:[%s1351_s19 + $0xa8] sm:$0xff] %vm487_vm0, %v1397_v20  ;;  %v655_v25 = vpop.f32.mrb[11].mxu1 }
 0x112   : > { %v838_v26 = vadd.f32 %v837_v21, %v836_v11  ;;  %v739_v27 = vadd.f32 %v738_v22, %v737_v18 }
 0x113   : > { %v839_v28 = vsel %vm487_vm0, %v803_v23, 0.0 }
 0x114   : > { %v840_v29 = vadd.f32 %v839_v28, %v838_v26 }
 0x116   : > { %v594_v30 = vpop.f32.mrb[12].mxu0  ;;  %v1407_v31 = vpop.f32.mrb[12].mxu1 }
 0x117   : > { %703 = vst.msk [vmem:[%s1351_s19 + $0x30] sm:$0xff] %vm487_vm0, %v594_v30  ;;  %v740_v32 = vsel %vm487_vm0, %v594_v30, 0.0  ;;  %v804_v33 = vmul.f32 %v594_v30, %v594_v30  ;;  %v596_v34 = vpop.f32.mrb[13].mxu0  ;;  %719 = vst.msk [vmem:[%s1351_s19 + $0xb0] sm:$0xff] %vm487_vm0, %v1407_v31  ;;  %v660_v35 = vpop.f32.mrb[13].mxu1 }
 0x118   : > { %v741_v36 = vadd.f32 %v740_v32, %v739_v27  ;;  %v597_v37 = vpop.f32.mrb[14].mxu0  ;;  %v1415_v38 = vpop.f32.mrb[14].mxu1 }
 0x119   : > { %v841_v39 = vsel %vm487_vm0, %v804_v33, 0.0  ;;  %704 = vst.msk [vmem:[%s1351_s19 + $0x38] sm:$0xff] %vm487_vm0, %v597_v37  ;;  %v742_v40 = vsel %vm487_vm0, %v597_v37, 0.0  ;;  %v805_v41 = vmul.f32 %v597_v37, %v597_v37  ;;  %v599_v42 = vpop.f32.mrb[15].mxu0  ;;  %720 = vst.msk [vmem:[%s1351_s19 + $0xb8] sm:$0xff] %vm487_vm0, %v1415_v38  ;;  %v663_v44 = vpop.f32.mrb[15].mxu1 }
 0x11a   : > { %v842_v45 = vadd.f32 %v841_v39, %v840_v29  ;;  %v743_v46 = vadd.f32 %v742_v40, %v741_v36 }
 0x11b   : > { %v843_v47 = vsel %vm487_vm0, %v805_v41, 0.0 }
 0x11c   : > { %v844_v49 = vadd.f32 %v843_v47, %v842_v45 }
 0x11e   : > { %v602_v50 = vpop.f32.mrb[16].mxu0  ;;  %v1425_v51 = vpop.f32.mrb[16].mxu1 }
 0x11f   : > { %705 = vst.msk [vmem:[%s1351_s19 + $0x40] sm:$0xff] %vm487_vm0, %v602_v50  ;;  %v744_v52 = vsel %vm487_vm0, %v602_v50, 0.0  ;;  %v806_v53 = vmul.f32 %v602_v50, %v602_v50  ;;  %v604_v54 = vpop.f32.mrb[17].mxu0  ;;  %721 = vst.msk [vmem:[%s1351_s19 + $0xc0] sm:$0xff] %vm487_vm0, %v1425_v51  ;;  %v668_v55 = vpop.f32.mrb[17].mxu1 }
 0x120   : > { %v745_v56 = vadd.f32 %v744_v52, %v743_v46  ;;  %v605_v57 = vpop.f32.mrb[18].mxu0  ;;  %v1433_v58 = vpop.f32.mrb[18].mxu1 }
 0x121   : > { %v845_v60 = vsel %vm487_vm0, %v806_v53, 0.0  ;;  %706 = vst.msk [vmem:[%s1351_s19 + $0x48] sm:$0xff] %vm487_vm0, %v605_v57  ;;  %v746_v61 = vsel %vm487_vm0, %v605_v57, 0.0  ;;  %v807_v62 = vmul.f32 %v605_v57, %v605_v57  ;;  %v607_v63 = vpop.f32.mrb[19].mxu0  ;;  %722 = vst.msk [vmem:[%s1351_s19 + $0xc8] sm:$0xff] %vm487_vm0, %v1433_v58  ;;  %v671_v0 = vpop.f32.mrb[19].mxu1 }
 0x122   : > { %v846_v1 = vadd.f32 %v845_v60, %v844_v49  ;;  %v747_v3 = vadd.f32 %v746_v61, %v745_v56  ;;  %v814_v60 = vmul.f32 %v1353_v43, %v1353_v43 }
 0x123   : > { %v847_v4 = vsel %vm487_vm0, %v807_v62, 0.0 }
 0x124   : > { %v848_v5 = vadd.f32 %v847_v4, %v846_v1 }
 0x126   : > { %v610_v6 = vpop.f32.mrb[20].mxu0  ;;  %v1443_v7 = vpop.f32.mrb[20].mxu1 }
 0x127   : > { %707 = vst.msk [vmem:[%s1351_s19 + $0x50] sm:$0xff] %vm487_vm0, %v610_v6  ;;  %v748_v8 = vsel %vm487_vm0, %v610_v6, 0.0  ;;  %v808_v9 = vmul.f32 %v610_v6, %v610_v6  ;;  %v612_v10 = vpop.f32.mrb[21].mxu0  ;;  %723 = vst.msk [vmem:[%s1351_s19 + $0xd0] sm:$0xff] %vm487_vm0, %v1443_v7  ;;  %v676_v11 = vpop.f32.mrb[21].mxu1  ;;  %v815_v6 = vmul.f32 %v1360_v48, %v1360_v48 }
 0x128   : > { %v749_v12 = vadd.f32 %v748_v8, %v747_v3  ;;  %v613_v14 = vpop.f32.mrb[22].mxu0  ;;  %v1451_v15 = vpop.f32.mrb[22].mxu1  ;;  %v861_v11 = vsel %vm487_vm0, %v814_v60, 0.0 }
 0x129   : > { %v849_v16 = vsel %vm487_vm0, %v808_v9, 0.0  ;;  %708 = vst.msk [vmem:[%s1351_s19 + $0x58] sm:$0xff] %vm487_vm0, %v613_v14  ;;  %v750_v17 = vsel %vm487_vm0, %v613_v14, 0.0  ;;  %v809_v18 = vmul.f32 %v613_v14, %v613_v14  ;;  %v615_v19 = vpop.f32.mrb[23].mxu0  ;;  %724 = vst.msk [vmem:[%s1351_s19 + $0xd8] sm:$0xff] %vm487_vm0, %v1451_v15  ;;  %v679_v21 = vpop.f32.mrb[23].mxu1  ;;  %v816_v14 = vmul.f32 %v1371_v59, %v1371_v59 }
 0x12a   : > { %v850_v22 = vadd.f32 %v849_v16, %v848_v5  ;;  %v751_v23 = vadd.f32 %v750_v17, %v749_v12  ;;  %v760_v5 = vsel %vm487_vm0, %v1353_v43, 0.0  ;;  %v762_v12 = vsel %vm487_vm0, %v1360_v48, 0.0 }
 0x12b   : > { %v851_v24 = vsel %vm487_vm0, %v809_v18, 0.0  ;;  %v863_v18 = vsel %vm487_vm0, %v815_v6, 0.0  ;;  %v764_v43 = vsel %vm487_vm0, %v1371_v59, 0.0  ;;  %v817_v19 = vmul.f32 %v1379_v2, %v1379_v2 }
 0x12c   : > { %v852_v25 = vadd.f32 %v851_v24, %v850_v22  ;;  %v766_v48 = vsel %vm487_vm0, %v1379_v2, 0.0  ;;  %v818_v24 = vmul.f32 %v1389_v13, %v1389_v13  ;;  %v768_v59 = vsel %vm487_vm0, %v1389_v13, 0.0 }
 0x12d   : > { %v770_v2 = vsel %vm487_vm0, %v1397_v20, 0.0  ;;  %v772_v13 = vsel %vm487_vm0, %v1407_v31, 0.0 }
 0x12e   : > { %v618_v26 = vpop.f32.mrb[24].mxu0  ;;  %v1461_v27 = vpop.f32.mrb[24].mxu1 }
 0x12f   : > { %709 = vst.msk [vmem:[%s1351_s19 + $0x60] sm:$0xff] %vm487_vm0, %v618_v26  ;;  %v752_v28 = vsel %vm487_vm0, %v618_v26, 0.0  ;;  %v810_v29 = vmul.f32 %v618_v26, %v618_v26  ;;  %v620_v30 = vpop.f32.mrb[25].mxu0  ;;  %725 = vst.msk [vmem:[%s1351_s19 + $0xe0] sm:$0xff] %vm487_vm0, %v1461_v27  ;;  %v684_v32 = vpop.f32.mrb[25].mxu1 }
 0x130   : > { %v753_v33 = vadd.f32 %v752_v28, %v751_v23  ;;  %v621_v34 = vpop.f32.mrb[26].mxu0  ;;  %v1469_v35 = vpop.f32.mrb[26].mxu1  ;;  %v865_v23 = vsel %vm487_vm0, %v816_v14, 0.0  ;;  %v867_v28 = vsel %vm487_vm0, %v817_v19, 0.0 }
 0x131   : > { %v853_v36 = vsel %vm487_vm0, %v810_v29, 0.0  ;;  %710 = vst.msk [vmem:[%s1351_s19 + $0x68] sm:$0xff] %vm487_vm0, %v621_v34  ;;  %v754_v37 = vsel %vm487_vm0, %v621_v34, 0.0  ;;  %v811_v39 = vmul.f32 %v621_v34, %v621_v34  ;;  %v623_v40 = vpop.f32.mrb[27].mxu0  ;;  %726 = vst.msk [vmem:[%s1351_s19 + $0xe8] sm:$0xff] %vm487_vm0, %v1469_v35  ;;  %v687_v41 = vpop.f32.mrb[27].mxu1  ;;  %v819_v29 = vmul.f32 %v1397_v20, %v1397_v20 }
 0x132   : > { %v854_v42 = vadd.f32 %v853_v36, %v852_v25  ;;  %v755_v44 = vadd.f32 %v754_v37, %v753_v33  ;;  %v869_v33 = vsel %vm487_vm0, %v818_v24, 0.0  ;;  %v820_v34 = vmul.f32 %v1407_v31, %v1407_v31 }
 0x133   : > { %v855_v45 = vsel %vm487_vm0, %v811_v39, 0.0  ;;  %v871_v39 = vsel %vm487_vm0, %v819_v29, 0.0  ;;  %v821_v40 = vmul.f32 %v1415_v38, %v1415_v38  ;;  %v774_v20 = vsel %vm487_vm0, %v1415_v38, 0.0 }
 0x134   : > { %v856_v46 = vadd.f32 %v855_v45, %v854_v42  ;;  %v822_v45 = vmul.f32 %v1425_v51, %v1425_v51  ;;  %v776_v31 = vsel %vm487_vm0, %v1425_v51, 0.0  ;;  %v778_v38 = vsel %vm487_vm0, %v1433_v58, 0.0 }
 0x135   : > { %v780_v51 = vsel %vm487_vm0, %v1443_v7, 0.0  ;;  %v786_v14 = vsel %vm487_vm0, %v1469_v35, 0.0 }
 0x136   : > { %v626_v47 = vpop.f32.mrb[28].mxu0  ;;  %v1479_v49 = vpop.f32.mrb[28].mxu1 }
 0x137   : > { %711 = vst.msk [vmem:[%s1351_s19 + $0x70] sm:$0xff] %vm487_vm0, %v626_v47  ;;  %v756_v50 = vsel %vm487_vm0, %v626_v47, 0.0  ;;  %v812_v52 = vmul.f32 %v626_v47, %v626_v47  ;;  %v628_v53 = vpop.f32.mrb[29].mxu0  ;;  %727 = vst.msk [vmem:[%s1351_s19 + $0xf0] sm:$0xff] %vm487_vm0, %v1479_v49  ;;  %v692_v54 = vpop.f32.mrb[29].mxu1 }
 0x138   : > { %v757_v55 = vadd.f32 %v756_v50, %v755_v44  ;;  %v629_v56 = vpop.f32.mrb[30].mxu0  ;;  %v1487_v57 = vpop.f32.mrb[30].mxu1  ;;  %v873_v44 = vsel %vm487_vm0, %v820_v34, 0.0  ;;  %v875_v50 = vsel %vm487_vm0, %v821_v40, 0.0 }
 0x139   : > { %v857_v61 = vsel %vm487_vm0, %v812_v52, 0.0  ;;  %712 = vst.msk [vmem:[%s1351_s19 + $0x78] sm:$0xff] %vm487_vm0, %v629_v56  ;;  %v758_v62 = vsel %vm487_vm0, %v629_v56, 0.0  ;;  %v813_v63 = vmul.f32 %v629_v56, %v629_v56  ;;  %v631_v0 = vpop.f32.mrb[31].mxu0  ;;  %728 = vst.msk [vmem:[%s1351_s19 + $0xf8] sm:$0xff] %vm487_vm0, %v1487_v57  ;;  %v695_v1 = vpop.f32.mrb[31].mxu1  ;;  %v823_v52 = vmul.f32 %v1433_v58, %v1433_v58 }
 0x13a   : > { %v858_v3 = vadd.f32 %v857_v61, %v856_v46  ;;  %v759_v4 = vadd.f32 %v758_v62, %v757_v55  ;;  %v877_v55 = vsel %vm487_vm0, %v822_v45, 0.0  ;;  %v824_v56 = vmul.f32 %v1443_v7, %v1443_v7 }
 0x13b   : > { %v859_v8 = vsel %vm487_vm0, %v813_v63, 0.0  ;;  %v879_v62 = vsel %vm487_vm0, %v823_v52, 0.0  ;;  %v825_v63 = vmul.f32 %v1451_v15, %v1451_v15  ;;  %v782_v58 = vsel %vm487_vm0, %v1451_v15, 0.0 }
 0x13c   : > { %v761_v9 = vadd.f32 %v760_v5, %v759_v4  ;;  %v860_v10 = vadd.f32 %v859_v8, %v858_v3  ;;  %v881_v3 = vsel %vm487_vm0, %v824_v56, 0.0  ;;  %v826_v4 = vmul.f32 %v1461_v27, %v1461_v27 }
 0x13d   : > { %v883_v8 = vsel %vm487_vm0, %v825_v63, 0.0  ;;  %v784_v7 = vsel %vm487_vm0, %v1461_v27, 0.0  ;;  %v829_v19 = vmul.f32 %v1487_v57, %v1487_v57 }
 0x13e   : > { %v763_v16 = vadd.f32 %v762_v12, %v761_v9  ;;  %v862_v17 = vadd.f32 %v861_v11, %v860_v10  ;;  %v827_v9 = vmul.f32 %v1469_v35, %v1469_v35  ;;  %v828_v10 = vmul.f32 %v1479_v49, %v1479_v49 }
 0x13f   : > { %v885_v15 = vsel %vm487_vm0, %v826_v4, 0.0  ;;  %v891_v24 = vsel %vm487_vm0, %v829_v19, 0.0 }
 0x140   : > { %v765_v21 = vadd.f32 %v764_v43, %v763_v16  ;;  %v864_v22 = vadd.f32 %v863_v18, %v862_v17  ;;  %v788_v16 = vsel %vm487_vm0, %v1479_v49, 0.0  ;;  %v887_v27 = vsel %vm487_vm0, %v827_v9, 0.0 }
 0x141   : > { %v889_v43 = vsel %vm487_vm0, %v828_v10, 0.0 }
 0x142   : > { %v767_v25 = vadd.f32 %v766_v48, %v765_v21  ;;  %v866_v26 = vadd.f32 %v865_v23, %v864_v22  ;;  %v790_v23 = vsel %vm487_vm0, %v1487_v57, 0.0 }
 0x144   : > { %v868_v30 = vadd.f32 %v867_v28, %v866_v26  ;;  %v769_v32 = vadd.f32 %v768_v59, %v767_v25  ;;  %v899_v59 = vlaneseq }
 0x146   : > { %v771_v36 = vadd.f32 %v770_v2, %v769_v32  ;;  %v870_v37 = vadd.f32 %v869_v33, %v868_v30  ;;  %v900_v2 = vshrl.u32 %v899_v59, 7 }
 0x148   : > { %v773_v41 = vadd.f32 %v772_v13, %v771_v36  ;;  %v872_v42 = vadd.f32 %v871_v39, %v870_v37  ;;  %vm902_vm1 = vcmp.eq.s32.totalorder %v900_v2, 1  ;;  %vm901_vm2 = vcmp.eq.s32.totalorder %v900_v2, 0 }
 0x14a   : > { %v775_v46 = vadd.f32 %v774_v20, %v773_v41  ;;  %v874_v47 = vadd.f32 %v873_v44, %v872_v42 }
 0x14c   : > { %v777_v53 = vadd.f32 %v776_v31, %v775_v46  ;;  %v876_v54 = vadd.f32 %v875_v50, %v874_v47 }
 0x14e   : > { %v878_v60 = vadd.f32 %v877_v55, %v876_v54  ;;  %v779_v61 = vadd.f32 %v778_v38, %v777_v53 }
 0x150   : > { %v880_v0 = vadd.f32 %v879_v62, %v878_v60  ;;  %v781_v1 = vadd.f32 %v780_v51, %v779_v61 }
 0x152   : > { %v882_v5 = vadd.f32 %v881_v3, %v880_v0  ;;  %v783_v6 = vadd.f32 %v782_v58, %v781_v1 }
 0x154   : > { %v884_v11 = vadd.f32 %v883_v8, %v882_v5  ;;  %v785_v12 = vadd.f32 %v784_v7, %v783_v6 }
 0x156   : > { %v886_v17 = vadd.f32 %v885_v15, %v884_v11  ;;  %v787_v18 = vadd.f32 %v786_v14, %v785_v12 }
 0x158   : > { %v888_v21 = vadd.f32 %v887_v27, %v886_v17  ;;  %v789_v22 = vadd.f32 %v788_v16, %v787_v18 }
 0x15a   : > { %v890_v48 = vadd.f32 %v889_v43, %v888_v21  ;;  %v791_v35 = vadd.f32 %v790_v23, %v789_v22 }
 0x15c   : > { %v792_v49 = vrot.slane %v791_v35, 4  ;;  %v892_v25 = vadd.f32 %v891_v24, %v890_v48 }
 0x15e   : > { %v793_v26 = vadd.f32 %v792_v49, %v791_v35  ;;  %v893_v28 = vrot.slane %v892_v25, 4 }
 0x160   : > { %v794_v29 = vrot.slane %v793_v26, 2  ;;  %v894_v30 = vadd.f32 %v893_v28, %v892_v25 }
 0x162   : > { %v795_v32 = vadd.f32 %v794_v29, %v793_v26  ;;  %v895_v33 = vrot.slane %v894_v30, 2 }
 0x164   : > { %v896_v34 = vadd.f32 %v895_v33, %v894_v30  ;;  %v796_v36 = vrot.slane %v795_v32, 1 }
 0x166   : > { %v897_v57 = vrot.slane %v896_v34, 1  ;;  %v797_v39 = vadd.f32 %v796_v36, %v795_v32 }
 0x168   : > { %v898_v37 = vadd.f32 %v897_v57, %v896_v34 }
 0x16a   : > { %v903_v13 = vsel %vm902_vm1, %v898_v37, 0.0 }
 0x16b   : > { %v904_v40 = vsel %vm901_vm2, %v797_v39, %v903_v13 }
 0x16c   : > { %905 = vst.msk [vmem:[%s237_s22] sm:$0xff] %vm487_vm0, %v904_v40 }
 0x16d PF: > { %s14_s14 = sadd.s32 1, %s1217_s14   ;;  %s1596_s12 = smov %s1213_s13 }
 0x16e   : > { %p11_p6 = scmp.ge.s32.totalorder %s14_s14, 4   ;;  %s1597_s13 = smov %s1599_s15 }
 0x170   :  { %13 = sbr.rel (!%p11_p6) target bundleno = 2 (0x2), region = 73 }

// kernel: block_forward.15
= control target key start
LH: loop header
LB: loop body
LE: loop exit
PB: predicated region body
PF: predicated region fallthrough
CT: control target
= control target key end

     0   :  { %s998_s12 = smov 0   ;;  %s1324_s0 = inlined_call_operand.vmem [shape: f32[512,16], index: 0, kind: input, shape index: {}]   ;;  %s1325_s1 = inlined_call_operand.vmem [shape: f32[1,16], index: 1, kind: input, shape index: {}]   ;;  %s1326_s2 = inlined_call_operand.vmem [shape: f32[1,16], index: 2, kind: input, shape index: {}]   ;;  %s1327_s3 = inlined_call_operand.vmem [shape: bf16[512,16], index: 3, kind: output, shape index: {}]  }
   0x1 LB: > { %s725_s13 = sadd.s32 4294967295, %s976_s12   ;;  %p729_p0 = scmp.ge.s32.totalorder %s976_s12, 1  ;;  %s976_s12 = sphi %s998_s12, %s13_s12  }
   0x2   : > { %p138_p1 = scmp.lt.s32.totalorder %s976_s12, 3 }
   0x4   : > { %p139_p2 = pnand %p729_p0, %p138_p1 }
   0x5   : > { %s730_s14 = sshll.u32 (!%p139_p2), %s725_s13, 5  ;;  %v1012_v0 = vld [vmem:[%s1325_s1] ss:$0 sm:$0xff] (!%p139_p2)  ;;  %vm636_vm0 = vcmask (!%p139_p2), 125952  }
   0x6   : > { %142 = sbr.rel (%p139_p2) target bundleno = 109 (0x6d), region = 32  ;;  %p163_p3 = scmp.lt.s32.totalorder (!%p139_p2), %s730_s14, 63  ;;  %v1022_v1 = vld [vmem:[%s1326_s2] ss:$0 sm:$0xff] (!%p139_p2) }
   0xd   : > { %s1329_s14 = smov (!%p163_p3, %s730_s14), 63 }
   0xe   : > { %s731_s15 = sshll.u32 %s1329_s14, 3  ;;  %s733_s23 = sshll.u32 %s1329_s14, 2 }
   0xf   : > { %s1017_s20 = scalar_lea.vmem %s1324_s0, %s731_s15  ;;  %s1170_s26 = scalar_lea.vmem %s1327_s3, %s733_s23 }
  0x10   : > { %v174_v2 = vld [vmem:[%s1017_s20] sm:$0xff]  ;;  %v175_v3 = vld [vmem:[%s1017_s20 + $0x8] sm:$0xff]  ;;  %v176_v4 = vld [vmem:[%s1017_s20 + $0x10] sm:$0xff] }
  0x11   : > { %v213_v5 = vmul.f32 %v1012_v0, %v174_v2  ;;  %v214_v6 = vmul.f32 %v1012_v0, %v175_v3  ;;  %v215_v7 = vmul.f32 %v1012_v0, %v176_v4  ;;  %v177_v8 = vld [vmem:[%s1017_s20 + $0x18] sm:$0xff]  ;;  %v178_v9 = vld [vmem:[%s1017_s20 + $0x20] sm:$0xff]  ;;  %v179_v10 = vld [vmem:[%s1017_s20 + $0x28] sm:$0xff] }
  0x12   : > { %v216_v11 = vmul.f32 %v1012_v0, %v177_v8  ;;  %v217_v12 = vmul.f32 %v1012_v0, %v178_v9  ;;  %v218_v13 = vmul.f32 %v1012_v0, %v179_v10  ;;  %v180_v14 = vld [vmem:[%s1017_s20 + $0x30] sm:$0xff]  ;;  %v181_v15 = vld [vmem:[%s1017_s20 + $0x38] sm:$0xff]  ;;  %v182_v20 = vld [vmem:[%s1017_s20 + $0x40] sm:$0xff] }
  0x13   : > { %v1039_v16 = vadd.f32 %v1022_v1, %v213_v5  ;;  %v1042_v17 = vadd.f32 %v1022_v1, %v214_v6  ;;  %v1045_v18 = vadd.f32 %v1022_v1, %v215_v7  ;;  %v219_v19 = vmul.f32 %v1012_v0, %v180_v14  ;;  %v183_v25 = vld [vmem:[%s1017_s20 + $0x48] sm:$0xff]  ;;  %v184_v26 = vld [vmem:[%s1017_s20 + $0x50] sm:$0xff]  ;;  %v185_v27 = vld [vmem:[%s1017_s20 + $0x58] sm:$0xff] }
  0x14   : > { %v1050_v21 = vadd.f32 %v1022_v1, %v216_v11  ;;  %v1053_v22 = vadd.f32 %v1022_v1, %v217_v12  ;;  %v1056_v23 = vadd.f32 %v1022_v1, %v218_v13  ;;  %v220_v24 = vmul.f32 %v1012_v0, %v181_v15  ;;  %v186_v35 = vld [vmem:[%s1017_s20 + $0x60] sm:$0xff]  ;;  %v187_v50 = vld [vmem:[%s1017_s20 + $0x68] sm:$0xff]  ;;  %v188_v55 = vld [vmem:[%s1017_s20 + $0x70] sm:$0xff] }
  0x15   : > { %v736_v28 = vmul.f32 -1.442695, %v1039_v16  ;;  %v737_v29 = vmul.f32 -1.442695, %v1042_v17  ;;  %v738_v30 = vmul.f32 -1.442695, %v1045_v18  ;;  %v1066_v31 = vadd.f32 %v1022_v1, %v219_v19 }
  0x16   : > { %v739_v32 = vmul.f32 -1.442695, %v1050_v21  ;;  %v740_v33 = vmul.f32 -1.442695, %v1053_v22  ;;  %v1071_v34 = vadd.f32 %v1022_v1, %v220_v24  ;;  %v741_v36 = vmul.f32 -1.442695, %v1056_v23 }
  0x17   : > { %842 = vpow2.f32 %v736_v28  ;;  %v221_v37 = vmul.f32 %v1012_v0, %v182_v20  ;;  %v222_v38 = vmul.f32 %v1012_v0, %v183_v25  ;;  %v742_v39 = vmul.f32 -1.442695, %v1066_v31  ;;  %v189_v57 = vld [vmem:[%s1017_s20 + $0x78] sm:$0xff]  ;;  %v190_v58 = vld [vmem:[%s1017_s20 + $0x80] sm:$0xff]  ;;  %v191_v61 = vld [vmem:[%s1017_s20 + $0x88] sm:$0xff] }
  0x18   : > { %844 = vpow2.f32 %v737_v29  ;;  %v223_v40 = vmul.f32 %v1012_v0, %v184_v26  ;;  %v224_v41 = vmul.f32 %v1012_v0, %v185_v27  ;;  %v225_v44 = vmul.f32 %v1012_v0, %v186_v35  ;;  %v192_v3 = vld [vmem:[%s1017_s20 + $0x90] sm:$0xff]  ;;  %v193_v8 = vld [vmem:[%s1017_s20 + $0x98] sm:$0xff]  ;;  %v194_v19 = vld [vmem:[%s1017_s20 + $0xa0] sm:$0xff] }
  0x19   : > { %846 = vpow2.f32 %v738_v30  ;;  %v1081_v42 = vadd.f32 %v1022_v1, %v221_v37  ;;  %v1084_v43 = vadd.f32 %v1022_v1, %v222_v38  ;;  %v743_v45 = vmul.f32 -1.442695, %v1071_v34  ;;  %v196_v38 = vld [vmem:[%s1017_s20 + $0xb0] sm:$0xff] }
  0x1a   : > { %848 = vpow2.f32 %v739_v32  ;;  %v1089_v46 = vadd.f32 %v1022_v1, %v223_v40  ;;  %v1092_v47 = vadd.f32 %v1022_v1, %v224_v41  ;;  %v1096_v49 = vadd.f32 %v1022_v1, %v225_v44  ;;  %v195_v32 = vld [vmem:[%s1017_s20 + $0xa8] sm:$0xff] }
  0x1b   : > { %850 = vpow2.f32 %v740_v33  ;;  %v744_v48 = vmul.f32 -1.442695, %v1081_v42  ;;  %v745_v51 = vmul.f32 -1.442695, %v1084_v43  ;;  %v226_v54 = vmul.f32 %v1012_v0, %v187_v50 }
  0x1c   : > { %852 = vpow2.f32 %v741_v36  ;;  %v746_v52 = vmul.f32 -1.442695, %v1089_v46  ;;  %v747_v53 = vmul.f32 -1.442695, %v1092_v47  ;;  %v748_v56 = vmul.f32 -1.442695, %v1096_v49 }
  0x1d   : > { %854 = vpow2.f32 %v742_v39  ;;  %v227_v60 = vmul.f32 %v1012_v0, %v188_v55  ;;  %v1110_v2 = vadd.f32 %v1022_v1, %v226_v54  ;;  %v228_v6 = vmul.f32 %v1012_v0, %v189_v57 }
  0x1e   : > { %856 = vpow2.f32 %v743_v45  ;;  %v229_v7 = vmul.f32 %v1012_v0, %v190_v58  ;;  %v230_v11 = vmul.f32 %v1012_v0, %v191_v61  ;;  %v231_v15 = vmul.f32 %v1012_v0, %v192_v3 }
  0x1f   : > { %858 = vpow2.f32 %v744_v48  ;;  %v1118_v14 = vadd.f32 %v1022_v1, %v227_v60  ;;  %v1123_v25 = vmul.f32 -1.442695, %v1110_v2  ;;  %v232_v26 = vmul.f32 %v1012_v0, %v193_v8  ;;  %v197_v60 = vld [vmem:[%s1017_s20 + $0xb8] sm:$0xff] }
  0x20   : > { %860 = vpow2.f32 %v745_v51  ;;  %v1127_v29 = vadd.f32 %v1022_v1, %v228_v6  ;;  %v1130_v30 = vadd.f32 %v1022_v1, %v229_v7  ;;  %v1134_v36 = vadd.f32 %v1022_v1, %v230_v11 }
  0x21   : > { %v843_v59 = vpop.eup %842  ;;  %862 = vpow2.f32 %v746_v52  ;;  %v233_v37 = vmul.f32 %v1012_v0, %v194_v19  ;;  %v750_v41 = vmul.f32 -1.442695, %v1118_v14  ;;  %v1140_v44 = vadd.f32 %v1022_v1, %v231_v15 }
  0x22   : > { %v845_v62 = vpop.eup %844  ;;  %v380_v63 = vadd.f32 1.0, %v843_v59  ;;  %864 = vpow2.f32 %v747_v53  ;;  %v1143_v50 = vadd.f32 %v1022_v1, %v232_v26  ;;  %v234_v51 = vmul.f32 %v1012_v0, %v195_v32 }
  0x23   : > { %v847_v4 = vpop.eup %846  ;;  %v381_v5 = vadd.f32 1.0, %v845_v62  ;;  %866 = vpow2.f32 %v748_v56  ;;  %v751_v54 = vmul.f32 -1.442695, %v1127_v29  ;;  %v235_v55 = vmul.f32 %v1012_v0, %v196_v38 }
  0x24   : > { %v849_v9 = vpop.eup %848  ;;  %868 = vrcp.f32 %v380_v63  ;;  %v382_v10 = vadd.f32 1.0, %v847_v4  ;;  %v752_v58 = vmul.f32 -1.442695, %v1130_v30  ;;  %v1151_v59 = vadd.f32 %v1022_v1, %v233_v37  ;;  %v198_v4 = vld [vmem:[%s1017_s20 + $0xc0] sm:$0xff] }
  0x25   : > { %v851_v12 = vpop.eup %850  ;;  %870 = vrcp.f32 %v381_v5  ;;  %v383_v13 = vadd.f32 1.0, %v849_v9  ;;  %v753_v63 = vmul.f32 -1.442695, %v1134_v36  ;;  %v754_v3 = vmul.f32 -1.442695, %v1140_v44  ;;  %v199_v9 = vld [vmem:[%s1017_s20 + $0xc8] sm:$0xff] }
  0x26   : > { %v853_v20 = vpop.eup %852  ;;  %872 = vrcp.f32 %v382_v10  ;;  %v384_v24 = vadd.f32 1.0, %v851_v12  ;;  %v755_v7 = vmul.f32 -1.442695, %v1143_v50  ;;  %v1159_v8 = vadd.f32 %v1022_v1, %v234_v51 }
  0x27   : > { %v855_v27 = vpop.eup %854  ;;  %874 = vrcp.f32 %v383_v13  ;;  %v385_v28 = vadd.f32 1.0, %v853_v20  ;;  %v1164_v12 = vadd.f32 %v1022_v1, %v235_v55  ;;  %v236_v13 = vmul.f32 %v1012_v0, %v197_v60 }
  0x28   : > { %v857_v33 = vpop.eup %856  ;;  %876 = vrcp.f32 %v384_v24  ;;  %v386_v35 = vadd.f32 1.0, %v855_v27  ;;  %v756_v20 = vmul.f32 -1.442695, %v1151_v59 }
  0x29   : > { %v859_v39 = vpop.eup %858  ;;  %878 = vrcp.f32 %v385_v28  ;;  %v387_v40 = vadd.f32 1.0, %v857_v33  ;;  %v238_v28 = vmul.f32 %v1012_v0, %v199_v9 }
  0x2a   : > { %v861_v45 = vpop.eup %860  ;;  %880 = vrcp.f32 %v386_v35  ;;  %v388_v48 = vadd.f32 1.0, %v859_v39 }
  0x2b   : > { %v863_v52 = vpop.eup %862  ;;  %882 = vrcp.f32 %v387_v40  ;;  %v389_v53 = vadd.f32 1.0, %v861_v45  ;;  %v1196_v51 = vadd.f32 %v1022_v1, %v238_v28 }
  0x2c   : > { %v865_v56 = vpop.eup %864  ;;  %884 = vrcp.f32 %v388_v48  ;;  %v390_v57 = vadd.f32 1.0, %v863_v52 }
  0x2d   : > { %v867_v61 = vpop.eup %866  ;;  %886 = vrcp.f32 %v389_v53  ;;  %v391_v62 = vadd.f32 1.0, %v865_v56 }
  0x2e   : > { %v869_v5 = vpop.eup %868  ;;  %888 = vrcp.f32 %v390_v57  ;;  %v392_v6 = vadd.f32 1.0, %v867_v61 }
  0x2f   : > { %v871_v10 = vpop.eup %870  ;;  %v476_v11 = vmul.f32 %v869_v5, %v1039_v16  ;;  %890 = vrcp.f32 %v391_v62  ;;  %v237_v16 = vmul.f32 %v1012_v0, %v198_v4 }
  0x30   : > { %v873_v15 = vpop.eup %872  ;;  %v477_v19 = vmul.f32 %v871_v10, %v1042_v17  ;;  %892 = vrcp.f32 %v392_v6  ;;  %v757_v17 = vmul.f32 -1.442695, %v1159_v8 }
  0x31   : > { %v875_v24 = vpop.eup %874  ;;  %v802_v26 = vpack.c.bf16 %v476_v11, %v476_v11  ;;  %v478_v27 = vmul.f32 %v873_v15, %v1045_v18  ;;  %894 = vpow2.f32 %v1123_v25  ;;  %v1184_v18 = vadd.f32 %v1022_v1, %v236_v13  ;;  %v200_v13 = vld [vmem:[%s1017_s20 + $0xd0] sm:$0xff] }
  0x32   : > { %v877_v32 = vpop.eup %876  ;;  %v803_v33 = vpack.c.bf16 %v477_v19, %v477_v19  ;;  %v479_v35 = vmul.f32 %v875_v24, %v1050_v21  ;;  %896 = vpow2.f32 %v750_v41  ;;  %v1190_v41 = vadd.f32 %v1022_v1, %v237_v16  ;;  %v202_v24 = vld [vmem:[%s1017_s20 + $0xe0] sm:$0xff] }
  0x33   : > { %v879_v37 = vpop.eup %878  ;;  %637 = vst.msk [vmem:[%s1170_s26] sm:$0xf] %vm636_vm0, %v802_v26  ;;  %v804_v38 = vpack.c.bf16 %v478_v27, %v478_v27  ;;  %v480_v39 = vmul.f32 %v877_v32, %v1053_v22  ;;  %898 = vpow2.f32 %v751_v54  ;;  %v758_v54 = vmul.f32 -1.442695, %v1164_v12  ;;  %v203_v32 = vld [vmem:[%s1017_s20 + $0xe8] sm:$0xff] }
  0x34   : > { %v881_v25 = vpop.eup %880  ;;  %638 = vst.msk [vmem:[%s1170_s26 + $0x4] sm:$0xf] %vm636_vm0, %v803_v33  ;;  %v805_v40 = vpack.c.bf16 %v479_v35, %v479_v35  ;;  %v481_v21 = vmul.f32 %v879_v37, %v1056_v23  ;;  %900 = vpow2.f32 %v752_v58  ;;  %v759_v57 = vmul.f32 -1.442695, %v1184_v18  ;;  %v204_v37 = vld [vmem:[%s1017_s20 + $0xf0] sm:$0xff] }
  0x35   : > { %v883_v45 = vpop.eup %882  ;;  %639 = vst.msk [vmem:[%s1170_s26 + $0x8] sm:$0xf] %vm636_vm0, %v804_v38  ;;  %v806_v22 = vpack.c.bf16 %v480_v39, %v480_v39  ;;  %v482_v48 = vmul.f32 %v881_v25, %v1066_v31  ;;  %902 = vpow2.f32 %v753_v63  ;;  %v760_v61 = vmul.f32 -1.442695, %v1190_v41 }
  0x36   : > { %v885_v52 = vpop.eup %884  ;;  %640 = vst.msk [vmem:[%s1170_s26 + $0xc] sm:$0xf] %vm636_vm0, %v805_v40  ;;  %v807_v23 = vpack.c.bf16 %v481_v21, %v481_v21  ;;  %v483_v53 = vmul.f32 %v883_v45, %v1071_v34  ;;  %904 = vpow2.f32 %v754_v3  ;;  %v761_v3 = vmul.f32 -1.442695, %v1196_v51  ;;  %v205_v40 = vld [vmem:[%s1017_s20 + $0xf8] sm:$0xff] }
  0x37   : > { %v887_v55 = vpop.eup %886  ;;  %641 = vst.msk [vmem:[%s1170_s26 + $0x10] sm:$0xf] %vm636_vm0, %v806_v22  ;;  %v808_v56 = vpack.c.bf16 %v482_v48, %v482_v48  ;;  %v484_v31 = vmul.f32 %v885_v52, %v1081_v42  ;;  %906 = vpow2.f32 %v755_v7  ;;  %v239_v28 = vmul.f32 %v1012_v0, %v200_v13 }
  0x38   : > { %v889_v58 = vpop.eup %888  ;;  %642 = vst.msk [vmem:[%s1170_s26 + $0x14] sm:$0xf] %vm636_vm0, %v807_v23  ;;  %v809_v60 = vpack.c.bf16 %v483_v53, %v483_v53  ;;  %v485_v34 = vmul.f32 %v887_v55, %v1084_v43  ;;  %908 = vpow2.f32 %v756_v20  ;;  %v201_v20 = vld [vmem:[%s1017_s20 + $0xd8] sm:$0xff]  ;;  %v241_v25 = vmul.f32 %v1012_v0, %v202_v24 }
  0x39   : > { %v891_v62 = vpop.eup %890  ;;  %643 = vst.msk [vmem:[%s1170_s26 + $0x18] sm:$0xf] %vm636_vm0, %v808_v56  ;;  %v810_v63 = vpack.c.bf16 %v484_v31, %v484_v31  ;;  %v486_v42 = vmul.f32 %v889_v58, %v1089_v46  ;;  %910 = vpow2.f32 %v757_v17  ;;  %v240_v17 = vmul.f32 %v1012_v0, %v201_v20 }
  0x3a   : > { %v893_v4 = vpop.eup %892  ;;  %644 = vst.msk [vmem:[%s1170_s26 + $0x1c] sm:$0xf] %vm636_vm0, %v809_v60  ;;  %v811_v5 = vpack.c.bf16 %v485_v34, %v485_v34  ;;  %v487_v43 = vmul.f32 %v891_v62, %v1092_v47  ;;  %912 = vpow2.f32 %v758_v54  ;;  %v242_v22 = vmul.f32 %v1012_v0, %v203_v32 }
  0x3b   : > { %v895_v6 = vpop.eup %894  ;;  %645 = vst.msk [vmem:[%s1170_s26 + $0x20] sm:$0xf] %vm636_vm0, %v810_v63  ;;  %v812_v7 = vpack.c.bf16 %v486_v42, %v486_v42  ;;  %v488_v46 = vmul.f32 %v893_v4, %v1096_v49  ;;  %914 = vpow2.f32 %v759_v57  ;;  %v1239_v23 = vadd.f32 %v1022_v1, %v239_v28 }
  0x3c   : > { %v897_v9 = vpop.eup %896  ;;  %646 = vst.msk [vmem:[%s1170_s26 + $0x24] sm:$0xf] %vm636_vm0, %v811_v5  ;;  %v813_v10 = vpack.c.bf16 %v487_v43, %v487_v43  ;;  %v393_v11 = vadd.f32 1.0, %v895_v6  ;;  %916 = vpow2.f32 %v760_v61  ;;  %v243_v53 = vmul.f32 %v1012_v0, %v204_v37 }
  0x3d   : > { %v899_v47 = vpop.eup %898  ;;  %647 = vst.msk [vmem:[%s1170_s26 + $0x28] sm:$0xf] %vm636_vm0, %v812_v7  ;;  %v814_v15 = vpack.c.bf16 %v488_v46, %v488_v46  ;;  %v394_v19 = vadd.f32 1.0, %v897_v9  ;;  %918 = vpow2.f32 %v761_v3  ;;  %v1243_v56 = vadd.f32 %v1022_v1, %v240_v17 }
  0x3e   : > { %v901_v49 = vpop.eup %900  ;;  %648 = vst.msk [vmem:[%s1170_s26 + $0x2c] sm:$0xf] %vm636_vm0, %v813_v10  ;;  %920 = vrcp.f32 %v393_v11  ;;  %v395_v16 = vadd.f32 1.0, %v899_v47  ;;  %v244_v31 = vmul.f32 %v1012_v0, %v205_v40  ;;  %v1247_v60 = vadd.f32 %v1022_v1, %v241_v25 }
  0x3f   : > { %v903_v26 = vpop.eup %902  ;;  %649 = vst.msk [vmem:[%s1170_s26 + $0x30] sm:$0xf] %vm636_vm0, %v814_v15  ;;  %922 = vrcp.f32 %v394_v19  ;;  %v396_v27 = vadd.f32 1.0, %v901_v49  ;;  %v1250_v62 = vadd.f32 %v1022_v1, %v242_v22  ;;  %v762_v3 = vmul.f32 -1.442695, %v1239_v23 }
  0x40   : > { %v905_v33 = vpop.eup %904  ;;  %924 = vrcp.f32 %v395_v16  ;;  %v397_v35 = vadd.f32 1.0, %v903_v26  ;;  %v1254_v4 = vadd.f32 %v1022_v1, %v243_v53  ;;  %v763_v43 = vmul.f32 -1.442695, %v1243_v56 }
  0x41   : > { %v907_v38 = vpop.eup %906  ;;  %926 = vrcp.f32 %v396_v27  ;;  %v398_v39 = vadd.f32 1.0, %v905_v33  ;;  %v1258_v6 = vadd.f32 %v1022_v1, %v244_v31  ;;  %v764_v9 = vmul.f32 -1.442695, %v1247_v60 }
  0x42   : > { %v909_v21 = vpop.eup %908  ;;  %928 = vrcp.f32 %v397_v35  ;;  %v399_v45 = vadd.f32 1.0, %v907_v38  ;;  %v765_v13 = vmul.f32 -1.442695, %v1250_v62  ;;  %v766_v1 = vmul.f32 -1.442695, %v1254_v4 }
  0x43   : > { %v911_v48 = vpop.eup %910  ;;  %930 = vrcp.f32 %v398_v39  ;;  %v400_v52 = vadd.f32 1.0, %v909_v21  ;;  %v767_v16 = vmul.f32 -1.442695, %v1258_v6 }
  0x44   : > { %v913_v54 = vpop.eup %912  ;;  %932 = vrcp.f32 %v399_v45  ;;  %v401_v55 = vadd.f32 1.0, %v911_v48 }
  0x45   : > { %v915_v57 = vpop.eup %914  ;;  %934 = vrcp.f32 %v400_v52  ;;  %v402_v58 = vadd.f32 1.0, %v913_v54 }
  0x46   : > { %v917_v34 = vpop.eup %916  ;;  %936 = vrcp.f32 %v401_v55  ;;  %v403_v61 = vadd.f32 1.0, %v915_v57 }
  0x47   : > { %v919_v63 = vpop.eup %918  ;;  %938 = vrcp.f32 %v402_v58  ;;  %v404_v42 = vadd.f32 1.0, %v917_v34 }
  0x48   : > { %v921_v0 = vpop.eup %920  ;;  %940 = vrcp.f32 %v403_v61  ;;  %v405_v5 = vadd.f32 1.0, %v919_v63 }
  0x49   : > { %v923_v7 = vpop.eup %922  ;;  %v489_v46 = vmul.f32 %v921_v0, %v1110_v2  ;;  %942 = vrcp.f32 %v404_v42 }
  0x4a   : > { %v925_v10 = vpop.eup %924  ;;  %v490_v11 = vmul.f32 %v923_v7, %v1118_v14  ;;  %944 = vrcp.f32 %v405_v5 }
  0x4b   : > { %v927_v47 = vpop.eup %926  ;;  %v815_v15 = vpack.c.bf16 %v489_v46, %v489_v46  ;;  %v491_v19 = vmul.f32 %v925_v10, %v1127_v29  ;;  %946 = vpow2.f32 %v762_v3 }
  0x4c   : > { %v929_v20 = vpop.eup %928  ;;  %v816_v2 = vpack.c.bf16 %v490_v11, %v490_v11  ;;  %v492_v49 = vmul.f32 %v927_v47, %v1130_v30  ;;  %948 = vpow2.f32 %v763_v43 }
  0x4d   : > { %v931_v14 = vpop.eup %930  ;;  %650 = vst.msk [vmem:[%s1170_s26 + $0x34] sm:$0xf] %vm636_vm0, %v815_v15  ;;  %v817_v24 = vpack.c.bf16 %v491_v19, %v491_v19  ;;  %v493_v26 = vmul.f32 %v929_v20, %v1134_v36  ;;  %950 = vpow2.f32 %v764_v9 }
  0x4e   : > { %v933_v29 = vpop.eup %932  ;;  %651 = vst.msk [vmem:[%s1170_s26 + $0x38] sm:$0xf] %vm636_vm0, %v816_v2  ;;  %v818_v27 = vpack.c.bf16 %v492_v49, %v492_v49  ;;  %v494_v28 = vmul.f32 %v931_v14, %v1140_v44  ;;  %952 = vpow2.f32 %v765_v13 }
  0x4f   : > { %v935_v30 = vpop.eup %934  ;;  %652 = vst.msk [vmem:[%s1170_s26 + $0x3c] sm:$0xf] %vm636_vm0, %v817_v24  ;;  %v819_v32 = vpack.c.bf16 %v493_v26, %v493_v26  ;;  %v495_v33 = vmul.f32 %v933_v29, %v1143_v50  ;;  %954 = vpow2.f32 %v766_v1 }
  0x50   : > { %v937_v35 = vpop.eup %936  ;;  %653 = vst.msk [vmem:[%s1170_s26 + $0x40] sm:$0xf] %vm636_vm0, %v818_v27  ;;  %v820_v36 = vpack.c.bf16 %v494_v28, %v494_v28  ;;  %v496_v17 = vmul.f32 %v935_v30, %v1151_v59  ;;  %956 = vpow2.f32 %v767_v16 }
  0x51   : > { %v939_v37 = vpop.eup %938  ;;  %654 = vst.msk [vmem:[%s1170_s26 + $0x44] sm:$0xf] %vm636_vm0, %v819_v32  ;;  %v821_v44 = vpack.c.bf16 %v495_v33, %v495_v33  ;;  %v497_v38 = vmul.f32 %v937_v35, %v1159_v8 }
  0x52   : > { %v941_v39 = vpop.eup %940  ;;  %655 = vst.msk [vmem:[%s1170_s26 + $0x48] sm:$0xf] %vm636_vm0, %v820_v36  ;;  %v822_v50 = vpack.c.bf16 %v496_v17, %v496_v17  ;;  %v498_v25 = vmul.f32 %v939_v37, %v1164_v12 }
  0x53   : > { %v943_v40 = vpop.eup %942  ;;  %656 = vst.msk [vmem:[%s1170_s26 + $0x4c] sm:$0xf] %vm636_vm0, %v821_v44  ;;  %v823_v59 = vpack.c.bf16 %v497_v38, %v497_v38  ;;  %v499_v21 = vmul.f32 %v941_v39, %v1184_v18 }
  0x54   : > { %v945_v45 = vpop.eup %944  ;;  %657 = vst.msk [vmem:[%s1170_s26 + $0x50] sm:$0xf] %vm636_vm0, %v822_v50  ;;  %v824_v22 = vpack.c.bf16 %v498_v25, %v498_v25  ;;  %v500_v8 = vmul.f32 %v943_v40, %v1190_v41 }
  0x55   : > { %v947_v48 = vpop.eup %946  ;;  %658 = vst.msk [vmem:[%s1170_s26 + $0x54] sm:$0xf] %vm636_vm0, %v823_v59  ;;  %v825_v52 = vpack.c.bf16 %v499_v21, %v499_v21  ;;  %v501_v12 = vmul.f32 %v945_v45, %v1196_v51 }
  0x56   : > { %v949_v53 = vpop.eup %948  ;;  %659 = vst.msk [vmem:[%s1170_s26 + $0x58] sm:$0xf] %vm636_vm0, %v824_v22  ;;  %v826_v54 = vpack.c.bf16 %v500_v8, %v500_v8  ;;  %v406_v55 = vadd.f32 1.0, %v947_v48 }
  0x57   : > { %v951_v18 = vpop.eup %950  ;;  %660 = vst.msk [vmem:[%s1170_s26 + $0x5c] sm:$0xf] %vm636_vm0, %v825_v52  ;;  %v827_v31 = vpack.c.bf16 %v501_v12, %v501_v12  ;;  %v407_v57 = vadd.f32 1.0, %v949_v53 }
  0x58   : > { %v953_v58 = vpop.eup %952  ;;  %661 = vst.msk [vmem:[%s1170_s26 + $0x60] sm:$0xf] %vm636_vm0, %v826_v54  ;;  %958 = vrcp.f32 %v406_v55  ;;  %v408_v41 = vadd.f32 1.0, %v951_v18 }
  0x59   : > { %v955_v34 = vpop.eup %954  ;;  %662 = vst.msk [vmem:[%s1170_s26 + $0x64] sm:$0xf] %vm636_vm0, %v827_v31  ;;  %960 = vrcp.f32 %v407_v57  ;;  %v409_v51 = vadd.f32 1.0, %v953_v58 }
  0x5a   : > { %v957_v61 = vpop.eup %956  ;;  %962 = vrcp.f32 %v408_v41  ;;  %v410_v63 = vadd.f32 1.0, %v955_v34 }
  0x5b   : > { %964 = vrcp.f32 %v409_v51  ;;  %v411_v42 = vadd.f32 1.0, %v957_v61 }
  0x5c   : > { %966 = vrcp.f32 %v410_v63 }
  0x5d   : > { %968 = vrcp.f32 %v411_v42 }
  0x62   : > { %v959_v3 = vpop.eup %958 }
  0x63   : > { %v961_v0 = vpop.eup %960  ;;  %v502_v5 = vmul.f32 %v959_v3, %v1239_v23 }
  0x64   : > { %v963_v43 = vpop.eup %962  ;;  %v503_v7 = vmul.f32 %v961_v0, %v1243_v56 }
  0x65   : > { %v965_v46 = vpop.eup %964  ;;  %v828_v9 = vpack.c.bf16 %v502_v5, %v502_v5  ;;  %v504_v10 = vmul.f32 %v963_v43, %v1247_v60 }
  0x66   : > { %v967_v11 = vpop.eup %966  ;;  %v829_v13 = vpack.c.bf16 %v503_v7, %v503_v7  ;;  %v505_v47 = vmul.f32 %v965_v46, %v1250_v62 }
  0x67   : > { %v969_v15 = vpop.eup %968  ;;  %663 = vst.msk [vmem:[%s1170_s26 + $0x68] sm:$0xf] %vm636_vm0, %v828_v9  ;;  %v830_v19 = vpack.c.bf16 %v504_v10, %v504_v10  ;;  %v506_v23 = vmul.f32 %v967_v11, %v1254_v4 }
  0x68   : > { %664 = vst.msk [vmem:[%s1170_s26 + $0x6c] sm:$0xf] %vm636_vm0, %v829_v13  ;;  %v831_v56 = vpack.c.bf16 %v505_v47, %v505_v47  ;;  %v507_v1 = vmul.f32 %v969_v15, %v1258_v6 }
  0x69   : > { %665 = vst.msk [vmem:[%s1170_s26 + $0x70] sm:$0xf] %vm636_vm0, %v830_v19  ;;  %v832_v20 = vpack.c.bf16 %v506_v23, %v506_v23 }
  0x6a   : > { %666 = vst.msk [vmem:[%s1170_s26 + $0x74] sm:$0xf] %vm636_vm0, %v831_v56  ;;  %v833_v60 = vpack.c.bf16 %v507_v1, %v507_v1 }
  0x6b   : > { %667 = vst.msk [vmem:[%s1170_s26 + $0x78] sm:$0xf] %vm636_vm0, %v832_v20 }
  0x6c   : > { %668 = vst.msk [vmem:[%s1170_s26 + $0x7c] sm:$0xf] %vm636_vm0, %v833_v60 }
  0x6d PF: > { %s13_s12 = sadd.s32 1, %s976_s12  }
  0x6e   : > { %p10_p4 = scmp.ge.s32.totalorder %s13_s12, 4  }
  0x70   :  { %12 = sbr.rel (!%p10_p4) target bundleno = 1 (0x1), region = 62 }

// kernel: block_forward.22
= control target key start
LH: loop header
LB: loop body
LE: loop exit
PB: predicated region body
PF: predicated region fallthrough
CT: control target
= control target key end

     0   :  { %s1113_s12 = smov 0   ;;  %s1115_s13 = smov 0   ;;  %s1431_s0 = inlined_call_operand.vmem [shape: bf16[512,64], index: 0, kind: input, shape index: {}]   ;;  %s1432_s1 = inlined_call_operand.vmem [shape: bf16[64,64], index: 1, kind: input, shape index: {}]   ;;  %s1433_s2 = inlined_call_operand.vmem [shape: f32[512,64], index: 2, kind: output, shape index: {0}]   ;;  %s1434_s3 = inlined_call_operand.vmem [shape: f32[2,8,64], index: 3, kind: output, shape index: {1}]  }
   0x1   :  { %s1117_s14 = smov 0  }
   0x2 LB: > { %s26_s15 = sadd.s32 1, %s1087_s13  ;;  %p913_p0 = scmp.ge.s32.totalorder %s1091_s14, 1  ;;  %s1091_s14 = sphi %s1117_s14, %s14_s14   ;;  %s1087_s13 = sphi %s1115_s13, %s1436_s13   ;;  %s1083_s12 = sphi %s1113_s12, %s1435_s12  }
   0x3   : > { %p28_p1 = scmp.ge.s32.totalorder %s26_s15, 2  ;;  %p169_p2 = scmp.lt.s32.totalorder %s1091_s14, 3 }
   0x5   : > { %s1438_s15 = smov (%p28_p1, %s26_s15), 0  ;;  %p170_p3 = pnand %p913_p0, %p169_p2 }
   0x6   : > { %v1049_v0 = vld [vmem:[%s1432_s1] sm:$0xff] (!%p170_p3)   ;;  %s914_s18 = sshll.u32 (!%p170_p3), %s1083_s12, 5  ;;  %v1050_v1 = vld [vmem:[%s1432_s1 + $0x8] sm:$0xff] (!%p170_p3)   ;;  %v1051_v2 = vld [vmem:[%s1432_s1 + $0x10] sm:$0xff] (!%p170_p3)   ;;  %vm375_vm0 = vcmask (!%p170_p3), 523264   ;;  %p226_p5 = scmp.lt.s32.totalorder (!%p170_p3), %s1083_s12, 1 }
   0x7   : > { %173 = sbr.rel (%p170_p3) target bundleno = 318 (0x13e), region = 28  ;;  %p206_p4 = scmp.lt.s32.totalorder (!%p170_p3), %s914_s18, 63  ;;  %977 = vmatprep.subr.bf16.mxu0 (!%p170_p3), %v1049_v0  ;;  %1017 = vmatprep.subr.bf16.mxu1 (!%p170_p3), %v1049_v0  ;;  %v1052_v4 = vld [vmem:[%s1432_s1 + $0x18] sm:$0xff] (!%p170_p3)  }
   0x8   : > { %978 = vmatpush3.bf16.msra.mxu0 (!%p170_p3), %v1049_v0  ;;  %1021 = vmatpush3.bf16.msra.mxu1 (!%p170_p3), %v1049_v0 }
   0x9   : > { %979 = vmatprep.subr.bf16.mxu0 (!%p170_p3), %v1050_v1  ;;  %1018 = vmatprep.subr.bf16.mxu1 (!%p170_p3), %v1050_v1 }
   0xc   : > { %980 = vmatpush3.bf16.msra.mxu0 (!%p170_p3), %v1050_v1  ;;  %1022 = vmatpush3.bf16.msra.mxu1 (!%p170_p3), %v1050_v1 }
   0xd   : > { %981 = vmatprep.subr.bf16.mxu0 (!%p170_p3), %v1051_v2  ;;  %1019 = vmatprep.subr.bf16.mxu1 (!%p170_p3), %v1051_v2 }
   0xe   : > { %s1440_s18 = smov (!%p206_p4, %s914_s18), 63  ;;  %s1442_s12 = smov (!%p226_p5, %s1083_s12), 1 }
   0xf   : > { %s915_s23 = sshll.u32 %s1440_s18, 2  ;;  %s917_s29 = sshll.u32 %s1440_s18, 3 }
  0x10   : > { %s1149_s26 = scalar_lea.vmem %s1431_s0, %s915_s23  ;;  %982 = vmatpush3.bf16.msra.mxu0 %v1051_v2  ;;  %1023 = vmatpush3.bf16.msra.mxu1 %v1051_v2  ;;  %s1190_s5 = scalar_lea.vmem %s1433_s2, %s917_s29 }
  0x11   : > { %v1053_v3 = vld [vmem:[%s1149_s26] sm:$0xff]   ;;  %983 = vmatprep.subr.bf16.mxu0 %v1052_v4  ;;  %1020 = vmatprep.subr.bf16.mxu1 %v1052_v4  ;;  %v1054_v5 = vld [vmem:[%s1149_s26 + $0x8] sm:$0xff]   ;;  %v1055_v6 = vld [vmem:[%s1149_s26 + $0x10] sm:$0xff]   ;;  %s918_s6 = sshll.u32 %s1442_s12, 3 }
  0x12   : > { %985 = vmatprep.mubr.msk.bf16.mxu0 %vm375_vm0, %v1053_v3  ;;  %v1061_v7 = vld [vmem:[%s1149_s26 + $0x40] sm:$0xff]   ;;  %v1062_v8 = vld [vmem:[%s1149_s26 + $0x48] sm:$0xff]   ;;  %v1063_v9 = vld [vmem:[%s1149_s26 + $0x50] sm:$0xff]   ;;  %s229_s9 = scalar_lea.vmem %s1434_s3, %s918_s6 }
  0x13   : > { %1001 = vmatprep.mubr.msk.bf16.mxu1 %vm375_vm0, %v1061_v7  ;;  %v1056_v10 = vld [vmem:[%s1149_s26 + $0x18] sm:$0xff]   ;;  %v1057_v12 = vld [vmem:[%s1149_s26 + $0x20] sm:$0xff]   ;;  %v1058_v14 = vld [vmem:[%s1149_s26 + $0x28] sm:$0xff]  }
  0x14   : > { %984 = vmatpush3.bf16.msra.mxu0 %v1052_v4  ;;  %1024 = vmatpush3.bf16.msra.mxu1 %v1052_v4  ;;  %v1064_v11 = vld [vmem:[%s1149_s26 + $0x58] sm:$0xff]   ;;  %v1065_v13 = vld [vmem:[%s1149_s26 + $0x60] sm:$0xff]   ;;  %v1066_v15 = vld [vmem:[%s1149_s26 + $0x68] sm:$0xff]  }
  0x15   : > { %v1059_v16 = vld [vmem:[%s1149_s26 + $0x30] sm:$0xff]   ;;  %v1060_v18 = vld [vmem:[%s1149_s26 + $0x38] sm:$0xff]  }
  0x16   : > { %v1067_v17 = vld [vmem:[%s1149_s26 + $0x70] sm:$0xff]   ;;  %v1068_v19 = vld [vmem:[%s1149_s26 + $0x78] sm:$0xff]  }
  0x17   : > { %986 = vmatmul.mubr.msk.bf16.vlgmr.msra.gmra.mrb[0].mxu0 %vm375_vm0, %v1054_v5  ;;  %1002 = vmatmul.mubr.msk.bf16.vlgmr.msra.gmra.mrb[0].mxu1 %vm375_vm0, %v1062_v8 }
  0x18   : > { %989 = vmatprep.mubr.msk.bf16.mxu0 %vm375_vm0, %v1055_v6  ;;  %1005 = vmatprep.mubr.msk.bf16.mxu1 %vm375_vm0, %v1063_v9 }
  0x1f   : > { %990 = vmatmul.mubr.msk.bf16.gmra.mrb[4].mxu0 %vm375_vm0, %v1056_v10  ;;  %1006 = vmatmul.mubr.msk.bf16.gmra.mrb[4].mxu1 %vm375_vm0, %v1064_v11 }
  0x20   : > { %993 = vmatprep.mubr.msk.bf16.mxu0 %vm375_vm0, %v1057_v12  ;;  %1009 = vmatprep.mubr.msk.bf16.mxu1 %vm375_vm0, %v1065_v13 }
  0x27   : > { %994 = vmatmul.mubr.msk.bf16.gmra.mrb[8].mxu0 %vm375_vm0, %v1058_v14  ;;  %1010 = vmatmul.mubr.msk.bf16.gmra.mrb[8].mxu1 %vm375_vm0, %v1066_v15 }
  0x28   : > { %997 = vmatprep.mubr.msk.bf16.mxu0 %vm375_vm0, %v1059_v16  ;;  %1013 = vmatprep.mubr.msk.bf16.mxu1 %vm375_vm0, %v1067_v17 }
  0x2f   : > { %998 = vmatmul.mubr.msk.bf16.gmra.mrb[12].mxu0 %vm375_vm0, %v1060_v18  ;;  %1014 = vmatmul.mubr.msk.bf16.gmra.mrb[12].mxu1 %vm375_vm0, %v1068_v19 }
  0xea   : > { %v987_v20 = vpop.f32.mrb[0].mxu0  ;;  %v1192_v21 = vpop.f32.mrb[0].mxu1 }
  0xeb   : > { %587 = vst.msk [vmem:[%s1190_s5 + $0x10] sm:$0xff] %vm375_vm0, %v987_v20  ;;  %v458_v22 = vpop.f32.mrb[1].mxu0  ;;  %603 = vst.msk [vmem:[%s1190_s5 + $0x90] sm:$0xff] %vm375_vm0, %v1192_v21  ;;  %v1199_v23 = vpop.f32.mrb[1].mxu1  ;;  %v688_v29 = vmul.f32 %v987_v20, %v987_v20  ;;  %v620_v34 = vsel %vm375_vm0, %v987_v20, 0.0 }
  0xec   : > { %585 = vst.msk [vmem:[%s1190_s5] sm:$0xff] %vm375_vm0, %v458_v22  ;;  %v686_v24 = vmul.f32 %v458_v22, %v458_v22  ;;  %v988_v25 = vpop.f32.mrb[2].mxu0  ;;  %601 = vst.msk [vmem:[%s1190_s5 + $0x80] sm:$0xff] %vm375_vm0, %v1199_v23  ;;  %v1206_v26 = vpop.f32.mrb[2].mxu1  ;;  %v617_v30 = vsel %vm375_vm0, %v458_v22, 0.0 }
  0xed   : > { %588 = vst.msk [vmem:[%s1190_s5 + $0x18] sm:$0xff] %vm375_vm0, %v988_v25  ;;  %v461_v27 = vpop.f32.mrb[3].mxu0  ;;  %604 = vst.msk [vmem:[%s1190_s5 + $0x98] sm:$0xff] %vm375_vm0, %v1206_v26  ;;  %v1213_v28 = vpop.f32.mrb[3].mxu1  ;;  %v689_v36 = vmul.f32 %v988_v25, %v988_v25  ;;  %v721_v40 = vsel %vm375_vm0, %v688_v29, 0.0  ;;  %v622_v41 = vsel %vm375_vm0, %v988_v25, 0.0 }
  0xee   : > { %586 = vst.msk [vmem:[%s1190_s5 + $0x8] sm:$0xff] %vm375_vm0, %v461_v27  ;;  %v618_v31 = vsel %vm375_vm0, %v461_v27, 0.0  ;;  %v687_v32 = vmul.f32 %v461_v27, %v461_v27  ;;  %602 = vst.msk [vmem:[%s1190_s5 + $0x88] sm:$0xff] %vm375_vm0, %v1213_v28  ;;  %v718_v35 = vsel %vm375_vm0, %v686_v24, 0.0 }
  0xef   : > { %v619_v33 = vadd.f32 %v618_v31, %v617_v30  ;;  %v723_v48 = vsel %vm375_vm0, %v689_v36, 0.0 }
  0xf0   : > { %v719_v37 = vsel %vm375_vm0, %v687_v32, 0.0 }
  0xf1   : > { %v621_v38 = vadd.f32 %v620_v34, %v619_v33  ;;  %v720_v39 = vadd.f32 %v719_v37, %v718_v35 }
  0xf2   : > { %v991_v42 = vpop.f32.mrb[4].mxu0  ;;  %v1227_v43 = vpop.f32.mrb[4].mxu1 }
  0xf3   : > { %v722_v44 = vadd.f32 %v721_v40, %v720_v39  ;;  %591 = vst.msk [vmem:[%s1190_s5 + $0x30] sm:$0xff] %vm375_vm0, %v991_v42  ;;  %v474_v45 = vpop.f32.mrb[5].mxu0  ;;  %v623_v46 = vadd.f32 %v622_v41, %v621_v38  ;;  %607 = vst.msk [vmem:[%s1190_s5 + $0xb0] sm:$0xff] %vm375_vm0, %v1227_v43  ;;  %v1234_v47 = vpop.f32.mrb[5].mxu1  ;;  %v692_v57 = vmul.f32 %v991_v42, %v991_v42  ;;  %v628_v63 = vsel %vm375_vm0, %v991_v42, 0.0 }
  0xf4   : > { %589 = vst.msk [vmem:[%s1190_s5 + $0x20] sm:$0xff] %vm375_vm0, %v474_v45  ;;  %v624_v49 = vsel %vm375_vm0, %v474_v45, 0.0  ;;  %v690_v50 = vmul.f32 %v474_v45, %v474_v45  ;;  %v992_v51 = vpop.f32.mrb[6].mxu0  ;;  %605 = vst.msk [vmem:[%s1190_s5 + $0xa0] sm:$0xff] %vm375_vm0, %v1234_v47  ;;  %v1243_v52 = vpop.f32.mrb[6].mxu1 }
  0xf5   : > { %v625_v53 = vadd.f32 %v624_v49, %v623_v46  ;;  %v724_v54 = vadd.f32 %v723_v48, %v722_v44  ;;  %592 = vst.msk [vmem:[%s1190_s5 + $0x38] sm:$0xff] %vm375_vm0, %v992_v51  ;;  %v477_v55 = vpop.f32.mrb[7].mxu0  ;;  %608 = vst.msk [vmem:[%s1190_s5 + $0xb8] sm:$0xff] %vm375_vm0, %v1243_v52  ;;  %v1250_v56 = vpop.f32.mrb[7].mxu1  ;;  %v693_v0 = vmul.f32 %v992_v51, %v992_v51  ;;  %v729_v4 = vsel %vm375_vm0, %v692_v57, 0.0 }
  0xf6   : > { %v725_v58 = vsel %vm375_vm0, %v690_v50, 0.0  ;;  %590 = vst.msk [vmem:[%s1190_s5 + $0x28] sm:$0xff] %vm375_vm0, %v477_v55  ;;  %v626_v59 = vsel %vm375_vm0, %v477_v55, 0.0  ;;  %v691_v60 = vmul.f32 %v477_v55, %v477_v55  ;;  %606 = vst.msk [vmem:[%s1190_s5 + $0xa8] sm:$0xff] %vm375_vm0, %v1250_v56  ;;  %v630_v5 = vsel %vm375_vm0, %v992_v51, 0.0 }
  0xf7   : > { %v726_v61 = vadd.f32 %v725_v58, %v724_v54  ;;  %v627_v62 = vadd.f32 %v626_v59, %v625_v53  ;;  %v731_v12 = vsel %vm375_vm0, %v693_v0, 0.0 }
  0xf8   : > { %v727_v1 = vsel %vm375_vm0, %v691_v60, 0.0 }
  0xf9   : > { %v629_v2 = vadd.f32 %v628_v63, %v627_v62  ;;  %v728_v3 = vadd.f32 %v727_v1, %v726_v61 }
  0xfa   : > { %v995_v6 = vpop.f32.mrb[8].mxu0  ;;  %v1263_v7 = vpop.f32.mrb[8].mxu1 }
  0xfb   : > { %v730_v8 = vadd.f32 %v729_v4, %v728_v3  ;;  %595 = vst.msk [vmem:[%s1190_s5 + $0x50] sm:$0xff] %vm375_vm0, %v995_v6  ;;  %v490_v9 = vpop.f32.mrb[9].mxu0  ;;  %v631_v10 = vadd.f32 %v630_v5, %v629_v2  ;;  %611 = vst.msk [vmem:[%s1190_s5 + $0xd0] sm:$0xff] %vm375_vm0, %v1263_v7  ;;  %v1270_v11 = vpop.f32.mrb[9].mxu1  ;;  %v696_v22 = vmul.f32 %v995_v6, %v995_v6  ;;  %v636_v31 = vsel %vm375_vm0, %v995_v6, 0.0 }
  0xfc   : > { %593 = vst.msk [vmem:[%s1190_s5 + $0x40] sm:$0xff] %vm375_vm0, %v490_v9  ;;  %v632_v13 = vsel %vm375_vm0, %v490_v9, 0.0  ;;  %v694_v14 = vmul.f32 %v490_v9, %v490_v9  ;;  %v996_v15 = vpop.f32.mrb[10].mxu0  ;;  %609 = vst.msk [vmem:[%s1190_s5 + $0xc0] sm:$0xff] %vm375_vm0, %v1270_v11  ;;  %v1279_v16 = vpop.f32.mrb[10].mxu1  ;;  %v702_v2 = vmul.f32 %v1199_v23, %v1199_v23 }
  0xfd   : > { %v633_v17 = vadd.f32 %v632_v13, %v631_v10  ;;  %v732_v18 = vadd.f32 %v731_v12, %v730_v8  ;;  %596 = vst.msk [vmem:[%s1190_s5 + $0x58] sm:$0xff] %vm375_vm0, %v996_v15  ;;  %v493_v19 = vpop.f32.mrb[11].mxu0  ;;  %612 = vst.msk [vmem:[%s1190_s5 + $0xd8] sm:$0xff] %vm375_vm0, %v1279_v16  ;;  %v1286_v20 = vpop.f32.mrb[11].mxu1  ;;  %v697_v32 = vmul.f32 %v996_v15, %v996_v15  ;;  %v737_v36 = vsel %vm375_vm0, %v696_v22, 0.0 }
  0xfe   : > { %v733_v24 = vsel %vm375_vm0, %v694_v14, 0.0  ;;  %594 = vst.msk [vmem:[%s1190_s5 + $0x48] sm:$0xff] %vm375_vm0, %v493_v19  ;;  %v634_v25 = vsel %vm375_vm0, %v493_v19, 0.0  ;;  %v695_v27 = vmul.f32 %v493_v19, %v493_v19  ;;  %610 = vst.msk [vmem:[%s1190_s5 + $0xc8] sm:$0xff] %vm375_vm0, %v1286_v20  ;;  %v638_v37 = vsel %vm375_vm0, %v996_v15, 0.0 }
  0xff   : > { %v734_v29 = vadd.f32 %v733_v24, %v732_v18  ;;  %v635_v30 = vadd.f32 %v634_v25, %v633_v17  ;;  %v739_v45 = vsel %vm375_vm0, %v697_v32, 0.0  ;;  %v648_v8 = vsel %vm375_vm0, %v1199_v23, 0.0 }
 0x100   : > { %v735_v33 = vsel %vm375_vm0, %v695_v27, 0.0  ;;  %v749_v13 = vsel %vm375_vm0, %v702_v2, 0.0  ;;  %v703_v14 = vmul.f32 %v1213_v28, %v1213_v28  ;;  %v704_v18 = vmul.f32 %v1192_v21, %v1192_v21 }
 0x101   : > { %v637_v34 = vadd.f32 %v636_v31, %v635_v30  ;;  %v736_v35 = vadd.f32 %v735_v33, %v734_v29  ;;  %v650_v19 = vsel %vm375_vm0, %v1213_v28, 0.0  ;;  %v652_v23 = vsel %vm375_vm0, %v1192_v21, 0.0 }
 0x102   : > { %v999_v38 = vpop.f32.mrb[12].mxu0  ;;  %v1299_v39 = vpop.f32.mrb[12].mxu1  ;;  %v705_v25 = vmul.f32 %v1206_v26, %v1206_v26  ;;  %v751_v27 = vsel %vm375_vm0, %v703_v14, 0.0  ;;  %v706_v29 = vmul.f32 %v1234_v47, %v1234_v47  ;;  %v753_v32 = vsel %vm375_vm0, %v704_v18, 0.0 }
 0x103   : > { %v738_v40 = vadd.f32 %v737_v36, %v736_v35  ;;  %599 = vst.msk [vmem:[%s1190_s5 + $0x70] sm:$0xff] %vm375_vm0, %v999_v38  ;;  %v506_v41 = vpop.f32.mrb[13].mxu0  ;;  %v639_v42 = vadd.f32 %v638_v37, %v637_v34  ;;  %615 = vst.msk [vmem:[%s1190_s5 + $0xf0] sm:$0xff] %vm375_vm0, %v1299_v39  ;;  %v1306_v44 = vpop.f32.mrb[13].mxu1  ;;  %v700_v57 = vmul.f32 %v999_v38, %v999_v38  ;;  %v644_v63 = vsel %vm375_vm0, %v999_v38, 0.0 }
 0x104   : > { %597 = vst.msk [vmem:[%s1190_s5 + $0x60] sm:$0xff] %vm375_vm0, %v506_v41  ;;  %v640_v46 = vsel %vm375_vm0, %v506_v41, 0.0  ;;  %v698_v48 = vmul.f32 %v506_v41, %v506_v41  ;;  %v1000_v49 = vpop.f32.mrb[14].mxu0  ;;  %613 = vst.msk [vmem:[%s1190_s5 + $0xe0] sm:$0xff] %vm375_vm0, %v1306_v44  ;;  %v1315_v50 = vpop.f32.mrb[14].mxu1  ;;  %v654_v28 = vsel %vm375_vm0, %v1206_v26, 0.0  ;;  %v707_v37 = vmul.f32 %v1250_v56, %v1250_v56 }
 0x105   : > { %v641_v51 = vadd.f32 %v640_v46, %v639_v42  ;;  %v740_v53 = vadd.f32 %v739_v45, %v738_v40  ;;  %600 = vst.msk [vmem:[%s1190_s5 + $0x78] sm:$0xff] %vm375_vm0, %v1000_v49  ;;  %v509_v54 = vpop.f32.mrb[15].mxu0  ;;  %616 = vst.msk [vmem:[%s1190_s5 + $0xf8] sm:$0xff] %vm375_vm0, %v1315_v50  ;;  %v1322_v55 = vpop.f32.mrb[15].mxu1  ;;  %v701_v0 = vmul.f32 %v1000_v49, %v1000_v49  ;;  %v745_v5 = vsel %vm375_vm0, %v700_v57, 0.0 }
 0x106   : > { %v741_v58 = vsel %vm375_vm0, %v698_v48, 0.0  ;;  %598 = vst.msk [vmem:[%s1190_s5 + $0x68] sm:$0xff] %vm375_vm0, %v509_v54  ;;  %v642_v59 = vsel %vm375_vm0, %v509_v54, 0.0  ;;  %v699_v60 = vmul.f32 %v509_v54, %v509_v54  ;;  %614 = vst.msk [vmem:[%s1190_s5 + $0xe8] sm:$0xff] %vm375_vm0, %v1322_v55  ;;  %v646_v6 = vsel %vm375_vm0, %v1000_v49, 0.0 }
 0x107   : > { %v742_v61 = vadd.f32 %v741_v58, %v740_v53  ;;  %v643_v62 = vadd.f32 %v642_v59, %v641_v51  ;;  %v747_v12 = vsel %vm375_vm0, %v701_v0, 0.0  ;;  %v656_v33 = vsel %vm375_vm0, %v1234_v47, 0.0 }
 0x108   : > { %v743_v1 = vsel %vm375_vm0, %v699_v60, 0.0  ;;  %v755_v35 = vsel %vm375_vm0, %v705_v25, 0.0  ;;  %v757_v36 = vsel %vm375_vm0, %v706_v29, 0.0  ;;  %v708_v41 = vmul.f32 %v1227_v43, %v1227_v43 }
 0x109   : > { %v645_v3 = vadd.f32 %v644_v63, %v643_v62  ;;  %v744_v4 = vadd.f32 %v743_v1, %v742_v61  ;;  %v658_v26 = vsel %vm375_vm0, %v1250_v56, 0.0  ;;  %v660_v47 = vsel %vm375_vm0, %v1227_v43, 0.0 }
 0x10a   : > { %v709_v46 = vmul.f32 %v1243_v52, %v1243_v52  ;;  %v759_v48 = vsel %vm375_vm0, %v707_v37, 0.0  ;;  %v710_v49 = vmul.f32 %v1270_v11, %v1270_v11  ;;  %v761_v54 = vsel %vm375_vm0, %v708_v41, 0.0 }
 0x10b   : > { %v746_v9 = vadd.f32 %v745_v5, %v744_v4  ;;  %v647_v10 = vadd.f32 %v646_v6, %v645_v3  ;;  %v662_v56 = vsel %vm375_vm0, %v1243_v52, 0.0  ;;  %v664_v57 = vsel %vm375_vm0, %v1270_v11, 0.0 }
 0x10c   : > { %v763_v59 = vsel %vm375_vm0, %v709_v46, 0.0  ;;  %v765_v60 = vsel %vm375_vm0, %v710_v49, 0.0  ;;  %v711_v61 = vmul.f32 %v1286_v20, %v1286_v20  ;;  %v712_v0 = vmul.f32 %v1263_v7, %v1263_v7 }
 0x10d   : > { %v649_v15 = vadd.f32 %v648_v8, %v647_v10  ;;  %v748_v17 = vadd.f32 %v747_v12, %v746_v9  ;;  %v666_v52 = vsel %vm375_vm0, %v1286_v20, 0.0  ;;  %v668_v11 = vsel %vm375_vm0, %v1263_v7, 0.0 }
 0x10e   : > { %v713_v3 = vmul.f32 %v1279_v16, %v1279_v16  ;;  %v767_v4 = vsel %vm375_vm0, %v711_v61, 0.0  ;;  %v714_v5 = vmul.f32 %v1306_v44, %v1306_v44  ;;  %v769_v9 = vsel %vm375_vm0, %v712_v0, 0.0 }
 0x10f   : > { %v750_v22 = vadd.f32 %v749_v13, %v748_v17  ;;  %v651_v24 = vadd.f32 %v650_v19, %v649_v15  ;;  %v670_v20 = vsel %vm375_vm0, %v1279_v16, 0.0  ;;  %v672_v10 = vsel %vm375_vm0, %v1306_v44, 0.0 }
 0x110   : > { %v771_v13 = vsel %vm375_vm0, %v713_v3, 0.0  ;;  %v773_v14 = vsel %vm375_vm0, %v714_v5, 0.0  ;;  %v715_v15 = vmul.f32 %v1322_v55, %v1322_v55  ;;  %v716_v19 = vmul.f32 %v1299_v39, %v1299_v39 }
 0x111   : > { %v653_v30 = vadd.f32 %v652_v23, %v651_v24  ;;  %v752_v31 = vadd.f32 %v751_v27, %v750_v22  ;;  %v674_v16 = vsel %vm375_vm0, %v1322_v55, 0.0  ;;  %v676_v24 = vsel %vm375_vm0, %v1299_v39, 0.0 }
 0x112   : > { %v717_v23 = vmul.f32 %v1315_v50, %v1315_v50  ;;  %v775_v25 = vsel %vm375_vm0, %v715_v15, 0.0 }
 0x113   : > { %v754_v34 = vadd.f32 %v753_v32, %v752_v31  ;;  %v655_v21 = vadd.f32 %v654_v28, %v653_v30  ;;  %v777_v30 = vsel %vm375_vm0, %v716_v19, 0.0  ;;  %v678_v31 = vsel %vm375_vm0, %v1315_v50, 0.0 }
 0x114   : > { %v779_v28 = vsel %vm375_vm0, %v717_v23, 0.0 }
 0x115   : > { %v657_v38 = vadd.f32 %v656_v33, %v655_v21  ;;  %v756_v40 = vadd.f32 %v755_v35, %v754_v34  ;;  %v787_v35 = vlaneseq }
 0x117   : > { %v758_v42 = vadd.f32 %v757_v36, %v756_v40  ;;  %v659_v45 = vadd.f32 %v658_v26, %v657_v38  ;;  %v788_v41 = vshrl.u32 %v787_v35, 7 }
 0x119   : > { %v661_v51 = vadd.f32 %v660_v47, %v659_v45  ;;  %v760_v53 = vadd.f32 %v759_v48, %v758_v42  ;;  %vm790_vm1 = vcmp.eq.s32.totalorder %v788_v41, 1  ;;  %vm789_vm2 = vcmp.eq.s32.totalorder %v788_v41, 0 }
 0x11b   : > { %v762_v58 = vadd.f32 %v761_v54, %v760_v53  ;;  %v663_v43 = vadd.f32 %v662_v56, %v661_v51 }
 0x11d   : > { %v665_v62 = vadd.f32 %v664_v57, %v663_v43  ;;  %v764_v63 = vadd.f32 %v763_v59, %v762_v58 }
 0x11f   : > { %v766_v1 = vadd.f32 %v765_v60, %v764_v63  ;;  %v667_v2 = vadd.f32 %v666_v52, %v665_v62 }
 0x121   : > { %v669_v6 = vadd.f32 %v668_v11, %v667_v2  ;;  %v768_v8 = vadd.f32 %v767_v4, %v766_v1 }
 0x123   : > { %v770_v12 = vadd.f32 %v769_v9, %v768_v8  ;;  %v671_v7 = vadd.f32 %v670_v20, %v669_v6 }
 0x125   : > { %v673_v17 = vadd.f32 %v672_v10, %v671_v7  ;;  %v772_v18 = vadd.f32 %v771_v13, %v770_v12 }
 0x127   : > { %v774_v22 = vadd.f32 %v773_v14, %v772_v18  ;;  %v675_v44 = vadd.f32 %v674_v16, %v673_v17 }
 0x129   : > { %v677_v27 = vadd.f32 %v676_v24, %v675_v44  ;;  %v776_v29 = vadd.f32 %v775_v25, %v774_v22 }
 0x12b   : > { %v679_v32 = vadd.f32 %v678_v31, %v677_v27  ;;  %v778_v55 = vadd.f32 %v777_v30, %v776_v29 }
 0x12d   : > { %v680_v33 = vrot.slane %v679_v32, 4  ;;  %v780_v34 = vadd.f32 %v779_v28, %v778_v55 }
 0x12f   : > { %v681_v39 = vadd.f32 %v680_v33, %v679_v32  ;;  %v781_v21 = vrot.slane %v780_v34, 4 }
 0x131   : > { %v682_v36 = vrot.slane %v681_v39, 2  ;;  %v782_v37 = vadd.f32 %v781_v21, %v780_v34 }
 0x133   : > { %v683_v38 = vadd.f32 %v682_v36, %v681_v39  ;;  %v783_v40 = vrot.slane %v782_v37, 2 }
 0x135   : > { %v784_v26 = vadd.f32 %v783_v40, %v782_v37  ;;  %v684_v42 = vrot.slane %v683_v38, 1 }
 0x137   : > { %v785_v50 = vrot.slane %v784_v26, 1  ;;  %v685_v47 = vadd.f32 %v684_v42, %v683_v38 }
 0x139   : > { %v786_v45 = vadd.f32 %v785_v50, %v784_v26 }
 0x13b   : > { %v791_v46 = vsel %vm790_vm1, %v786_v45, 0.0 }
 0x13c   : > { %v792_v48 = vsel %vm789_vm2, %v685_v47, %v791_v46 }
 0x13d   : > { %793 = vst.msk [vmem:[%s229_s9] sm:$0xff] %vm375_vm0, %v792_v48 }
 0x13e PF: > { %s14_s14 = sadd.s32 1, %s1091_s14   ;;  %s1435_s12 = smov %s1087_s13 }
 0x13f   : > { %p11_p6 = scmp.ge.s32.totalorder %s14_s14, 4   ;;  %s1436_s13 = smov %s1438_s15 }
 0x141   :  { %13 = sbr.rel (!%p11_p6) target bundleno = 2 (0x2), region = 73 }

// kernel: block_forward.23
= control target key start
LH: loop header
LB: loop body
LE: loop exit
PB: predicated region body
PF: predicated region fallthrough
CT: control target
= control target key end

     0   :  { %8 = vsyncpa [#allocation3], 0  ;;  %s1330_s0 = inlined_call_operand.vmem [shape: f32[512,64], index: 0, kind: input, shape index: {}]   ;;  %s1331_s1 = inlined_call_operand.vmem [shape: f32[1,64], index: 1, kind: input, shape index: {}]   ;;  %s1332_s2 = inlined_call_operand.vmem [shape: f32[1,64], index: 2, kind: input, shape index: {}]   ;;  %s1333_s3 = inlined_call_operand.hbm [shape: f32[512,64], index: 3, kind: output, shape index: {}]  }
   0x1   :  { %10 = vsyncpa [#allocation3 + $0x1], 0  ;;  %s918_s12 = smov 0   ;;  %s920_s13 = smov 0  }
   0x2   :  { %s922_s14 = smov 0   ;;  %s924_s15 = smov 0  }
   0x3 LB: > { %s939_s16 = sadd.s32 4294967295, %s893_s15   ;;  %s615_s17 = sadd.s32 4294967294, %s893_s15   ;;  %s893_s15 = sphi %s924_s15, %s1339_s15   ;;  %s889_s14 = sphi %s922_s14, %s1338_s14   ;;  %s885_s13 = sphi %s920_s13, %s1337_s13   ;;  %s881_s12 = sphi %s918_s12, %s1336_s12  }
   0x4   : > { %s943_s18 = sadd.s32 1, %s893_s15   ;;  %s91_s19 = sadd.s32 1, %s889_s14 }
   0x5   : > { %s88_s20 = ssub.s32 %s893_s15, %s943_s18  ;;  %p101_p0 = scmp.ne.s32.totalorder %s889_s14, %s885_s13 }
   0x6   : > { %p89_p1 = scmp.eq.s32.totalorder %s88_s20, 0  ;;  %p102_p2 = scmp.eq.s32.totalorder %s939_s16, 1 }
   0x7   : > { %p107_p3 = scmp.ne.s32.totalorder %s885_s13, %s881_s12  ;;  %p108_p4 = scmp.eq.s32.totalorder %s615_s17, 1 }
   0x8   : > { %s954_s21 = scalar_select %p89_p1, %s889_s14, %s91_s19  }
   0x9   : > { %p956_p5 = por %p102_p2, %p101_p0  ;;  %p960_p6 = por %p108_p4, %p107_p3 }
   0xa   : > { %p618_p7 = scmp.ge.s32.totalorder %s893_s15, 1  ;;  %p141_p8 = scmp.lt.s32.totalorder %s893_s15, 3 }
   0xc   : > { %p142_p9 = pnand %p618_p7, %p141_p8 }
   0xd   : > { %s620_s24 = sshll.u32 (!%p142_p9), %s939_s16, 5  ;;  %v970_v0 = vld [vmem:[%s1331_s1] ss:$0 sm:$0xff] (!%p142_p9)  ;;  %s162_s6 = sand.u32 (!%p142_p9), 1, %s885_s13   ;;  %vm506_vm0 = vcmask (!%p142_p9), 523264  }
   0xe   : > { %145 = sbr.rel (%p142_p9) target bundleno = 129 (0x81), region = 32  ;;  %p166_p10 = scmp.lt.s32.totalorder (!%p142_p9), %s620_s24, 63  ;;  %v980_v1 = vld [vmem:[%s1332_s2] ss:$0 sm:$0xff] (!%p142_p9) }
   0xf   : > { %s1090_s7 = sshll.u32 (!%p142_p9), %s162_s6, 8  ;;  %s661_s9 = sshll.u32 (!%p142_p9), %s939_s16, 12 }
  0x10   : > { %s1122_s8 = scalar_lea.vmem (!%p142_p9), [#allocation2], %s1090_s7  ;;  %s1276_s17 = scalar_lea.hbm (!%p142_p9), %s1333_s3, %s661_s9 }
  0x11   : > { %s553_s10 = sshll.u32 (!%p142_p9), %s1122_s8, 4  ;;  %s1289_s19 = scalar_lea.sflag (!%p142_p9), [#allocation3], %s162_s6  ;;  %s1278_s10 = int_to_ptr.vmem [resolvable:$true] %s553_s10 }
  0x12   : > { %s831_s20 = scalar_lea.vmem (!%p142_p9), %s1278_s10, 4096 }
  0x13   : > { %p832_p11 = scmp.ne.s32.totalorder (!%p142_p9), %s1278_s10, %s831_s20 }
  0x15   : > { %s1341_s24 = smov (!%p166_p10, %s620_s24), 63  ;;  %p833_p12 = pnand %p832_p11, %p956_p5 }
  0x16   : > { %s621_s25 = sshll.u32 %s1341_s24, 3  ;;  %s895_s24 = smov [#allocation2]  }
  0x17   : > { %s975_s30 = scalar_lea.vmem %s1330_s0, %s621_s25  ;;  %p834_p13 = pneg %p833_p12 }
  0x18   : > { %v172_v2 = vld [vmem:[%s975_s30] sm:$0xff]  ;;  %v173_v3 = vld [vmem:[%s975_s30 + $0x8] sm:$0xff]  ;;  %v174_v4 = vld [vmem:[%s975_s30 + $0x10] sm:$0xff]  ;;  %s835_s25 = sshll.u32 %s895_s24, 4  ;;  %s836_s25 = int_to_ptr.vmem [resolvable:$false] %s835_s25 }
  0x19   : > { %v211_v5 = vmul.f32 %v970_v0, %v172_v2  ;;  %v212_v6 = vmul.f32 %v970_v0, %v173_v3  ;;  %v213_v7 = vmul.f32 %v970_v0, %v174_v4  ;;  %v175_v8 = vld [vmem:[%s975_s30 + $0x18] sm:$0xff]  ;;  %v176_v9 = vld [vmem:[%s975_s30 + $0x20] sm:$0xff]  ;;  %v177_v10 = vld [vmem:[%s975_s30 + $0x28] sm:$0xff]  ;;  %s837_s26 = scalar_lea.vmem %s836_s25, 8192  ;;  %p838_p0 = scmp.lt.s32.totalorder %s1278_s10, %s836_s25 }
  0x1a   : > { %v214_v11 = vmul.f32 %v970_v0, %v175_v8  ;;  %v215_v12 = vmul.f32 %v970_v0, %v176_v9  ;;  %v216_v13 = vmul.f32 %v970_v0, %v177_v10  ;;  %v178_v14 = vld [vmem:[%s975_s30 + $0x30] sm:$0xff]  ;;  %v179_v15 = vld [vmem:[%s975_s30 + $0x38] sm:$0xff]  ;;  %v180_v20 = vld [vmem:[%s975_s30 + $0x40] sm:$0xff]  ;;  %p839_p1 = scmp.lt.s32.totalorder %s837_s26, %s831_s20 }
  0x1b   : > { %v997_v16 = vadd.f32 %v980_v1, %v211_v5  ;;  %v1000_v17 = vadd.f32 %v980_v1, %v212_v6  ;;  %v1003_v18 = vadd.f32 %v980_v1, %v213_v7  ;;  %v217_v19 = vmul.f32 %v970_v0, %v178_v14  ;;  %v181_v25 = vld [vmem:[%s975_s30 + $0x48] sm:$0xff]  ;;  %v182_v26 = vld [vmem:[%s975_s30 + $0x50] sm:$0xff]  ;;  %v183_v27 = vld [vmem:[%s975_s30 + $0x58] sm:$0xff] }
  0x1c   : > { %v1008_v21 = vadd.f32 %v980_v1, %v214_v11  ;;  %v1011_v22 = vadd.f32 %v980_v1, %v215_v12  ;;  %v1014_v23 = vadd.f32 %v980_v1, %v216_v13  ;;  %v218_v24 = vmul.f32 %v970_v0, %v179_v15  ;;  %v184_v35 = vld [vmem:[%s975_s30 + $0x60] sm:$0xff]  ;;  %v185_v53 = vld [vmem:[%s975_s30 + $0x68] sm:$0xff]  ;;  %v186_v55 = vld [vmem:[%s975_s30 + $0x70] sm:$0xff]  ;;  %p840_p2 = por %p839_p1, %p838_p0 }
  0x1d   : > { %v624_v28 = vmul.f32 -1.442695, %v997_v16  ;;  %v625_v29 = vmul.f32 -1.442695, %v1000_v17  ;;  %v626_v30 = vmul.f32 -1.442695, %v1003_v18  ;;  %v1024_v31 = vadd.f32 %v980_v1, %v217_v19 }
  0x1e   : > { %v627_v32 = vmul.f32 -1.442695, %v1008_v21  ;;  %v628_v33 = vmul.f32 -1.442695, %v1011_v22  ;;  %v1029_v34 = vadd.f32 %v980_v1, %v218_v24  ;;  %v629_v36 = vmul.f32 -1.442695, %v1014_v23  ;;  %p841_p3 = pnand %p840_p2, %p834_p13 }
  0x1f   : > { %703 = vpow2.f32 %v624_v28  ;;  %v219_v37 = vmul.f32 %v970_v0, %v180_v20  ;;  %v220_v38 = vmul.f32 %v970_v0, %v181_v25  ;;  %v630_v39 = vmul.f32 -1.442695, %v1024_v31  ;;  %v187_v56 = vld [vmem:[%s975_s30 + $0x78] sm:$0xff]  ;;  %v188_v61 = vld [vmem:[%s975_s30 + $0x80] sm:$0xff]  ;;  %v189_v4 = vld [vmem:[%s975_s30 + $0x88] sm:$0xff] }
  0x20   : > { %705 = vpow2.f32 %v625_v29  ;;  %v221_v40 = vmul.f32 %v970_v0, %v182_v26  ;;  %v222_v41 = vmul.f32 %v970_v0, %v183_v27  ;;  %v223_v44 = vmul.f32 %v970_v0, %v184_v35  ;;  %v190_v11 = vld [vmem:[%s975_s30 + $0x90] sm:$0xff]  ;;  %v191_v25 = vld [vmem:[%s975_s30 + $0x98] sm:$0xff]  ;;  %v192_v35 = vld [vmem:[%s975_s30 + $0xa0] sm:$0xff] }
  0x21   : > { %707 = vpow2.f32 %v626_v30  ;;  %v1039_v42 = vadd.f32 %v980_v1, %v219_v37  ;;  %v1042_v43 = vadd.f32 %v980_v1, %v220_v38  ;;  %v631_v45 = vmul.f32 -1.442695, %v1029_v34 }
  0x22   : > { %709 = vpow2.f32 %v627_v32  ;;  %v1047_v46 = vadd.f32 %v980_v1, %v221_v40  ;;  %v1050_v47 = vadd.f32 %v980_v1, %v222_v41  ;;  %v1054_v49 = vadd.f32 %v980_v1, %v223_v44  ;;  %v193_v40 = vld [vmem:[%s975_s30 + $0xa8] sm:$0xff] }
  0x23   : > { %711 = vpow2.f32 %v628_v33  ;;  %v632_v48 = vmul.f32 -1.442695, %v1039_v42  ;;  %v633_v50 = vmul.f32 -1.442695, %v1042_v43  ;;  %v224_v58 = vmul.f32 %v970_v0, %v185_v53 }
  0x24   : > { %713 = vpow2.f32 %v629_v36  ;;  %v634_v51 = vmul.f32 -1.442695, %v1047_v46  ;;  %v635_v52 = vmul.f32 -1.442695, %v1050_v47  ;;  %v636_v54 = vmul.f32 -1.442695, %v1054_v49 }
  0x25   : > { %715 = vpow2.f32 %v630_v39  ;;  %v225_v2 = vmul.f32 %v970_v0, %v186_v55  ;;  %v226_v3 = vmul.f32 %v970_v0, %v187_v56  ;;  %v1069_v9 = vadd.f32 %v980_v1, %v224_v58  ;;  %v195_v55 = vld [vmem:[%s975_s30 + $0xb8] sm:$0xff] }
  0x26   : > { %717 = vpow2.f32 %v631_v45  ;;  %v227_v10 = vmul.f32 %v970_v0, %v188_v61  ;;  %v228_v14 = vmul.f32 %v970_v0, %v189_v4  ;;  %v229_v28 = vmul.f32 %v970_v0, %v190_v11 }
  0x27   : > { %719 = vpow2.f32 %v632_v48  ;;  %v1076_v20 = vadd.f32 %v980_v1, %v225_v2  ;;  %v1079_v24 = vadd.f32 %v980_v1, %v226_v3  ;;  %v637_v32 = vmul.f32 -1.442695, %v1069_v9  ;;  %v197_v3 = vld [vmem:[%s975_s30 + $0xc8] sm:$0xff] }
  0x28   : > { %721 = vpow2.f32 %v633_v50  ;;  %v1085_v33 = vadd.f32 %v980_v1, %v227_v10  ;;  %v1093_v38 = vadd.f32 %v980_v1, %v228_v14  ;;  %v230_v39 = vmul.f32 %v970_v0, %v191_v25  ;;  %v194_v50 = vld [vmem:[%s975_s30 + $0xb0] sm:$0xff] }
  0x29   : > { %v704_v57 = vpop.eup %703  ;;  %723 = vpow2.f32 %v634_v51  ;;  %v638_v45 = vmul.f32 -1.442695, %v1076_v20  ;;  %v639_v48 = vmul.f32 -1.442695, %v1079_v24  ;;  %v1101_v53 = vadd.f32 %v980_v1, %v229_v28 }
  0x2a   : > { %v706_v59 = vpop.eup %705  ;;  %v378_v60 = vadd.f32 1.0, %v704_v57  ;;  %725 = vpow2.f32 %v635_v52  ;;  %v640_v58 = vmul.f32 -1.442695, %v1085_v33  ;;  %v233_v2 = vmul.f32 %v970_v0, %v194_v50 }
  0x2b   : > { %v708_v62 = vpop.eup %707  ;;  %v379_v63 = vadd.f32 1.0, %v706_v59  ;;  %727 = vpow2.f32 %v636_v54  ;;  %v231_v54 = vmul.f32 %v970_v0, %v192_v35  ;;  %v232_v59 = vmul.f32 %v970_v0, %v193_v40 }
  0x2c   : > { %v710_v5 = vpop.eup %709  ;;  %729 = vrcp.f32 %v378_v60  ;;  %v380_v6 = vadd.f32 1.0, %v708_v62  ;;  %v196_v60 = vld [vmem:[%s975_s30 + $0xc0] sm:$0xff]  ;;  %v236_v14 = vmul.f32 %v970_v0, %v197_v3  ;;  %v642_v25 = vmul.f32 -1.442695, %v1101_v53 }
  0x2d   : > { %v712_v7 = vpop.eup %711  ;;  %731 = vrcp.f32 %v379_v63  ;;  %v381_v8 = vadd.f32 1.0, %v710_v5  ;;  %v641_v63 = vmul.f32 -1.442695, %v1093_v38  ;;  %v1118_v11 = vadd.f32 %v980_v1, %v231_v54 }
  0x2e   : > { %v714_v12 = vpop.eup %713  ;;  %733 = vrcp.f32 %v380_v6  ;;  %v382_v13 = vadd.f32 1.0, %v712_v7  ;;  %v1113_v6 = vadd.f32 %v980_v1, %v230_v39  ;;  %v234_v7 = vmul.f32 %v970_v0, %v195_v55 }
  0x2f   : > { %v716_v15 = vpop.eup %715  ;;  %735 = vrcp.f32 %v381_v8  ;;  %v383_v19 = vadd.f32 1.0, %v714_v12  ;;  %v235_v12 = vmul.f32 %v970_v0, %v196_v60  ;;  %v1157_v39 = vadd.f32 %v980_v1, %v236_v14  ;;  %v203_v14 = vld [vmem:[%s975_s30 + $0xf8] sm:$0xff] }
  0x30   : > { %v718_v26 = vpop.eup %717  ;;  %737 = vrcp.f32 %v382_v13  ;;  %v384_v27 = vadd.f32 1.0, %v716_v15  ;;  %v643_v28 = vmul.f32 -1.442695, %v1113_v6 }
  0x31   : > { %v720_v29 = vpop.eup %719  ;;  %739 = vrcp.f32 %v383_v19  ;;  %v385_v30 = vadd.f32 1.0, %v718_v26  ;;  %v1136_v26 = vadd.f32 %v980_v1, %v233_v2  ;;  %v1150_v35 = vadd.f32 %v980_v1, %v235_v12 }
  0x32   : > { %v722_v36 = vpop.eup %721  ;;  %741 = vrcp.f32 %v384_v27  ;;  %v386_v37 = vadd.f32 1.0, %v720_v29  ;;  %v1143_v29 = vadd.f32 %v980_v1, %v234_v7 }
  0x33   : > { %v724_v41 = vpop.eup %723  ;;  %743 = vrcp.f32 %v385_v30  ;;  %v387_v44 = vadd.f32 1.0, %v722_v36 }
  0x34   : > { %v726_v51 = vpop.eup %725  ;;  %745 = vrcp.f32 %v386_v37  ;;  %v388_v52 = vadd.f32 1.0, %v724_v41  ;;  %v646_v41 = vmul.f32 -1.442695, %v1136_v26 }
  0x35   : > { %v728_v56 = vpop.eup %727  ;;  %747 = vrcp.f32 %v387_v44  ;;  %v389_v57 = vadd.f32 1.0, %v726_v51 }
  0x36   : > { %v730_v61 = vpop.eup %729  ;;  %749 = vrcp.f32 %v388_v52  ;;  %v390_v62 = vadd.f32 1.0, %v728_v56 }
  0x37   : > { %v732_v4 = vpop.eup %731  ;;  %v474_v5 = vmul.f32 %v730_v61, %v997_v16  ;;  %751 = vrcp.f32 %v389_v57 }
  0x38   : > { %v734_v8 = vpop.eup %733  ;;  %v475_v10 = vmul.f32 %v732_v4, %v1000_v17  ;;  %753 = vrcp.f32 %v390_v62  ;;  %v1128_v17 = vadd.f32 %v980_v1, %v232_v59  ;;  %v201_v4 = vld [vmem:[%s975_s30 + $0xe8] sm:$0xff] }
  0x39   : > { %v736_v13 = vpop.eup %735  ;;  %507 = vst.msk [vmem:[%s1122_s8] sm:$0xff] %vm506_vm0, %v474_v5  ;;  %v476_v16 = vmul.f32 %v734_v8, %v1003_v18  ;;  %755 = vpow2.f32 %v637_v32  ;;  %v644_v32 = vmul.f32 -1.442695, %v1118_v11 }
  0x3a   : > { %v738_v15 = vpop.eup %737  ;;  %508 = vst.msk [vmem:[%s1122_s8 + $0x8] sm:$0xff] %vm506_vm0, %v475_v10  ;;  %v477_v19 = vmul.f32 %v736_v13, %v1008_v21  ;;  %757 = vpow2.f32 %v638_v45  ;;  %v645_v37 = vmul.f32 -1.442695, %v1128_v17  ;;  %v647_v45 = vmul.f32 -1.442695, %v1143_v29  ;;  %v202_v10 = vld [vmem:[%s975_s30 + $0xf0] sm:$0xff] }
  0x3b   : > { %v740_v18 = vpop.eup %739  ;;  %509 = vst.msk [vmem:[%s1122_s8 + $0x10] sm:$0xff] %vm506_vm0, %v476_v16  ;;  %v478_v27 = vmul.f32 %v738_v15, %v1011_v22  ;;  %759 = vpow2.f32 %v639_v48 }
  0x3c   : > { %v742_v21 = vpop.eup %741  ;;  %510 = vst.msk [vmem:[%s1122_s8 + $0x18] sm:$0xff] %vm506_vm0, %v477_v19  ;;  %v479_v30 = vmul.f32 %v740_v18, %v1014_v23  ;;  %761 = vpow2.f32 %v640_v58  ;;  %v198_v58 = vld [vmem:[%s975_s30 + $0xd0] sm:$0xff] }
  0x3d   : > { %v744_v22 = vpop.eup %743  ;;  %511 = vst.msk [vmem:[%s1122_s8 + $0x20] sm:$0xff] %vm506_vm0, %v478_v27  ;;  %v480_v36 = vmul.f32 %v742_v21, %v1024_v31  ;;  %763 = vpow2.f32 %v641_v63  ;;  %v237_v3 = vmul.f32 %v970_v0, %v198_v58  ;;  %v241_v21 = vmul.f32 %v970_v0, %v202_v10 }
  0x3e   : > { %v746_v23 = vpop.eup %745  ;;  %512 = vst.msk [vmem:[%s1122_s8 + $0x28] sm:$0xff] %vm506_vm0, %v479_v30  ;;  %v481_v40 = vmul.f32 %v744_v22, %v1029_v34  ;;  %765 = vpow2.f32 %v642_v25  ;;  %v648_v34 = vmul.f32 -1.442695, %v1150_v35  ;;  %v240_v25 = vmul.f32 %v970_v0, %v201_v4 }
  0x3f   : > { %v748_v44 = vpop.eup %747  ;;  %513 = vst.msk [vmem:[%s1122_s8 + $0x30] sm:$0xff] %vm506_vm0, %v480_v36  ;;  %v482_v31 = vmul.f32 %v746_v23, %v1039_v42  ;;  %767 = vpow2.f32 %v643_v28  ;;  %v649_v42 = vmul.f32 -1.442695, %v1157_v39  ;;  %v1196_v28 = vadd.f32 %v980_v1, %v237_v3 }
  0x40   : > { %v750_v48 = vpop.eup %749  ;;  %514 = vst.msk [vmem:[%s1122_s8 + $0x38] sm:$0xff] %vm506_vm0, %v481_v40  ;;  %v483_v50 = vmul.f32 %v748_v44, %v1042_v43  ;;  %769 = vpow2.f32 %v644_v32  ;;  %v242_v36 = vmul.f32 %v970_v0, %v203_v14 }
  0x41   : > { %v752_v51 = vpop.eup %751  ;;  %515 = vst.msk [vmem:[%s1122_s8 + $0x40] sm:$0xff] %vm506_vm0, %v482_v31  ;;  %v484_v52 = vmul.f32 %v750_v48, %v1047_v46  ;;  %771 = vpow2.f32 %v645_v37  ;;  %v1207_v31 = vadd.f32 %v980_v1, %v240_v25 }
  0x42   : > { %v754_v54 = vpop.eup %753  ;;  %516 = vst.msk [vmem:[%s1122_s8 + $0x48] sm:$0xff] %vm506_vm0, %v483_v50  ;;  %v485_v43 = vmul.f32 %v752_v51, %v1050_v47  ;;  %773 = vpow2.f32 %v646_v41  ;;  %v199_v47 = vld [vmem:[%s975_s30 + $0xd8] sm:$0xff]  ;;  %v650_v50 = vmul.f32 -1.442695, %v1196_v28 }
  0x43   : > { %v756_v55 = vpop.eup %755  ;;  %517 = vst.msk [vmem:[%s1122_s8 + $0x50] sm:$0xff] %vm506_vm0, %v484_v52  ;;  %v486_v56 = vmul.f32 %v754_v54, %v1054_v49  ;;  %775 = vpow2.f32 %v647_v45  ;;  %v200_v49 = vld [vmem:[%s975_s30 + $0xe0] sm:$0xff]  ;;  %v238_v8 = vmul.f32 %v970_v0, %v199_v47 }
  0x44   : > { %v758_v57 = vpop.eup %757  ;;  %518 = vst.msk [vmem:[%s1122_s8 + $0x58] sm:$0xff] %vm506_vm0, %v485_v43  ;;  %v391_v46 = vadd.f32 1.0, %v756_v55  ;;  %777 = vpow2.f32 %v648_v34  ;;  %v239_v16 = vmul.f32 %v970_v0, %v200_v49  ;;  %v1211_v0 = vadd.f32 %v980_v1, %v241_v21 }
  0x45   : > { %v760_v59 = vpop.eup %759  ;;  %519 = vst.msk [vmem:[%s1122_s8 + $0x60] sm:$0xff] %vm506_vm0, %v486_v56  ;;  %v392_v60 = vadd.f32 1.0, %v758_v57  ;;  %779 = vpow2.f32 %v649_v42  ;;  %v1200_v22 = vadd.f32 %v980_v1, %v238_v8  ;;  %v1215_v42 = vadd.f32 %v980_v1, %v242_v36 }
  0x46   : > { %v762_v61 = vpop.eup %761  ;;  %781 = vrcp.f32 %v391_v46  ;;  %v393_v62 = vadd.f32 1.0, %v760_v59  ;;  %v1204_v40 = vadd.f32 %v980_v1, %v239_v16  ;;  %v653_v46 = vmul.f32 -1.442695, %v1207_v31 }
  0x47   : > { %v764_v63 = vpop.eup %763  ;;  %783 = vrcp.f32 %v392_v60  ;;  %v394_v2 = vadd.f32 1.0, %v762_v61  ;;  %v651_v52 = vmul.f32 -1.442695, %v1200_v22 }
  0x48   : > { %v766_v5 = vpop.eup %765  ;;  %785 = vrcp.f32 %v393_v62  ;;  %v395_v7 = vadd.f32 1.0, %v764_v63  ;;  %v652_v55 = vmul.f32 -1.442695, %v1204_v40 }
  0x49   : > { %v768_v12 = vpop.eup %767  ;;  %787 = vrcp.f32 %v394_v2  ;;  %v396_v13 = vadd.f32 1.0, %v766_v5 }
  0x4a   : > { %v770_v15 = vpop.eup %769  ;;  %789 = vrcp.f32 %v395_v7  ;;  %v397_v19 = vadd.f32 1.0, %v768_v12 }
  0x4b   : > { %v772_v18 = vpop.eup %771  ;;  %791 = vrcp.f32 %v396_v13  ;;  %v398_v27 = vadd.f32 1.0, %v770_v15 }
  0x4c   : > { %v774_v30 = vpop.eup %773  ;;  %793 = vrcp.f32 %v397_v19  ;;  %v399_v32 = vadd.f32 1.0, %v772_v18 }
  0x4d   : > { %v776_v37 = vpop.eup %775  ;;  %795 = vrcp.f32 %v398_v27  ;;  %v400_v23 = vadd.f32 1.0, %v774_v30 }
  0x4e   : > { %v778_v41 = vpop.eup %777  ;;  %797 = vrcp.f32 %v399_v32  ;;  %v401_v44 = vadd.f32 1.0, %v776_v37 }
  0x4f   : > { %v780_v45 = vpop.eup %779  ;;  %799 = vrcp.f32 %v400_v23  ;;  %v402_v48 = vadd.f32 1.0, %v778_v41 }
  0x50   : > { %v782_v34 = vpop.eup %781  ;;  %801 = vrcp.f32 %v401_v44  ;;  %v403_v51 = vadd.f32 1.0, %v780_v45 }
  0x51   : > { %v784_v54 = vpop.eup %783  ;;  %v487_v43 = vmul.f32 %v782_v34, %v1069_v9  ;;  %803 = vrcp.f32 %v402_v48  ;;  %v654_v9 = vmul.f32 -1.442695, %v1211_v0 }
  0x52   : > { %v786_v56 = vpop.eup %785  ;;  %v488_v57 = vmul.f32 %v784_v54, %v1076_v20  ;;  %805 = vrcp.f32 %v403_v51  ;;  %v655_v20 = vmul.f32 -1.442695, %v1215_v42 }
  0x53   : > { %v788_v58 = vpop.eup %787  ;;  %520 = vst.msk [vmem:[%s1122_s8 + $0x68] sm:$0xff] %vm506_vm0, %v487_v43  ;;  %v489_v1 = vmul.f32 %v786_v56, %v1079_v24  ;;  %807 = vpow2.f32 %v650_v50 }
  0x54   : > { %v790_v59 = vpop.eup %789  ;;  %521 = vst.msk [vmem:[%s1122_s8 + $0x70] sm:$0xff] %vm506_vm0, %v488_v57  ;;  %v490_v60 = vmul.f32 %v788_v58, %v1085_v33  ;;  %809 = vpow2.f32 %v651_v52 }
  0x55   : > { %v792_v47 = vpop.eup %791  ;;  %522 = vst.msk [vmem:[%s1122_s8 + $0x78] sm:$0xff] %vm506_vm0, %v489_v1  ;;  %v491_v61 = vmul.f32 %v790_v59, %v1093_v38  ;;  %811 = vpow2.f32 %v652_v55 }
  0x56   : > { %v794_v24 = vpop.eup %793  ;;  %523 = vst.msk [vmem:[%s1122_s8 + $0x80] sm:$0xff] %vm506_vm0, %v490_v60  ;;  %v492_v62 = vmul.f32 %v792_v47, %v1101_v53  ;;  %813 = vpow2.f32 %v653_v46 }
  0x57   : > { %v796_v33 = vpop.eup %795  ;;  %524 = vst.msk [vmem:[%s1122_s8 + $0x88] sm:$0xff] %vm506_vm0, %v491_v61  ;;  %v493_v49 = vmul.f32 %v794_v24, %v1113_v6  ;;  %815 = vpow2.f32 %v654_v9 }
  0x58   : > { %v798_v63 = vpop.eup %797  ;;  %525 = vst.msk [vmem:[%s1122_s8 + $0x90] sm:$0xff] %vm506_vm0, %v492_v62  ;;  %v494_v38 = vmul.f32 %v796_v33, %v1118_v11  ;;  %817 = vpow2.f32 %v655_v20 }
  0x59   : > { %v800_v2 = vpop.eup %799  ;;  %526 = vst.msk [vmem:[%s1122_s8 + $0x98] sm:$0xff] %vm506_vm0, %v493_v49  ;;  %v495_v53 = vmul.f32 %v798_v63, %v1128_v17 }
  0x5a   : > { %v802_v3 = vpop.eup %801  ;;  %527 = vst.msk [vmem:[%s1122_s8 + $0xa0] sm:$0xff] %vm506_vm0, %v494_v38  ;;  %v496_v6 = vmul.f32 %v800_v2, %v1136_v26 }
  0x5b   : > { %v804_v4 = vpop.eup %803  ;;  %528 = vst.msk [vmem:[%s1122_s8 + $0xa8] sm:$0xff] %vm506_vm0, %v495_v53  ;;  %v497_v5 = vmul.f32 %v802_v3, %v1143_v29 }
  0x5c   : > { %v806_v7 = vpop.eup %805  ;;  %529 = vst.msk [vmem:[%s1122_s8 + $0xb0] sm:$0xff] %vm506_vm0, %v496_v6  ;;  %v498_v11 = vmul.f32 %v804_v4, %v1150_v35 }
  0x5d   : > { %v808_v8 = vpop.eup %807  ;;  %530 = vst.msk [vmem:[%s1122_s8 + $0xb8] sm:$0xff] %vm506_vm0, %v497_v5  ;;  %v499_v17 = vmul.f32 %v806_v7, %v1157_v39 }
  0x5e   : > { %v810_v10 = vpop.eup %809  ;;  %531 = vst.msk [vmem:[%s1122_s8 + $0xc0] sm:$0xff] %vm506_vm0, %v498_v11  ;;  %v404_v12 = vadd.f32 1.0, %v808_v8 }
  0x5f   : > { %v812_v26 = vpop.eup %811  ;;  %532 = vst.msk [vmem:[%s1122_s8 + $0xc8] sm:$0xff] %vm506_vm0, %v499_v17  ;;  %v405_v13 = vadd.f32 1.0, %v810_v10 }
  0x60   : > { %v814_v16 = vpop.eup %813  ;;  %819 = vrcp.f32 %v404_v12  ;;  %v406_v29 = vadd.f32 1.0, %v812_v26 }
  0x61   : > { %v816_v14 = vpop.eup %815  ;;  %821 = vrcp.f32 %v405_v13  ;;  %v407_v35 = vadd.f32 1.0, %v814_v16 }
  0x62   : > { %v818_v15 = vpop.eup %817  ;;  %823 = vrcp.f32 %v406_v29  ;;  %v408_v39 = vadd.f32 1.0, %v816_v14 }
  0x63   : > { %825 = vrcp.f32 %v407_v35  ;;  %v409_v19 = vadd.f32 1.0, %v818_v15 }
  0x64   : > { %827 = vrcp.f32 %v408_v39 }
  0x65   : > { %829 = vrcp.f32 %v409_v19 }
  0x6a   : > { %v820_v25 = vpop.eup %819 }
  0x6b   : > { %v822_v18 = vpop.eup %821  ;;  %v500_v27 = vmul.f32 %v820_v25, %v1196_v28 }
  0x6c   : > { %v824_v21 = vpop.eup %823  ;;  %v501_v30 = vmul.f32 %v822_v18, %v1200_v22 }
  0x6d   : > { %v826_v32 = vpop.eup %825  ;;  %533 = vst.msk [vmem:[%s1122_s8 + $0xd0] sm:$0xff] %vm506_vm0, %v500_v27  ;;  %v502_v36 = vmul.f32 %v824_v21, %v1204_v40 }
  0x6e   : > { %v828_v37 = vpop.eup %827  ;;  %534 = vst.msk [vmem:[%s1122_s8 + $0xd8] sm:$0xff] %vm506_vm0, %v501_v30  ;;  %v503_v28 = vmul.f32 %v826_v32, %v1207_v31 }
  0x6f   : > { %v830_v23 = vpop.eup %829  ;;  %535 = vst.msk [vmem:[%s1122_s8 + $0xe0] sm:$0xff] %vm506_vm0, %v502_v36  ;;  %v504_v22 = vmul.f32 %v828_v37, %v1211_v0 }
  0x70   : > { %536 = vst.msk [vmem:[%s1122_s8 + $0xe8] sm:$0xff] %vm506_vm0, %v503_v28  ;;  %v505_v40 = vmul.f32 %v830_v23, %v1215_v42 }
  0x71   : > { %537 = vst.msk [vmem:[%s1122_s8 + $0xf0] sm:$0xff] %vm506_vm0, %v504_v22 }
  0x72   : > { %538 = vst.msk [vmem:[%s1122_s8 + $0xf8] sm:$0xff] %vm506_vm0, %v505_v40 }
  0x73   : > { %844 = shalt.err (!%p841_p3)
}
  0x74   : > { %s845_s27 = scalar_lea.hbm %s1276_s17, 4096  ;;  %s849_s30 = scalar_lea.hbm %s1333_s3, 8192 }
  0x75   : > { %p846_p4 = scmp.ne.s32.totalorder %s1276_s17, %s845_s27  ;;  %p850_p9 = scmp.lt.u32.totalorder %s1276_s17, %s1333_s3 }
  0x76   : > { %p851_p10 = scmp.lt.u32.totalorder %s849_s30, %s845_s27  ;;  %p853_p12 = scmp.lt.u32.totalorder %s845_s27, %s1276_s17 }
  0x77   : > { %p847_p7 = pnand %p846_p4, %p956_p5 }
  0x78   : > { %p852_p11 = por %p851_p10, %p850_p9 }
  0x79   : > { %p848_p8 = pneg %p847_p7 }
  0x7a   : > { %p854_p13 = por %p853_p12, %p852_p11 }
  0x7c   : > { %p855_p0 = pnand %p854_p13, %p848_p8 }
  0x7e   : > { %858 = shalt.err (!%p855_p0)
}
  0x7f   : > { %s896_s6 = smov 128   ;;  %s897_s7 = smov 8  }
  0x80   : > { %662 = dma.vmem_to_hbm [thread:$0]  (%p956_p5), %s1278_s10, 4096, %s1276_s17, %s1289_s19, %s896_s6, %s896_s6, %s897_s7  }
  0x81 PF: > { %p668_p1 = scmp.ge.s32.totalorder %s893_s15, 2  ;;  %s568_s8 = sand.u32 1, %s881_s12  }
  0x82   : > { %s569_s9 = scalar_lea.sflag [#allocation3], %s568_s8 }
  0x83   : > { %p665_p2 = pnand %p668_p1, %p960_p6 }
  0x85   : > { %876 = dma.done.wait (!%p665_p2), %s569_s9, 4096  }
  0x86   : > { %878 = vsyncadd (!%p665_p2), %s569_s9, 4294963200  ;;  %p13_p3 = scmp.ge.s32.totalorder %s943_s18, 4   ;;  %s1336_s12 = smov %s885_s13 }
  0x87   : > { %s1337_s13 = smov %s889_s14  ;;  %s1338_s14 = smov %s954_s21 }
  0x88   : > { %s1339_s15 = smov %s943_s18  ;;  %15 = sbr.rel (!%p13_p3) target bundleno = 3 (0x3), region = 67 }
  0x8f   :  { %574 = vsyncpa [#allocation3], 1 }
  0x90   :  { %576 = vsyncpa [#allocation3 + $0x1], 1 }

</bundles_post_ra>
